<compile_context>
chip_gen: v7x
topology: tpu7x:2x2x1
jax: 0.10.0
libtpu: 0.0.40
codegen_flags: <defaults>
</compile_context>

<pallas_src>
import functools

import numpy as np

import jax
import jax.numpy as jnp
from jax import lax
from jax.experimental import pallas as pl
from jax.experimental.pallas import tpu as pltpu


_VMEM = functools.partial(pl.BlockSpec, memory_space=pltpu.MemorySpace.VMEM)
_BF16 = jnp.bfloat16
_F32 = jnp.float32


# ----------------------------------------------------------------------------
# Pallas kernels
# ----------------------------------------------------------------------------
def _fused_forward_kernel(xf_ref, y_ref,
                          g1_ref, w1_ref, b1_ref,
                          g2_ref, w2_ref, b2_ref,
                          g3_ref, w3_ref, b3_ref,
                          gfc_ref, w1p_ref, fb1_ref,
                          fw2_ref, fb2_ref,
                          lrep_ref, fw3s_ref, fb3s_ref, rmask_ref,
                          mat_ref, out_ref):
    """Whole forward pass in one kernel; every intermediate stays in VMEM/vregs.

    Activations are laid out as (rows, channels) with rows ordered (b, h, w).
    Each stride-2 3x3 pad-1 conv is one stacked gather matmul (in-kernel
    im2col via a 0/1 matrix) followed by 9 tiny per-tap weight matmuls on row
    slices.  MXU operands are bf16, accumulation f32, element-wise math f32.
    fc3 is produced directly in (b*C + i, j) layout so the per-sample matrices
    feeding the channel mix are plain row slices (no in-kernel reshape).
    """

    def dot(a, b):
        return jnp.dot(a, b, preferred_element_type=_F32)

    def conv_layer(act_bf16, g_ref, w_ref, b_ref):
        n_taps = w_ref.shape[0]                       # 9
        ro = g_ref.shape[0] // n_taps                 # output rows per tap
        gathered = dot(g_ref[...], act_bf16)          # (9*ro, Cin) f32, exact gather
        acc = None
        for k in range(n_taps):                       # unrolled taps
            gk = gathered[k * ro:(k + 1) * ro, :].astype(_BF16)
            t = dot(gk, w_ref[k])                     # (ro, Cout) f32
            acc = t if acc is None else acc + t
        return jnp.maximum(acc + b_ref[...], 0.0).astype(_BF16)

    act = xf_ref[...]                                  # (B*H*W, Cin_pad)   bf16
    act = conv_layer(act, g1_ref, w1_ref, b1_ref)      # (B*H1*W1, hc)
    act = conv_layer(act, g2_ref, w2_ref, b2_ref)      # (B*H2*W2, hc)
    act = conv_layer(act, g3_ref, w3_ref, b3_ref)      # (B*H3*W3, hc)

    # Flatten (NCHW order) fused with fc1: for each spatial offset r, select
    # that row of every batch block and contract against the matching
    # row-slice of fc1's weight (permuted at pack time).
    acc = None
    for r in range(gfc_ref.shape[0]):
        sel = dot(gfc_ref[r], act).astype(_BF16)       # (B, hc)  exact row select
        t = dot(sel, w1p_ref[r])                       # (B, hidden)
        acc = t if acc is None else acc + t
    h = jnp.maximum(acc + fb1_ref[...], 0.0).astype(_BF16)                   # fc1+ReLU
    h = jnp.maximum(dot(h, fw2_ref[...]) + fb2_ref[...], 0.0).astype(_BF16)  # fc2+ReLU

    # fc3 + Tanh, computed directly in row layout (b*C + i, j):
    #   mat_rows[b*C + i, j] = tanh( h[b] @ fc3_w[:, i*C + j] + fc3_b[i*C + j] )
    # via a pack-time split of fc3_w into per-i blocks + 0/1 row masks.
    h_rep = dot(lrep_ref[...], h).astype(_BF16)        # (B*C, hidden), exact replication
    C = fw3s_ref.shape[0]
    acc = None
    for i in range(C):
        t = (dot(h_rep, fw3s_ref[i]) + fb3s_ref[i]) * rmask_ref[i]
        acc = t if acc is None else acc + t
    mat_rows = jnp.tanh(acc)                           # (B*C, C) f32
    mat_ref[...] = mat_rows

    # Invertible 1x1 conv (forward direction): out[b] = matrix[b] @ y[b].
    # Kept f32 (precision matters more than MXU rate on this tiny matmul).
    B = y_ref.shape[0]
    for b in range(B):
        m_b = mat_rows[b * C:(b + 1) * C, :]           # (C, C), static row slice
        out_ref[b] = dot(m_b, y_ref[b]).astype(out_ref.dtype)


def _channel_mix_kernel(m_ref, y_ref, o_ref):
    """Standalone per-sample 1x1 conv: out[b] = matrix[b] @ y[b] (C x HW).

    Only used on the reverse path (the matrix inverse has to be computed in
    plain JAX between the two kernels).  Whole batch in a single block.
    """
    for b in range(m_ref.shape[0]):
        o_ref[b] = jnp.dot(m_ref[b], y_ref[b],
                           preferred_element_type=_F32).astype(o_ref.dtype)


# ----------------------------------------------------------------------------
# Pallas call wrappers
# ----------------------------------------------------------------------------
def fused_forward(packed, x, y):
    """One pallas_call: x (NCHW), y (NCHW) -> (matrix (B,C,C), out (B,C,H,W))."""
    B, C, H, W = x.shape
    cy, Hy, Wy = y.shape[1], y.shape[2], y.shape[3]

    # Single cheap relayout of the raw inputs; everything downstream stays
    # inside the kernel.
    x_rows = x.transpose(0, 2, 3, 1).reshape(B * H * W, C)
    cin_pad = packed["w1"].shape[1]
    if cin_pad != C:                                   # pad channels (zero taps)
        x_rows = jnp.pad(x_rows, ((0, 0), (0, cin_pad - C)))
    x_rows = x_rows.astype(_BF16)
    y_rows = y.reshape(B, cy, Hy * Wy).astype(_F32)

    args = (x_rows, y_rows,
            packed["g1"], packed["w1"], packed["b1"],
            packed["g2"], packed["w2"], packed["b2"],
            packed["g3"], packed["w3"], packed["b3"],
            packed["gfc"], packed["w1p"], packed["fb1"],
            packed["fw2"], packed["fb2"],
            packed["lrep"], packed["fw3s"], packed["fb3s"], packed["rmask"])
    mat_rows, out_rows = pl.pallas_call(
        _fused_forward_kernel,
        out_shape=(jax.ShapeDtypeStruct((B * cy, cy), _F32),
                   jax.ShapeDtypeStruct((B, cy, Hy * Wy), _F32)),
        in_specs=[_VMEM() for _ in args],
        out_specs=(_VMEM(), _VMEM()),
    )(*args)
    matrix = mat_rows.reshape(B, cy, cy)
    out = out_rows.reshape(B, cy, Hy, Wy)
    return matrix, out


def batched_channel_mix(matrix, y):
    """Equivalent of F.conv2d(y.view(1,B*C,H,W), matrix.reshape(B*C,C,1,1),
    groups=B).view(B,C,H,W) -- used only on the reverse path."""
    B, C, H, W = y.shape
    y_flat = y.reshape(B, C, H * W).astype(_F32)
    out = pl.pallas_call(
        _channel_mix_kernel,
        out_shape=jax.ShapeDtypeStruct((B, C, H * W), _F32),
        in_specs=[_VMEM(), _VMEM()],
        out_specs=_VMEM(),
    )(matrix.astype(_F32), y_flat)
    return out.reshape(B, C, H, W)


# ----------------------------------------------------------------------------
# Parameters (raw, PyTorch-like) and kernel-ready packing
# ----------------------------------------------------------------------------
def init_params(key, in_size=(3, 16, 16), y_channels=4, stride=2,
                hidden_channels=8, hidden_size=32):
    C, H, W = in_size
    ks = jax.random.split(key, 6)

    def conv_w(k, cin, cout):
        return 0.1 * jax.random.normal(k, (cout, cin, 3, 3), _F32)

    convs = [
        (conv_w(ks[0], C, hidden_channels), jnp.zeros((hidden_channels,), _F32)),
        (conv_w(ks[1], hidden_channels, hidden_channels), jnp.zeros((hidden_channels,), _F32)),
        (conv_w(ks[2], hidden_channels, hidden_channels), jnp.zeros((hidden_channels,), _F32)),
    ]
    flat = int(hidden_channels * (H * W) // stride ** 6)
    # Linear weights stored as (in, out); y = x @ W + b.
    return {
        "stride": stride,
        "y_channels": y_channels,
        "convs": convs,
        "fc1_w": 0.1 * jax.random.normal(ks[3], (flat, hidden_size), _F32),
        "fc1_b": jnp.zeros((hidden_size,), _F32),
        "fc2_w": 0.1 * jax.random.normal(ks[4], (hidden_size, hidden_size), _F32),
        "fc2_b": jnp.zeros((hidden_size,), _F32),
        "fc3_w": 0.1 * jax.random.normal(ks[5], (hidden_size, y_channels ** 2), _F32),
        "fc3_b": jnp.zeros((y_channels ** 2,), _F32),
    }


def _conv_gather(batch, h_in, w_in, h_out, w_out, stride):
    """0/1 gather matrix G[k*rows_out + r_out, r_in] implementing in-kernel
    im2col for a 3x3 stride-`stride` pad-1 conv on rows ordered (b, h, w).
    All 9 taps are stacked along rows so the kernel needs ONE gather matmul."""
    g = np.zeros((9, batch * h_out * w_out, batch * h_in * w_in), np.float32)
    for kh in range(3):
        for kw in range(3):
            k = kh * 3 + kw
            for b in range(batch):
                for ho in range(h_out):
                    hi = stride * ho + kh - 1
                    if not (0 <= hi < h_in):
                        continue
                    for wo in range(w_out):
                        wi = stride * wo + kw - 1
                        if 0 <= wi < w_in:
                            g[k,
                              b * h_out * w_out + ho * w_out + wo,
                              b * h_in * w_in + hi * w_in + wi] = 1.0
    return g.reshape(9 * batch * h_out * w_out, batch * h_in * w_in)


def pack_params(params, batch, in_size):
    """One-time repack of raw parameters into kernel-ready constants
    (stacked gather matrices, per-tap conv weights, permuted fc1, row-split
    fc3, bf16 MXU operands)."""
    C, H, W = in_size
    s = params["stride"]
    cy = params["y_channels"]

    def out_hw(h, w):
        return (h + 2 - 3) // s + 1, (w + 2 - 3) // s + 1

    H1, W1 = out_hw(H, W)
    H2, W2 = out_hw(H1, W1)
    H3, W3 = out_hw(H2, W2)

    def tap_weights(w):        # OIHW (Cout,Cin,3,3) -> (9, Cin, Cout), k = kh*3+kw
        return jnp.transpose(w, (2, 3, 1, 0)).reshape(9, w.shape[1], w.shape[0]).astype(_BF16)

    (w1, b1), (w2, b2), (w3, b3) = params["convs"]
    cin_pad = ((C + 7) // 8) * 8
    w1_taps = tap_weights(w1)
    if cin_pad != C:           # pad input channels so the first matmuls are (…,8)@(8,8)
        w1_taps = jnp.pad(w1_taps, ((0, 0), (0, cin_pad - C), (0, 0)))

    packed = {
        "g1": jnp.asarray(_conv_gather(batch, H, W, H1, W1, s), _BF16),
        "w1": w1_taps, "b1": b1.reshape(1, -1).astype(_F32),
        "g2": jnp.asarray(_conv_gather(batch, H1, W1, H2, W2, s), _BF16),
        "w2": tap_weights(w2), "b2": b2.reshape(1, -1).astype(_F32),
        "g3": jnp.asarray(_conv_gather(batch, H2, W2, H3, W3, s), _BF16),
        "w3": tap_weights(w3), "b3": b3.reshape(1, -1).astype(_F32),
    }

    # Flatten(NCHW) + fc1 fusion: flat[b, c*R + r] = act3[b*R + r, c] with
    # r = h*W3 + w, so fc1 = sum_r (select_r @ act3) @ fc1_w[r::R, :].
    R = H3 * W3
    gfc = np.zeros((R, batch, batch * R), np.float32)
    for r in range(R):
        for b in range(batch):
            gfc[r, b, b * R + r] = 1.0
    packed["gfc"] = jnp.asarray(gfc, _BF16)
    packed["w1p"] = jnp.stack([params["fc1_w"][r::R, :] for r in range(R)], 0).astype(_BF16)
    packed["fb1"] = params["fc1_b"].reshape(1, -1).astype(_F32)
    packed["fw2"] = params["fc2_w"].astype(_BF16)
    packed["fb2"] = params["fc2_b"].reshape(1, -1).astype(_F32)

    # fc3 split so the kernel produces mat_rows[b*cy + i, j] directly:
    #   lrep replicates h[b] across the cy rows of batch b,
    #   fw3s[i]/fb3s[i] are the columns i*cy:(i+1)*cy of fc3,
    #   rmask[i] keeps only rows with row-block index i.
    lrep = np.zeros((batch * cy, batch), np.float32)
    for b in range(batch):
        lrep[b * cy:(b + 1) * cy, b] = 1.0
    packed["lrep"] = jnp.asarray(lrep, _BF16)
    packed["fw3s"] = jnp.stack(
        [params["fc3_w"][:, i * cy:(i + 1) * cy] for i in range(cy)], 0).astype(_BF16)
    packed["fb3s"] = jnp.stack(
        [params["fc3_b"][i * cy:(i + 1) * cy].reshape(1, -1) for i in range(cy)], 0).astype(_F32)
    rmask = np.zeros((cy, batch * cy, 1), np.float32)
    for i in range(cy):
        for b in range(batch):
            rmask[i, b * cy + i, 0] = 1.0
    packed["rmask"] = jnp.asarray(rmask, _F32)
    return packed


# ----------------------------------------------------------------------------
# Forward (matches cInvertibleConv.forward)
# ----------------------------------------------------------------------------
def cinvertible_conv_forward(packed, x, y, logdet=0.0, reverse=False):
    matrix, out_fwd = fused_forward(packed, x, y)      # one pallas_call
    dimensions = y.shape[2] * y.shape[3]
    # TODO(synk): the tiny cy x cy slogdet / inverse stay in plain JAX; a
    # closed-form 4x4 cofactor version could be folded into the kernel but the
    # cost is negligible under jit.
    dlogdet = jnp.linalg.slogdet(matrix)[1] * dimensions
    if reverse:
        logdet = logdet - dlogdet
        inv = jnp.linalg.inv(matrix)
        out = batched_channel_mix(inv, y)              # separate mix (needs inv first)
    else:
        logdet = logdet + dlogdet
        out = out_fwd                                  # mix already done in the kernel
    return out, logdet


# ----------------------------------------------------------------------------
# Pure-JAX reference (mirrors the kernel's bf16 rounding points)
# ----------------------------------------------------------------------------
def _reference_forward(params, x, y, logdet=0.0):
    s = params["stride"]
    act = x
    for (w, b) in params["convs"]:
        conv = lax.conv_general_dilated(
            act.astype(_BF16), w.astype(_BF16),
            window_strides=(s, s), padding=((1, 1), (1, 1)),
            dimension_numbers=("NCHW", "OIHW", "NCHW"),
            preferred_element_type=_F32)
        act = jnp.maximum(conv + b.reshape(1, -1, 1, 1), 0.0).astype(_BF16)
    flat = act.reshape(act.shape[0], -1)
    h = jnp.maximum(jnp.dot(flat, params["fc1_w"].astype(_BF16),
                            preferred_element_type=_F32) + params["fc1_b"], 0.0).astype(_BF16)
    h = jnp.maximum(jnp.dot(h, params["fc2_w"].astype(_BF16),
                            preferred_element_type=_F32) + params["fc2_b"], 0.0).astype(_BF16)
    mat = jnp.tanh(jnp.dot(h, params["fc3_w"].astype(_BF16),
                           preferred_element_type=_F32) + params["fc3_b"])
    cy = y.shape[1]
    matrix = mat.reshape(-1, cy, cy)
    dims = y.shape[2] * y.shape[3]
    logdet = logdet + jnp.linalg.slogdet(matrix)[1] * dims
    out = jnp.einsum("bij,bjhw->bihw", matrix.astype(_F32), y,
                     precision=lax.Precision.HIGHEST)
    return out, logdet


# ----------------------------------------------------------------------------
if __name__ == "__main__":
    key = jax.random.PRNGKey(0)
    kp, kx, ky = jax.random.split(key, 3)

    in_size = (3, 16, 16)     # (C, H, W) of x
    y_channels = 4
    B = 2

    params = init_params(kp, in_size=in_size, y_channels=y_channels,
                         stride=2, hidden_channels=8, hidden_size=32)
    packed = pack_params(params, batch=B, in_size=in_size)

    x = jax.random.normal(kx, (B,) + in_size, _F32)                # (2, 3, 16, 16)
    y = jax.random.normal(ky, (B, y_channels, 8, 8), _F32)         # (2, 4, 8, 8)

    fwd = jax.jit(cinvertible_conv_forward, static_argnames=("reverse",))
    out, logdet = fwd(packed, x, y, 0.0, reverse=False)
    jax.block_until_ready((out, logdet))

    assert out.shape == y.shape, out.shape
    assert logdet.shape == (B,), logdet.shape
    assert bool(jnp.all(jnp.isfinite(out))) and bool(jnp.all(jnp.isfinite(logdet)))

    # Correctness gate against a pure-JAX reference with matching precision.
    out_ref, logdet_ref = _reference_forward(params, x, y, logdet=0.0)
    np.testing.assert_allclose(np.asarray(out), np.asarray(out_ref),
                               rtol=1e-2, atol=1e-3)
    np.testing.assert_allclose(np.asarray(logdet), np.asarray(logdet_ref),
                               rtol=1e-2, atol=1e-2)

    print("KERNEL_OK")
</pallas_src>

<mosaic_0001>
module attributes {stable_mosaic.version = 11 : i64} {
  func.func @_fused_forward_kernel(%arg0: memref<512x8xbf16, #tpu.memory_space<vmem>>, %arg1: memref<2x4x64xf32, #tpu.memory_space<vmem>>, %arg2: memref<1152x512xbf16, #tpu.memory_space<vmem>>, %arg3: memref<9x8x8xbf16, #tpu.memory_space<vmem>>, %arg4: memref<1x8xf32, #tpu.memory_space<vmem>>, %arg5: memref<288x128xbf16, #tpu.memory_space<vmem>>, %arg6: memref<9x8x8xbf16, #tpu.memory_space<vmem>>, %arg7: memref<1x8xf32, #tpu.memory_space<vmem>>, %arg8: memref<72x32xbf16, #tpu.memory_space<vmem>>, %arg9: memref<9x8x8xbf16, #tpu.memory_space<vmem>>, %arg10: memref<1x8xf32, #tpu.memory_space<vmem>>, %arg11: memref<4x2x8xbf16, #tpu.memory_space<vmem>>, %arg12: memref<4x8x32xbf16, #tpu.memory_space<vmem>>, %arg13: memref<1x32xf32, #tpu.memory_space<vmem>>, %arg14: memref<32x32xbf16, #tpu.memory_space<vmem>>, %arg15: memref<1x32xf32, #tpu.memory_space<vmem>>, %arg16: memref<8x2xbf16, #tpu.memory_space<vmem>>, %arg17: memref<4x32x4xbf16, #tpu.memory_space<vmem>>, %arg18: memref<4x1x4xf32, #tpu.memory_space<vmem>>, %arg19: memref<4x8x1xf32, #tpu.memory_space<vmem>>, %arg20: memref<8x4xf32, #tpu.memory_space<vmem>>, %arg21: memref<2x4x64xf32, #tpu.memory_space<vmem>>) attributes {dimension_semantics = [], scalar_prefetch = 0 : i64, scratch_operands = 0 : i64, tpu.core_type = #tpu.core_type<tc>} {
    %c0 = arith.constant 0 : index
    %c0_0 = arith.constant 0 : index
    %0 = vector.load %arg0[%c0, %c0_0] : memref<512x8xbf16, #tpu.memory_space<vmem>>, vector<512x8xbf16>
    %c0_1 = arith.constant 0 : index
    %c0_2 = arith.constant 0 : index
    %1 = vector.load %arg2[%c0_1, %c0_2] : memref<1152x512xbf16, #tpu.memory_space<vmem>>, vector<1152x512xbf16>
    %cst = arith.constant dense<0.000000e+00> : vector<1152x8xf32>
    %2 = tpu.matmul %1, %0, %cst {dimension_numbers = #tpu.dot_dimension_numbers<[1], [0], [0], [1], [0, 0, 1, 1], [], []>} : vector<1152x512xbf16>, vector<512x8xbf16>, vector<1152x8xf32> -> vector<1152x8xf32>
    %3 = vector.extract_strided_slice %2 {offsets = [0, 0], sizes = [128, 8], strides = [1, 1]} : vector<1152x8xf32> to vector<128x8xf32>
    %4 = arith.truncf %3 : vector<128x8xf32> to vector<128x8xbf16>
    %c0_3 = arith.constant 0 : index
    %c0_4 = arith.constant 0 : index
    %c0_5 = arith.constant 0 : index
    %5 = vector.load %arg3[%c0_3, %c0_4, %c0_5] : memref<9x8x8xbf16, #tpu.memory_space<vmem>>, vector<1x8x8xbf16>
    %6 = vector.shape_cast %5 : vector<1x8x8xbf16> to vector<8x8xbf16>
    %cst_6 = arith.constant dense<0.000000e+00> : vector<128x8xf32>
    %7 = tpu.matmul %4, %6, %cst_6 {dimension_numbers = #tpu.dot_dimension_numbers<[1], [0], [0], [1], [0, 0, 1, 1], [], []>} : vector<128x8xbf16>, vector<8x8xbf16>, vector<128x8xf32> -> vector<128x8xf32>
    %8 = vector.extract_strided_slice %2 {offsets = [128, 0], sizes = [128, 8], strides = [1, 1]} : vector<1152x8xf32> to vector<128x8xf32>
    %9 = arith.truncf %8 : vector<128x8xf32> to vector<128x8xbf16>
    %c1 = arith.constant 1 : index
    %c0_7 = arith.constant 0 : index
    %c0_8 = arith.constant 0 : index
    %10 = vector.load %arg3[%c1, %c0_7, %c0_8] : memref<9x8x8xbf16, #tpu.memory_space<vmem>>, vector<1x8x8xbf16>
    %11 = vector.shape_cast %10 : vector<1x8x8xbf16> to vector<8x8xbf16>
    %cst_9 = arith.constant dense<0.000000e+00> : vector<128x8xf32>
    %12 = tpu.matmul %9, %11, %cst_9 {dimension_numbers = #tpu.dot_dimension_numbers<[1], [0], [0], [1], [0, 0, 1, 1], [], []>} : vector<128x8xbf16>, vector<8x8xbf16>, vector<128x8xf32> -> vector<128x8xf32>
    %13 = arith.addf %7, %12 : vector<128x8xf32>
    %14 = vector.extract_strided_slice %2 {offsets = [256, 0], sizes = [128, 8], strides = [1, 1]} : vector<1152x8xf32> to vector<128x8xf32>
    %15 = arith.truncf %14 : vector<128x8xf32> to vector<128x8xbf16>
    %c2 = arith.constant 2 : index
    %c0_10 = arith.constant 0 : index
    %c0_11 = arith.constant 0 : index
    %16 = vector.load %arg3[%c2, %c0_10, %c0_11] : memref<9x8x8xbf16, #tpu.memory_space<vmem>>, vector<1x8x8xbf16>
    %17 = vector.shape_cast %16 : vector<1x8x8xbf16> to vector<8x8xbf16>
    %cst_12 = arith.constant dense<0.000000e+00> : vector<128x8xf32>
    %18 = tpu.matmul %15, %17, %cst_12 {dimension_numbers = #tpu.dot_dimension_numbers<[1], [0], [0], [1], [0, 0, 1, 1], [], []>} : vector<128x8xbf16>, vector<8x8xbf16>, vector<128x8xf32> -> vector<128x8xf32>
    %19 = arith.addf %13, %18 : vector<128x8xf32>
    %20 = vector.extract_strided_slice %2 {offsets = [384, 0], sizes = [128, 8], strides = [1, 1]} : vector<1152x8xf32> to vector<128x8xf32>
    %21 = arith.truncf %20 : vector<128x8xf32> to vector<128x8xbf16>
    %c3 = arith.constant 3 : index
    %c0_13 = arith.constant 0 : index
    %c0_14 = arith.constant 0 : index
    %22 = vector.load %arg3[%c3, %c0_13, %c0_14] : memref<9x8x8xbf16, #tpu.memory_space<vmem>>, vector<1x8x8xbf16>
    %23 = vector.shape_cast %22 : vector<1x8x8xbf16> to vector<8x8xbf16>
    %cst_15 = arith.constant dense<0.000000e+00> : vector<128x8xf32>
    %24 = tpu.matmul %21, %23, %cst_15 {dimension_numbers = #tpu.dot_dimension_numbers<[1], [0], [0], [1], [0, 0, 1, 1], [], []>} : vector<128x8xbf16>, vector<8x8xbf16>, vector<128x8xf32> -> vector<128x8xf32>
    %25 = arith.addf %19, %24 : vector<128x8xf32>
    %26 = vector.extract_strided_slice %2 {offsets = [512, 0], sizes = [128, 8], strides = [1, 1]} : vector<1152x8xf32> to vector<128x8xf32>
    %27 = arith.truncf %26 : vector<128x8xf32> to vector<128x8xbf16>
    %c4 = arith.constant 4 : index
    %c0_16 = arith.constant 0 : index
    %c0_17 = arith.constant 0 : index
    %28 = vector.load %arg3[%c4, %c0_16, %c0_17] : memref<9x8x8xbf16, #tpu.memory_space<vmem>>, vector<1x8x8xbf16>
    %29 = vector.shape_cast %28 : vector<1x8x8xbf16> to vector<8x8xbf16>
    %cst_18 = arith.constant dense<0.000000e+00> : vector<128x8xf32>
    %30 = tpu.matmul %27, %29, %cst_18 {dimension_numbers = #tpu.dot_dimension_numbers<[1], [0], [0], [1], [0, 0, 1, 1], [], []>} : vector<128x8xbf16>, vector<8x8xbf16>, vector<128x8xf32> -> vector<128x8xf32>
    %31 = arith.addf %25, %30 : vector<128x8xf32>
    %32 = vector.extract_strided_slice %2 {offsets = [640, 0], sizes = [128, 8], strides = [1, 1]} : vector<1152x8xf32> to vector<128x8xf32>
    %33 = arith.truncf %32 : vector<128x8xf32> to vector<128x8xbf16>
    %c5 = arith.constant 5 : index
    %c0_19 = arith.constant 0 : index
    %c0_20 = arith.constant 0 : index
    %34 = vector.load %arg3[%c5, %c0_19, %c0_20] : memref<9x8x8xbf16, #tpu.memory_space<vmem>>, vector<1x8x8xbf16>
    %35 = vector.shape_cast %34 : vector<1x8x8xbf16> to vector<8x8xbf16>
    %cst_21 = arith.constant dense<0.000000e+00> : vector<128x8xf32>
    %36 = tpu.matmul %33, %35, %cst_21 {dimension_numbers = #tpu.dot_dimension_numbers<[1], [0], [0], [1], [0, 0, 1, 1], [], []>} : vector<128x8xbf16>, vector<8x8xbf16>, vector<128x8xf32> -> vector<128x8xf32>
    %37 = arith.addf %31, %36 : vector<128x8xf32>
    %38 = vector.extract_strided_slice %2 {offsets = [768, 0], sizes = [128, 8], strides = [1, 1]} : vector<1152x8xf32> to vector<128x8xf32>
    %39 = arith.truncf %38 : vector<128x8xf32> to vector<128x8xbf16>
    %c6 = arith.constant 6 : index
    %c0_22 = arith.constant 0 : index
    %c0_23 = arith.constant 0 : index
    %40 = vector.load %arg3[%c6, %c0_22, %c0_23] : memref<9x8x8xbf16, #tpu.memory_space<vmem>>, vector<1x8x8xbf16>
    %41 = vector.shape_cast %40 : vector<1x8x8xbf16> to vector<8x8xbf16>
    %cst_24 = arith.constant dense<0.000000e+00> : vector<128x8xf32>
    %42 = tpu.matmul %39, %41, %cst_24 {dimension_numbers = #tpu.dot_dimension_numbers<[1], [0], [0], [1], [0, 0, 1, 1], [], []>} : vector<128x8xbf16>, vector<8x8xbf16>, vector<128x8xf32> -> vector<128x8xf32>
    %43 = arith.addf %37, %42 : vector<128x8xf32>
    %44 = vector.extract_strided_slice %2 {offsets = [896, 0], sizes = [128, 8], strides = [1, 1]} : vector<1152x8xf32> to vector<128x8xf32>
    %45 = arith.truncf %44 : vector<128x8xf32> to vector<128x8xbf16>
    %c7 = arith.constant 7 : index
    %c0_25 = arith.constant 0 : index
    %c0_26 = arith.constant 0 : index
    %46 = vector.load %arg3[%c7, %c0_25, %c0_26] : memref<9x8x8xbf16, #tpu.memory_space<vmem>>, vector<1x8x8xbf16>
    %47 = vector.shape_cast %46 : vector<1x8x8xbf16> to vector<8x8xbf16>
    %cst_27 = arith.constant dense<0.000000e+00> : vector<128x8xf32>
    %48 = tpu.matmul %45, %47, %cst_27 {dimension_numbers = #tpu.dot_dimension_numbers<[1], [0], [0], [1], [0, 0, 1, 1], [], []>} : vector<128x8xbf16>, vector<8x8xbf16>, vector<128x8xf32> -> vector<128x8xf32>
    %49 = arith.addf %43, %48 : vector<128x8xf32>
    %50 = vector.extract_strided_slice %2 {offsets = [1024, 0], sizes = [128, 8], strides = [1, 1]} : vector<1152x8xf32> to vector<128x8xf32>
    %51 = arith.truncf %50 : vector<128x8xf32> to vector<128x8xbf16>
    %c8 = arith.constant 8 : index
    %c0_28 = arith.constant 0 : index
    %c0_29 = arith.constant 0 : index
    %52 = vector.load %arg3[%c8, %c0_28, %c0_29] : memref<9x8x8xbf16, #tpu.memory_space<vmem>>, vector<1x8x8xbf16>
    %53 = vector.shape_cast %52 : vector<1x8x8xbf16> to vector<8x8xbf16>
    %cst_30 = arith.constant dense<0.000000e+00> : vector<128x8xf32>
    %54 = tpu.matmul %51, %53, %cst_30 {dimension_numbers = #tpu.dot_dimension_numbers<[1], [0], [0], [1], [0, 0, 1, 1], [], []>} : vector<128x8xbf16>, vector<8x8xbf16>, vector<128x8xf32> -> vector<128x8xf32>
    %55 = arith.addf %49, %54 : vector<128x8xf32>
    %c0_31 = arith.constant 0 : index
    %c0_32 = arith.constant 0 : index
    %56 = vector.load %arg4[%c0_31, %c0_32] : memref<1x8xf32, #tpu.memory_space<vmem>>, vector<1x8xf32>
    %57 = vector.broadcast %56 : vector<1x8xf32> to vector<128x8xf32>
    %58 = arith.addf %55, %57 : vector<128x8xf32>
    %cst_33 = arith.constant 0.000000e+00 : f32
    %59 = vector.broadcast %cst_33 : f32 to vector<128x8xf32>
    %60 = arith.maximumf %58, %59 : vector<128x8xf32>
    %61 = arith.truncf %60 : vector<128x8xf32> to vector<128x8xbf16>
    %c0_34 = arith.constant 0 : index
    %c0_35 = arith.constant 0 : index
    %62 = vector.load %arg5[%c0_34, %c0_35] : memref<288x128xbf16, #tpu.memory_space<vmem>>, vector<288x128xbf16>
    %cst_36 = arith.constant dense<0.000000e+00> : vector<288x8xf32>
    %63 = tpu.matmul %62, %61, %cst_36 {dimension_numbers = #tpu.dot_dimension_numbers<[1], [0], [0], [1], [0, 0, 1, 1], [], []>} : vector<288x128xbf16>, vector<128x8xbf16>, vector<288x8xf32> -> vector<288x8xf32>
    %64 = vector.extract_strided_slice %63 {offsets = [0, 0], sizes = [32, 8], strides = [1, 1]} : vector<288x8xf32> to vector<32x8xf32>
    %65 = arith.truncf %64 : vector<32x8xf32> to vector<32x8xbf16>
    %c0_37 = arith.constant 0 : index
    %c0_38 = arith.constant 0 : index
    %c0_39 = arith.constant 0 : index
    %66 = vector.load %arg6[%c0_37, %c0_38, %c0_39] : memref<9x8x8xbf16, #tpu.memory_space<vmem>>, vector<1x8x8xbf16>
    %67 = vector.shape_cast %66 : vector<1x8x8xbf16> to vector<8x8xbf16>
    %cst_40 = arith.constant dense<0.000000e+00> : vector<32x8xf32>
    %68 = tpu.matmul %65, %67, %cst_40 {dimension_numbers = #tpu.dot_dimension_numbers<[1], [0], [0], [1], [0, 0, 1, 1], [], []>} : vector<32x8xbf16>, vector<8x8xbf16>, vector<32x8xf32> -> vector<32x8xf32>
    %69 = vector.extract_strided_slice %63 {offsets = [32, 0], sizes = [32, 8], strides = [1, 1]} : vector<288x8xf32> to vector<32x8xf32>
    %70 = arith.truncf %69 : vector<32x8xf32> to vector<32x8xbf16>
    %c1_41 = arith.constant 1 : index
    %c0_42 = arith.constant 0 : index
    %c0_43 = arith.constant 0 : index
    %71 = vector.load %arg6[%c1_41, %c0_42, %c0_43] : memref<9x8x8xbf16, #tpu.memory_space<vmem>>, vector<1x8x8xbf16>
    %72 = vector.shape_cast %71 : vector<1x8x8xbf16> to vector<8x8xbf16>
    %cst_44 = arith.constant dense<0.000000e+00> : vector<32x8xf32>
    %73 = tpu.matmul %70, %72, %cst_44 {dimension_numbers = #tpu.dot_dimension_numbers<[1], [0], [0], [1], [0, 0, 1, 1], [], []>} : vector<32x8xbf16>, vector<8x8xbf16>, vector<32x8xf32> -> vector<32x8xf32>
    %74 = arith.addf %68, %73 : vector<32x8xf32>
    %75 = vector.extract_strided_slice %63 {offsets = [64, 0], sizes = [32, 8], strides = [1, 1]} : vector<288x8xf32> to vector<32x8xf32>
    %76 = arith.truncf %75 : vector<32x8xf32> to vector<32x8xbf16>
    %c2_45 = arith.constant 2 : index
    %c0_46 = arith.constant 0 : index
    %c0_47 = arith.constant 0 : index
    %77 = vector.load %arg6[%c2_45, %c0_46, %c0_47] : memref<9x8x8xbf16, #tpu.memory_space<vmem>>, vector<1x8x8xbf16>
    %78 = vector.shape_cast %77 : vector<1x8x8xbf16> to vector<8x8xbf16>
    %cst_48 = arith.constant dense<0.000000e+00> : vector<32x8xf32>
    %79 = tpu.matmul %76, %78, %cst_48 {dimension_numbers = #tpu.dot_dimension_numbers<[1], [0], [0], [1], [0, 0, 1, 1], [], []>} : vector<32x8xbf16>, vector<8x8xbf16>, vector<32x8xf32> -> vector<32x8xf32>
    %80 = arith.addf %74, %79 : vector<32x8xf32>
    %81 = vector.extract_strided_slice %63 {offsets = [96, 0], sizes = [32, 8], strides = [1, 1]} : vector<288x8xf32> to vector<32x8xf32>
    %82 = arith.truncf %81 : vector<32x8xf32> to vector<32x8xbf16>
    %c3_49 = arith.constant 3 : index
    %c0_50 = arith.constant 0 : index
    %c0_51 = arith.constant 0 : index
    %83 = vector.load %arg6[%c3_49, %c0_50, %c0_51] : memref<9x8x8xbf16, #tpu.memory_space<vmem>>, vector<1x8x8xbf16>
    %84 = vector.shape_cast %83 : vector<1x8x8xbf16> to vector<8x8xbf16>
    %cst_52 = arith.constant dense<0.000000e+00> : vector<32x8xf32>
    %85 = tpu.matmul %82, %84, %cst_52 {dimension_numbers = #tpu.dot_dimension_numbers<[1], [0], [0], [1], [0, 0, 1, 1], [], []>} : vector<32x8xbf16>, vector<8x8xbf16>, vector<32x8xf32> -> vector<32x8xf32>
    %86 = arith.addf %80, %85 : vector<32x8xf32>
    %87 = vector.extract_strided_slice %63 {offsets = [128, 0], sizes = [32, 8], strides = [1, 1]} : vector<288x8xf32> to vector<32x8xf32>
    %88 = arith.truncf %87 : vector<32x8xf32> to vector<32x8xbf16>
    %c4_53 = arith.constant 4 : index
    %c0_54 = arith.constant 0 : index
    %c0_55 = arith.constant 0 : index
    %89 = vector.load %arg6[%c4_53, %c0_54, %c0_55] : memref<9x8x8xbf16, #tpu.memory_space<vmem>>, vector<1x8x8xbf16>
    %90 = vector.shape_cast %89 : vector<1x8x8xbf16> to vector<8x8xbf16>
    %cst_56 = arith.constant dense<0.000000e+00> : vector<32x8xf32>
    %91 = tpu.matmul %88, %90, %cst_56 {dimension_numbers = #tpu.dot_dimension_numbers<[1], [0], [0], [1], [0, 0, 1, 1], [], []>} : vector<32x8xbf16>, vector<8x8xbf16>, vector<32x8xf32> -> vector<32x8xf32>
    %92 = arith.addf %86, %91 : vector<32x8xf32>
    %93 = vector.extract_strided_slice %63 {offsets = [160, 0], sizes = [32, 8], strides = [1, 1]} : vector<288x8xf32> to vector<32x8xf32>
    %94 = arith.truncf %93 : vector<32x8xf32> to vector<32x8xbf16>
    %c5_57 = arith.constant 5 : index
    %c0_58 = arith.constant 0 : index
    %c0_59 = arith.constant 0 : index
    %95 = vector.load %arg6[%c5_57, %c0_58, %c0_59] : memref<9x8x8xbf16, #tpu.memory_space<vmem>>, vector<1x8x8xbf16>
    %96 = vector.shape_cast %95 : vector<1x8x8xbf16> to vector<8x8xbf16>
    %cst_60 = arith.constant dense<0.000000e+00> : vector<32x8xf32>
    %97 = tpu.matmul %94, %96, %cst_60 {dimension_numbers = #tpu.dot_dimension_numbers<[1], [0], [0], [1], [0, 0, 1, 1], [], []>} : vector<32x8xbf16>, vector<8x8xbf16>, vector<32x8xf32> -> vector<32x8xf32>
    %98 = arith.addf %92, %97 : vector<32x8xf32>
    %99 = vector.extract_strided_slice %63 {offsets = [192, 0], sizes = [32, 8], strides = [1, 1]} : vector<288x8xf32> to vector<32x8xf32>
    %100 = arith.truncf %99 : vector<32x8xf32> to vector<32x8xbf16>
    %c6_61 = arith.constant 6 : index
    %c0_62 = arith.constant 0 : index
    %c0_63 = arith.constant 0 : index
    %101 = vector.load %arg6[%c6_61, %c0_62, %c0_63] : memref<9x8x8xbf16, #tpu.memory_space<vmem>>, vector<1x8x8xbf16>
    %102 = vector.shape_cast %101 : vector<1x8x8xbf16> to vector<8x8xbf16>
    %cst_64 = arith.constant dense<0.000000e+00> : vector<32x8xf32>
    %103 = tpu.matmul %100, %102, %cst_64 {dimension_numbers = #tpu.dot_dimension_numbers<[1], [0], [0], [1], [0, 0, 1, 1], [], []>} : vector<32x8xbf16>, vector<8x8xbf16>, vector<32x8xf32> -> vector<32x8xf32>
    %104 = arith.addf %98, %103 : vector<32x8xf32>
    %105 = vector.extract_strided_slice %63 {offsets = [224, 0], sizes = [32, 8], strides = [1, 1]} : vector<288x8xf32> to vector<32x8xf32>
    %106 = arith.truncf %105 : vector<32x8xf32> to vector<32x8xbf16>
    %c7_65 = arith.constant 7 : index
    %c0_66 = arith.constant 0 : index
    %c0_67 = arith.constant 0 : index
    %107 = vector.load %arg6[%c7_65, %c0_66, %c0_67] : memref<9x8x8xbf16, #tpu.memory_space<vmem>>, vector<1x8x8xbf16>
    %108 = vector.shape_cast %107 : vector<1x8x8xbf16> to vector<8x8xbf16>
    %cst_68 = arith.constant dense<0.000000e+00> : vector<32x8xf32>
    %109 = tpu.matmul %106, %108, %cst_68 {dimension_numbers = #tpu.dot_dimension_numbers<[1], [0], [0], [1], [0, 0, 1, 1], [], []>} : vector<32x8xbf16>, vector<8x8xbf16>, vector<32x8xf32> -> vector<32x8xf32>
    %110 = arith.addf %104, %109 : vector<32x8xf32>
    %111 = vector.extract_strided_slice %63 {offsets = [256, 0], sizes = [32, 8], strides = [1, 1]} : vector<288x8xf32> to vector<32x8xf32>
    %112 = arith.truncf %111 : vector<32x8xf32> to vector<32x8xbf16>
    %c8_69 = arith.constant 8 : index
    %c0_70 = arith.constant 0 : index
    %c0_71 = arith.constant 0 : index
    %113 = vector.load %arg6[%c8_69, %c0_70, %c0_71] : memref<9x8x8xbf16, #tpu.memory_space<vmem>>, vector<1x8x8xbf16>
    %114 = vector.shape_cast %113 : vector<1x8x8xbf16> to vector<8x8xbf16>
    %cst_72 = arith.constant dense<0.000000e+00> : vector<32x8xf32>
    %115 = tpu.matmul %112, %114, %cst_72 {dimension_numbers = #tpu.dot_dimension_numbers<[1], [0], [0], [1], [0, 0, 1, 1], [], []>} : vector<32x8xbf16>, vector<8x8xbf16>, vector<32x8xf32> -> vector<32x8xf32>
    %116 = arith.addf %110, %115 : vector<32x8xf32>
    %c0_73 = arith.constant 0 : index
    %c0_74 = arith.constant 0 : index
    %117 = vector.load %arg7[%c0_73, %c0_74] : memref<1x8xf32, #tpu.memory_space<vmem>>, vector<1x8xf32>
    %118 = vector.broadcast %117 : vector<1x8xf32> to vector<32x8xf32>
    %119 = arith.addf %116, %118 : vector<32x8xf32>
    %cst_75 = arith.constant 0.000000e+00 : f32
    %120 = vector.broadcast %cst_75 : f32 to vector<32x8xf32>
    %121 = arith.maximumf %119, %120 : vector<32x8xf32>
    %122 = arith.truncf %121 : vector<32x8xf32> to vector<32x8xbf16>
    %c0_76 = arith.constant 0 : index
    %c0_77 = arith.constant 0 : index
    %123 = vector.load %arg8[%c0_76, %c0_77] : memref<72x32xbf16, #tpu.memory_space<vmem>>, vector<72x32xbf16>
    %cst_78 = arith.constant dense<0.000000e+00> : vector<72x8xf32>
    %124 = tpu.matmul %123, %122, %cst_78 {dimension_numbers = #tpu.dot_dimension_numbers<[1], [0], [0], [1], [0, 0, 1, 1], [], []>} : vector<72x32xbf16>, vector<32x8xbf16>, vector<72x8xf32> -> vector<72x8xf32>
    %125 = vector.extract_strided_slice %124 {offsets = [0, 0], sizes = [8, 8], strides = [1, 1]} : vector<72x8xf32> to vector<8x8xf32>
    %126 = arith.truncf %125 : vector<8x8xf32> to vector<8x8xbf16>
    %c0_79 = arith.constant 0 : index
    %c0_80 = arith.constant 0 : index
    %c0_81 = arith.constant 0 : index
    %127 = vector.load %arg9[%c0_79, %c0_80, %c0_81] : memref<9x8x8xbf16, #tpu.memory_space<vmem>>, vector<1x8x8xbf16>
    %128 = vector.shape_cast %127 : vector<1x8x8xbf16> to vector<8x8xbf16>
    %cst_82 = arith.constant dense<0.000000e+00> : vector<8x8xf32>
    %129 = tpu.matmul %126, %128, %cst_82 {dimension_numbers = #tpu.dot_dimension_numbers<[1], [0], [0], [1], [0, 0, 1, 1], [], []>} : vector<8x8xbf16>, vector<8x8xbf16>, vector<8x8xf32> -> vector<8x8xf32>
    %130 = vector.extract_strided_slice %124 {offsets = [8, 0], sizes = [8, 8], strides = [1, 1]} : vector<72x8xf32> to vector<8x8xf32>
    %131 = arith.truncf %130 : vector<8x8xf32> to vector<8x8xbf16>
    %c1_83 = arith.constant 1 : index
    %c0_84 = arith.constant 0 : index
    %c0_85 = arith.constant 0 : index
    %132 = vector.load %arg9[%c1_83, %c0_84, %c0_85] : memref<9x8x8xbf16, #tpu.memory_space<vmem>>, vector<1x8x8xbf16>
    %133 = vector.shape_cast %132 : vector<1x8x8xbf16> to vector<8x8xbf16>
    %cst_86 = arith.constant dense<0.000000e+00> : vector<8x8xf32>
    %134 = tpu.matmul %131, %133, %cst_86 {dimension_numbers = #tpu.dot_dimension_numbers<[1], [0], [0], [1], [0, 0, 1, 1], [], []>} : vector<8x8xbf16>, vector<8x8xbf16>, vector<8x8xf32> -> vector<8x8xf32>
    %135 = arith.addf %129, %134 : vector<8x8xf32>
    %136 = vector.extract_strided_slice %124 {offsets = [16, 0], sizes = [8, 8], strides = [1, 1]} : vector<72x8xf32> to vector<8x8xf32>
    %137 = arith.truncf %136 : vector<8x8xf32> to vector<8x8xbf16>
    %c2_87 = arith.constant 2 : index
    %c0_88 = arith.constant 0 : index
    %c0_89 = arith.constant 0 : index
    %138 = vector.load %arg9[%c2_87, %c0_88, %c0_89] : memref<9x8x8xbf16, #tpu.memory_space<vmem>>, vector<1x8x8xbf16>
    %139 = vector.shape_cast %138 : vector<1x8x8xbf16> to vector<8x8xbf16>
    %cst_90 = arith.constant dense<0.000000e+00> : vector<8x8xf32>
    %140 = tpu.matmul %137, %139, %cst_90 {dimension_numbers = #tpu.dot_dimension_numbers<[1], [0], [0], [1], [0, 0, 1, 1], [], []>} : vector<8x8xbf16>, vector<8x8xbf16>, vector<8x8xf32> -> vector<8x8xf32>
    %141 = arith.addf %135, %140 : vector<8x8xf32>
    %142 = vector.extract_strided_slice %124 {offsets = [24, 0], sizes = [8, 8], strides = [1, 1]} : vector<72x8xf32> to vector<8x8xf32>
    %143 = arith.truncf %142 : vector<8x8xf32> to vector<8x8xbf16>
    %c3_91 = arith.constant 3 : index
    %c0_92 = arith.constant 0 : index
    %c0_93 = arith.constant 0 : index
    %144 = vector.load %arg9[%c3_91, %c0_92, %c0_93] : memref<9x8x8xbf16, #tpu.memory_space<vmem>>, vector<1x8x8xbf16>
    %145 = vector.shape_cast %144 : vector<1x8x8xbf16> to vector<8x8xbf16>
    %cst_94 = arith.constant dense<0.000000e+00> : vector<8x8xf32>
    %146 = tpu.matmul %143, %145, %cst_94 {dimension_numbers = #tpu.dot_dimension_numbers<[1], [0], [0], [1], [0, 0, 1, 1], [], []>} : vector<8x8xbf16>, vector<8x8xbf16>, vector<8x8xf32> -> vector<8x8xf32>
    %147 = arith.addf %141, %146 : vector<8x8xf32>
    %148 = vector.extract_strided_slice %124 {offsets = [32, 0], sizes = [8, 8], strides = [1, 1]} : vector<72x8xf32> to vector<8x8xf32>
    %149 = arith.truncf %148 : vector<8x8xf32> to vector<8x8xbf16>
    %c4_95 = arith.constant 4 : index
    %c0_96 = arith.constant 0 : index
    %c0_97 = arith.constant 0 : index
    %150 = vector.load %arg9[%c4_95, %c0_96, %c0_97] : memref<9x8x8xbf16, #tpu.memory_space<vmem>>, vector<1x8x8xbf16>
    %151 = vector.shape_cast %150 : vector<1x8x8xbf16> to vector<8x8xbf16>
    %cst_98 = arith.constant dense<0.000000e+00> : vector<8x8xf32>
    %152 = tpu.matmul %149, %151, %cst_98 {dimension_numbers = #tpu.dot_dimension_numbers<[1], [0], [0], [1], [0, 0, 1, 1], [], []>} : vector<8x8xbf16>, vector<8x8xbf16>, vector<8x8xf32> -> vector<8x8xf32>
    %153 = arith.addf %147, %152 : vector<8x8xf32>
    %154 = vector.extract_strided_slice %124 {offsets = [40, 0], sizes = [8, 8], strides = [1, 1]} : vector<72x8xf32> to vector<8x8xf32>
    %155 = arith.truncf %154 : vector<8x8xf32> to vector<8x8xbf16>
    %c5_99 = arith.constant 5 : index
    %c0_100 = arith.constant 0 : index
    %c0_101 = arith.constant 0 : index
    %156 = vector.load %arg9[%c5_99, %c0_100, %c0_101] : memref<9x8x8xbf16, #tpu.memory_space<vmem>>, vector<1x8x8xbf16>
    %157 = vector.shape_cast %156 : vector<1x8x8xbf16> to vector<8x8xbf16>
    %cst_102 = arith.constant dense<0.000000e+00> : vector<8x8xf32>
    %158 = tpu.matmul %155, %157, %cst_102 {dimension_numbers = #tpu.dot_dimension_numbers<[1], [0], [0], [1], [0, 0, 1, 1], [], []>} : vector<8x8xbf16>, vector<8x8xbf16>, vector<8x8xf32> -> vector<8x8xf32>
    %159 = arith.addf %153, %158 : vector<8x8xf32>
    %160 = vector.extract_strided_slice %124 {offsets = [48, 0], sizes = [8, 8], strides = [1, 1]} : vector<72x8xf32> to vector<8x8xf32>
    %161 = arith.truncf %160 : vector<8x8xf32> to vector<8x8xbf16>
    %c6_103 = arith.constant 6 : index
    %c0_104 = arith.constant 0 : index
    %c0_105 = arith.constant 0 : index
    %162 = vector.load %arg9[%c6_103, %c0_104, %c0_105] : memref<9x8x8xbf16, #tpu.memory_space<vmem>>, vector<1x8x8xbf16>
    %163 = vector.shape_cast %162 : vector<1x8x8xbf16> to vector<8x8xbf16>
    %cst_106 = arith.constant dense<0.000000e+00> : vector<8x8xf32>
    %164 = tpu.matmul %161, %163, %cst_106 {dimension_numbers = #tpu.dot_dimension_numbers<[1], [0], [0], [1], [0, 0, 1, 1], [], []>} : vector<8x8xbf16>, vector<8x8xbf16>, vector<8x8xf32> -> vector<8x8xf32>
    %165 = arith.addf %159, %164 : vector<8x8xf32>
    %166 = vector.extract_strided_slice %124 {offsets = [56, 0], sizes = [8, 8], strides = [1, 1]} : vector<72x8xf32> to vector<8x8xf32>
    %167 = arith.truncf %166 : vector<8x8xf32> to vector<8x8xbf16>
    %c7_107 = arith.constant 7 : index
    %c0_108 = arith.constant 0 : index
    %c0_109 = arith.constant 0 : index
    %168 = vector.load %arg9[%c7_107, %c0_108, %c0_109] : memref<9x8x8xbf16, #tpu.memory_space<vmem>>, vector<1x8x8xbf16>
    %169 = vector.shape_cast %168 : vector<1x8x8xbf16> to vector<8x8xbf16>
    %cst_110 = arith.constant dense<0.000000e+00> : vector<8x8xf32>
    %170 = tpu.matmul %167, %169, %cst_110 {dimension_numbers = #tpu.dot_dimension_numbers<[1], [0], [0], [1], [0, 0, 1, 1], [], []>} : vector<8x8xbf16>, vector<8x8xbf16>, vector<8x8xf32> -> vector<8x8xf32>
    %171 = arith.addf %165, %170 : vector<8x8xf32>
    %172 = vector.extract_strided_slice %124 {offsets = [64, 0], sizes = [8, 8], strides = [1, 1]} : vector<72x8xf32> to vector<8x8xf32>
    %173 = arith.truncf %172 : vector<8x8xf32> to vector<8x8xbf16>
    %c8_111 = arith.constant 8 : index
    %c0_112 = arith.constant 0 : index
    %c0_113 = arith.constant 0 : index
    %174 = vector.load %arg9[%c8_111, %c0_112, %c0_113] : memref<9x8x8xbf16, #tpu.memory_space<vmem>>, vector<1x8x8xbf16>
    %175 = vector.shape_cast %174 : vector<1x8x8xbf16> to vector<8x8xbf16>
    %cst_114 = arith.constant dense<0.000000e+00> : vector<8x8xf32>
    %176 = tpu.matmul %173, %175, %cst_114 {dimension_numbers = #tpu.dot_dimension_numbers<[1], [0], [0], [1], [0, 0, 1, 1], [], []>} : vector<8x8xbf16>, vector<8x8xbf16>, vector<8x8xf32> -> vector<8x8xf32>
    %177 = arith.addf %171, %176 : vector<8x8xf32>
    %c0_115 = arith.constant 0 : index
    %c0_116 = arith.constant 0 : index
    %178 = vector.load %arg10[%c0_115, %c0_116] : memref<1x8xf32, #tpu.memory_space<vmem>>, vector<1x8xf32>
    %179 = vector.broadcast %178 : vector<1x8xf32> to vector<8x8xf32>
    %180 = arith.addf %177, %179 : vector<8x8xf32>
    %cst_117 = arith.constant 0.000000e+00 : f32
    %181 = vector.broadcast %cst_117 : f32 to vector<8x8xf32>
    %182 = arith.maximumf %180, %181 : vector<8x8xf32>
    %183 = arith.truncf %182 : vector<8x8xf32> to vector<8x8xbf16>
    %c0_118 = arith.constant 0 : index
    %c0_119 = arith.constant 0 : index
    %c0_120 = arith.constant 0 : index
    %184 = vector.load %arg11[%c0_118, %c0_119, %c0_120] : memref<4x2x8xbf16, #tpu.memory_space<vmem>>, vector<1x2x8xbf16>
    %185 = vector.shape_cast %184 : vector<1x2x8xbf16> to vector<2x8xbf16>
    %cst_121 = arith.constant dense<0.000000e+00> : vector<2x8xf32>
    %186 = tpu.matmul %185, %183, %cst_121 {dimension_numbers = #tpu.dot_dimension_numbers<[1], [0], [0], [1], [0, 0, 1, 1], [], []>} : vector<2x8xbf16>, vector<8x8xbf16>, vector<2x8xf32> -> vector<2x8xf32>
    %187 = arith.truncf %186 : vector<2x8xf32> to vector<2x8xbf16>
    %c0_122 = arith.constant 0 : index
    %c0_123 = arith.constant 0 : index
    %c0_124 = arith.constant 0 : index
    %188 = vector.load %arg12[%c0_122, %c0_123, %c0_124] : memref<4x8x32xbf16, #tpu.memory_space<vmem>>, vector<1x8x32xbf16>
    %189 = vector.shape_cast %188 : vector<1x8x32xbf16> to vector<8x32xbf16>
    %cst_125 = arith.constant dense<0.000000e+00> : vector<2x32xf32>
    %190 = tpu.matmul %187, %189, %cst_125 {dimension_numbers = #tpu.dot_dimension_numbers<[1], [0], [0], [1], [0, 0, 1, 1], [], []>} : vector<2x8xbf16>, vector<8x32xbf16>, vector<2x32xf32> -> vector<2x32xf32>
    %c1_126 = arith.constant 1 : index
    %c0_127 = arith.constant 0 : index
    %c0_128 = arith.constant 0 : index
    %191 = vector.load %arg11[%c1_126, %c0_127, %c0_128] : memref<4x2x8xbf16, #tpu.memory_space<vmem>>, vector<1x2x8xbf16>
    %192 = vector.shape_cast %191 : vector<1x2x8xbf16> to vector<2x8xbf16>
    %cst_129 = arith.constant dense<0.000000e+00> : vector<2x8xf32>
    %193 = tpu.matmul %192, %183, %cst_129 {dimension_numbers = #tpu.dot_dimension_numbers<[1], [0], [0], [1], [0, 0, 1, 1], [], []>} : vector<2x8xbf16>, vector<8x8xbf16>, vector<2x8xf32> -> vector<2x8xf32>
    %194 = arith.truncf %193 : vector<2x8xf32> to vector<2x8xbf16>
    %c1_130 = arith.constant 1 : index
    %c0_131 = arith.constant 0 : index
    %c0_132 = arith.constant 0 : index
    %195 = vector.load %arg12[%c1_130, %c0_131, %c0_132] : memref<4x8x32xbf16, #tpu.memory_space<vmem>>, vector<1x8x32xbf16>
    %196 = vector.shape_cast %195 : vector<1x8x32xbf16> to vector<8x32xbf16>
    %cst_133 = arith.constant dense<0.000000e+00> : vector<2x32xf32>
    %197 = tpu.matmul %194, %196, %cst_133 {dimension_numbers = #tpu.dot_dimension_numbers<[1], [0], [0], [1], [0, 0, 1, 1], [], []>} : vector<2x8xbf16>, vector<8x32xbf16>, vector<2x32xf32> -> vector<2x32xf32>
    %198 = arith.addf %190, %197 : vector<2x32xf32>
    %c2_134 = arith.constant 2 : index
    %c0_135 = arith.constant 0 : index
    %c0_136 = arith.constant 0 : index
    %199 = vector.load %arg11[%c2_134, %c0_135, %c0_136] : memref<4x2x8xbf16, #tpu.memory_space<vmem>>, vector<1x2x8xbf16>
    %200 = vector.shape_cast %199 : vector<1x2x8xbf16> to vector<2x8xbf16>
    %cst_137 = arith.constant dense<0.000000e+00> : vector<2x8xf32>
    %201 = tpu.matmul %200, %183, %cst_137 {dimension_numbers = #tpu.dot_dimension_numbers<[1], [0], [0], [1], [0, 0, 1, 1], [], []>} : vector<2x8xbf16>, vector<8x8xbf16>, vector<2x8xf32> -> vector<2x8xf32>
    %202 = arith.truncf %201 : vector<2x8xf32> to vector<2x8xbf16>
    %c2_138 = arith.constant 2 : index
    %c0_139 = arith.constant 0 : index
    %c0_140 = arith.constant 0 : index
    %203 = vector.load %arg12[%c2_138, %c0_139, %c0_140] : memref<4x8x32xbf16, #tpu.memory_space<vmem>>, vector<1x8x32xbf16>
    %204 = vector.shape_cast %203 : vector<1x8x32xbf16> to vector<8x32xbf16>
    %cst_141 = arith.constant dense<0.000000e+00> : vector<2x32xf32>
    %205 = tpu.matmul %202, %204, %cst_141 {dimension_numbers = #tpu.dot_dimension_numbers<[1], [0], [0], [1], [0, 0, 1, 1], [], []>} : vector<2x8xbf16>, vector<8x32xbf16>, vector<2x32xf32> -> vector<2x32xf32>
    %206 = arith.addf %198, %205 : vector<2x32xf32>
    %c3_142 = arith.constant 3 : index
    %c0_143 = arith.constant 0 : index
    %c0_144 = arith.constant 0 : index
    %207 = vector.load %arg11[%c3_142, %c0_143, %c0_144] : memref<4x2x8xbf16, #tpu.memory_space<vmem>>, vector<1x2x8xbf16>
    %208 = vector.shape_cast %207 : vector<1x2x8xbf16> to vector<2x8xbf16>
    %cst_145 = arith.constant dense<0.000000e+00> : vector<2x8xf32>
    %209 = tpu.matmul %208, %183, %cst_145 {dimension_numbers = #tpu.dot_dimension_numbers<[1], [0], [0], [1], [0, 0, 1, 1], [], []>} : vector<2x8xbf16>, vector<8x8xbf16>, vector<2x8xf32> -> vector<2x8xf32>
    %210 = arith.truncf %209 : vector<2x8xf32> to vector<2x8xbf16>
    %c3_146 = arith.constant 3 : index
    %c0_147 = arith.constant 0 : index
    %c0_148 = arith.constant 0 : index
    %211 = vector.load %arg12[%c3_146, %c0_147, %c0_148] : memref<4x8x32xbf16, #tpu.memory_space<vmem>>, vector<1x8x32xbf16>
    %212 = vector.shape_cast %211 : vector<1x8x32xbf16> to vector<8x32xbf16>
    %cst_149 = arith.constant dense<0.000000e+00> : vector<2x32xf32>
    %213 = tpu.matmul %210, %212, %cst_149 {dimension_numbers = #tpu.dot_dimension_numbers<[1], [0], [0], [1], [0, 0, 1, 1], [], []>} : vector<2x8xbf16>, vector<8x32xbf16>, vector<2x32xf32> -> vector<2x32xf32>
    %214 = arith.addf %206, %213 : vector<2x32xf32>
    %c0_150 = arith.constant 0 : index
    %c0_151 = arith.constant 0 : index
    %215 = vector.load %arg13[%c0_150, %c0_151] : memref<1x32xf32, #tpu.memory_space<vmem>>, vector<1x32xf32>
    %216 = vector.broadcast %215 : vector<1x32xf32> to vector<2x32xf32>
    %217 = arith.addf %214, %216 : vector<2x32xf32>
    %cst_152 = arith.constant 0.000000e+00 : f32
    %218 = vector.broadcast %cst_152 : f32 to vector<2x32xf32>
    %219 = arith.maximumf %217, %218 : vector<2x32xf32>
    %220 = arith.truncf %219 : vector<2x32xf32> to vector<2x32xbf16>
    %c0_153 = arith.constant 0 : index
    %c0_154 = arith.constant 0 : index
    %221 = vector.load %arg14[%c0_153, %c0_154] : memref<32x32xbf16, #tpu.memory_space<vmem>>, vector<32x32xbf16>
    %cst_155 = arith.constant dense<0.000000e+00> : vector<2x32xf32>
    %222 = tpu.matmul %220, %221, %cst_155 {dimension_numbers = #tpu.dot_dimension_numbers<[1], [0], [0], [1], [0, 0, 1, 1], [], []>} : vector<2x32xbf16>, vector<32x32xbf16>, vector<2x32xf32> -> vector<2x32xf32>
    %c0_156 = arith.constant 0 : index
    %c0_157 = arith.constant 0 : index
    %223 = vector.load %arg15[%c0_156, %c0_157] : memref<1x32xf32, #tpu.memory_space<vmem>>, vector<1x32xf32>
    %224 = vector.broadcast %223 : vector<1x32xf32> to vector<2x32xf32>
    %225 = arith.addf %222, %224 : vector<2x32xf32>
    %cst_158 = arith.constant 0.000000e+00 : f32
    %226 = vector.broadcast %cst_158 : f32 to vector<2x32xf32>
    %227 = arith.maximumf %225, %226 : vector<2x32xf32>
    %228 = arith.truncf %227 : vector<2x32xf32> to vector<2x32xbf16>
    %c0_159 = arith.constant 0 : index
    %c0_160 = arith.constant 0 : index
    %229 = vector.load %arg16[%c0_159, %c0_160] : memref<8x2xbf16, #tpu.memory_space<vmem>>, vector<8x2xbf16>
    %cst_161 = arith.constant dense<0.000000e+00> : vector<8x32xf32>
    %230 = tpu.matmul %229, %228, %cst_161 {dimension_numbers = #tpu.dot_dimension_numbers<[1], [0], [0], [1], [0, 0, 1, 1], [], []>} : vector<8x2xbf16>, vector<2x32xbf16>, vector<8x32xf32> -> vector<8x32xf32>
    %231 = arith.truncf %230 : vector<8x32xf32> to vector<8x32xbf16>
    %c0_162 = arith.constant 0 : index
    %c0_163 = arith.constant 0 : index
    %c0_164 = arith.constant 0 : index
    %232 = vector.load %arg17[%c0_162, %c0_163, %c0_164] : memref<4x32x4xbf16, #tpu.memory_space<vmem>>, vector<1x32x4xbf16>
    %233 = vector.shape_cast %232 : vector<1x32x4xbf16> to vector<32x4xbf16>
    %cst_165 = arith.constant dense<0.000000e+00> : vector<8x4xf32>
    %234 = tpu.matmul %231, %233, %cst_165 {dimension_numbers = #tpu.dot_dimension_numbers<[1], [0], [0], [1], [0, 0, 1, 1], [], []>} : vector<8x32xbf16>, vector<32x4xbf16>, vector<8x4xf32> -> vector<8x4xf32>
    %c0_166 = arith.constant 0 : index
    %c0_167 = arith.constant 0 : index
    %c0_168 = arith.constant 0 : index
    %235 = vector.load %arg18[%c0_166, %c0_167, %c0_168] : memref<4x1x4xf32, #tpu.memory_space<vmem>>, vector<1x1x4xf32>
    %236 = vector.shape_cast %235 : vector<1x1x4xf32> to vector<1x4xf32>
    %237 = vector.broadcast %236 : vector<1x4xf32> to vector<8x4xf32>
    %238 = arith.addf %234, %237 : vector<8x4xf32>
    %c0_169 = arith.constant 0 : index
    %c0_170 = arith.constant 0 : index
    %c0_171 = arith.constant 0 : index
    %239 = vector.load %arg19[%c0_169, %c0_170, %c0_171] : memref<4x8x1xf32, #tpu.memory_space<vmem>>, vector<1x8x1xf32>
    %240 = vector.shape_cast %239 : vector<1x8x1xf32> to vector<8x1xf32>
    %241 = vector.broadcast %240 : vector<8x1xf32> to vector<8x4xf32>
    %242 = arith.mulf %238, %241 : vector<8x4xf32>
    %c1_172 = arith.constant 1 : index
    %c0_173 = arith.constant 0 : index
    %c0_174 = arith.constant 0 : index
    %243 = vector.load %arg17[%c1_172, %c0_173, %c0_174] : memref<4x32x4xbf16, #tpu.memory_space<vmem>>, vector<1x32x4xbf16>
    %244 = vector.shape_cast %243 : vector<1x32x4xbf16> to vector<32x4xbf16>
    %cst_175 = arith.constant dense<0.000000e+00> : vector<8x4xf32>
    %245 = tpu.matmul %231, %244, %cst_175 {dimension_numbers = #tpu.dot_dimension_numbers<[1], [0], [0], [1], [0, 0, 1, 1], [], []>} : vector<8x32xbf16>, vector<32x4xbf16>, vector<8x4xf32> -> vector<8x4xf32>
    %c1_176 = arith.constant 1 : index
    %c0_177 = arith.constant 0 : index
    %c0_178 = arith.constant 0 : index
    %246 = vector.load %arg18[%c1_176, %c0_177, %c0_178] : memref<4x1x4xf32, #tpu.memory_space<vmem>>, vector<1x1x4xf32>
    %247 = vector.shape_cast %246 : vector<1x1x4xf32> to vector<1x4xf32>
    %248 = vector.broadcast %247 : vector<1x4xf32> to vector<8x4xf32>
    %249 = arith.addf %245, %248 : vector<8x4xf32>
    %c1_179 = arith.constant 1 : index
    %c0_180 = arith.constant 0 : index
    %c0_181 = arith.constant 0 : index
    %250 = vector.load %arg19[%c1_179, %c0_180, %c0_181] : memref<4x8x1xf32, #tpu.memory_space<vmem>>, vector<1x8x1xf32>
    %251 = vector.shape_cast %250 : vector<1x8x1xf32> to vector<8x1xf32>
    %252 = vector.broadcast %251 : vector<8x1xf32> to vector<8x4xf32>
    %253 = arith.mulf %249, %252 : vector<8x4xf32>
    %254 = arith.addf %242, %253 : vector<8x4xf32>
    %c2_182 = arith.constant 2 : index
    %c0_183 = arith.constant 0 : index
    %c0_184 = arith.constant 0 : index
    %255 = vector.load %arg17[%c2_182, %c0_183, %c0_184] : memref<4x32x4xbf16, #tpu.memory_space<vmem>>, vector<1x32x4xbf16>
    %256 = vector.shape_cast %255 : vector<1x32x4xbf16> to vector<32x4xbf16>
    %cst_185 = arith.constant dense<0.000000e+00> : vector<8x4xf32>
    %257 = tpu.matmul %231, %256, %cst_185 {dimension_numbers = #tpu.dot_dimension_numbers<[1], [0], [0], [1], [0, 0, 1, 1], [], []>} : vector<8x32xbf16>, vector<32x4xbf16>, vector<8x4xf32> -> vector<8x4xf32>
    %c2_186 = arith.constant 2 : index
    %c0_187 = arith.constant 0 : index
    %c0_188 = arith.constant 0 : index
    %258 = vector.load %arg18[%c2_186, %c0_187, %c0_188] : memref<4x1x4xf32, #tpu.memory_space<vmem>>, vector<1x1x4xf32>
    %259 = vector.shape_cast %258 : vector<1x1x4xf32> to vector<1x4xf32>
    %260 = vector.broadcast %259 : vector<1x4xf32> to vector<8x4xf32>
    %261 = arith.addf %257, %260 : vector<8x4xf32>
    %c2_189 = arith.constant 2 : index
    %c0_190 = arith.constant 0 : index
    %c0_191 = arith.constant 0 : index
    %262 = vector.load %arg19[%c2_189, %c0_190, %c0_191] : memref<4x8x1xf32, #tpu.memory_space<vmem>>, vector<1x8x1xf32>
    %263 = vector.shape_cast %262 : vector<1x8x1xf32> to vector<8x1xf32>
    %264 = vector.broadcast %263 : vector<8x1xf32> to vector<8x4xf32>
    %265 = arith.mulf %261, %264 : vector<8x4xf32>
    %266 = arith.addf %254, %265 : vector<8x4xf32>
    %c3_192 = arith.constant 3 : index
    %c0_193 = arith.constant 0 : index
    %c0_194 = arith.constant 0 : index
    %267 = vector.load %arg17[%c3_192, %c0_193, %c0_194] : memref<4x32x4xbf16, #tpu.memory_space<vmem>>, vector<1x32x4xbf16>
    %268 = vector.shape_cast %267 : vector<1x32x4xbf16> to vector<32x4xbf16>
    %cst_195 = arith.constant dense<0.000000e+00> : vector<8x4xf32>
    %269 = tpu.matmul %231, %268, %cst_195 {dimension_numbers = #tpu.dot_dimension_numbers<[1], [0], [0], [1], [0, 0, 1, 1], [], []>} : vector<8x32xbf16>, vector<32x4xbf16>, vector<8x4xf32> -> vector<8x4xf32>
    %c3_196 = arith.constant 3 : index
    %c0_197 = arith.constant 0 : index
    %c0_198 = arith.constant 0 : index
    %270 = vector.load %arg18[%c3_196, %c0_197, %c0_198] : memref<4x1x4xf32, #tpu.memory_space<vmem>>, vector<1x1x4xf32>
    %271 = vector.shape_cast %270 : vector<1x1x4xf32> to vector<1x4xf32>
    %272 = vector.broadcast %271 : vector<1x4xf32> to vector<8x4xf32>
    %273 = arith.addf %269, %272 : vector<8x4xf32>
    %c3_199 = arith.constant 3 : index
    %c0_200 = arith.constant 0 : index
    %c0_201 = arith.constant 0 : index
    %274 = vector.load %arg19[%c3_199, %c0_200, %c0_201] : memref<4x8x1xf32, #tpu.memory_space<vmem>>, vector<1x8x1xf32>
    %275 = vector.shape_cast %274 : vector<1x8x1xf32> to vector<8x1xf32>
    %276 = vector.broadcast %275 : vector<8x1xf32> to vector<8x4xf32>
    %277 = arith.mulf %273, %276 : vector<8x4xf32>
    %278 = arith.addf %266, %277 : vector<8x4xf32>
    %279 = math.tanh %278 : vector<8x4xf32>
    %c0_202 = arith.constant 0 : index
    %c0_203 = arith.constant 0 : index
    %280 = vector.load %arg20[%c0_202, %c0_203] : memref<8x4xf32, #tpu.memory_space<vmem>>, vector<8x4xf32>
    tpu.vector_store %arg20[%c0_202, %c0_203], %279 {strides = array<i32>} : memref<8x4xf32, #tpu.memory_space<vmem>>, vector<8x4xf32>,
    %281 = vector.extract_strided_slice %279 {offsets = [0, 0], sizes = [4, 4], strides = [1, 1]} : vector<8x4xf32> to vector<4x4xf32>
    %c0_204 = arith.constant 0 : index
    %c0_205 = arith.constant 0 : index
    %c0_206 = arith.constant 0 : index
    %282 = vector.load %arg1[%c0_204, %c0_205, %c0_206] : memref<2x4x64xf32, #tpu.memory_space<vmem>>, vector<1x4x64xf32>
    %283 = vector.shape_cast %282 : vector<1x4x64xf32> to vector<4x64xf32>
    %cst_207 = arith.constant dense<0.000000e+00> : vector<4x64xf32>
    %284 = tpu.matmul %281, %283, %cst_207 {dimension_numbers = #tpu.dot_dimension_numbers<[1], [0], [0], [1], [0, 0, 1, 1], [], []>} : vector<4x4xf32>, vector<4x64xf32>, vector<4x64xf32> -> vector<4x64xf32>
    %c0_208 = arith.constant 0 : index
    %c0_209 = arith.constant 0 : index
    %c0_210 = arith.constant 0 : index
    %285 = vector.load %arg21[%c0_208, %c0_209, %c0_210] : memref<2x4x64xf32, #tpu.memory_space<vmem>>, vector<1x4x64xf32>
    %286 = vector.shape_cast %285 : vector<1x4x64xf32> to vector<4x64xf32>
    %287 = vector.shape_cast %284 : vector<4x64xf32> to vector<1x4x64xf32>
    tpu.vector_store %arg21[%c0_208, %c0_209, %c0_210], %287 {strides = array<i32>} : memref<2x4x64xf32, #tpu.memory_space<vmem>>, vector<1x4x64xf32>,
    %288 = vector.extract_strided_slice %279 {offsets = [4, 0], sizes = [4, 4], strides = [1, 1]} : vector<8x4xf32> to vector<4x4xf32>
    %c1_211 = arith.constant 1 : index
    %c0_212 = arith.constant 0 : index
    %c0_213 = arith.constant 0 : index
    %289 = vector.load %arg1[%c1_211, %c0_212, %c0_213] : memref<2x4x64xf32, #tpu.memory_space<vmem>>, vector<1x4x64xf32>
    %290 = vector.shape_cast %289 : vector<1x4x64xf32> to vector<4x64xf32>
    %cst_214 = arith.constant dense<0.000000e+00> : vector<4x64xf32>
    %291 = tpu.matmul %288, %290, %cst_214 {dimension_numbers = #tpu.dot_dimension_numbers<[1], [0], [0], [1], [0, 0, 1, 1], [], []>} : vector<4x4xf32>, vector<4x64xf32>, vector<4x64xf32> -> vector<4x64xf32>
    %c1_215 = arith.constant 1 : index
    %c0_216 = arith.constant 0 : index
    %c0_217 = arith.constant 0 : index
    %292 = vector.load %arg21[%c1_215, %c0_216, %c0_217] : memref<2x4x64xf32, #tpu.memory_space<vmem>>, vector<1x4x64xf32>
    %293 = vector.shape_cast %292 : vector<1x4x64xf32> to vector<4x64xf32>
    %294 = vector.shape_cast %291 : vector<4x64xf32> to vector<1x4x64xf32>
    tpu.vector_store %arg21[%c1_215, %c0_216, %c0_217], %294 {strides = array<i32>} : memref<2x4x64xf32, #tpu.memory_space<vmem>>, vector<1x4x64xf32>,
    return
  }
}

</mosaic_0001>

<bundles_post_ra>
// kernel: custom-call.2
= control target key start
LH: loop header
LB: loop body
LE: loop exit
PB: predicated region body
PF: predicated region fallthrough
CT: control target
= control target key end

     0   :  { %5 = vsyncpa [#allocation6], 0  ;;  %s942_s0 = inlined_call_operand.vmem [shape: f32[2,4,4], index: 0, kind: input, shape index: {}]   ;;  %s943_s1 = inlined_call_operand.vmem [shape: f32[2,4,4], index: 1, kind: output, shape index: {0}]   ;;  %s944_s2 = inlined_call_operand.hbm [shape: s32[2,4], index: 2, kind: output, shape index: {1}]   ;;  %s945_s3 = inlined_call_operand.hbm [shape: s32[2,4], index: 3, kind: output, shape index: {2}]  }
   0x1   :  { %7 = vsyncpa [#allocation6 + $0x1], 0 }
   0x2   :  { %8 = vsyncpa [#allocation9], 0 }
   0x3   :  { %10 = vsyncpa [#allocation9 + $0x1], 0  ;;  %s739_s12 = smov 0   ;;  %s741_s13 = smov 0  }
   0x4   :  { %s743_s14 = smov 0   ;;  %s745_s15 = smov 0  }
   0x5 LB: > { %s760_s16 = sadd.s32 4294967295, %s710_s15   ;;  %s536_s17 = sadd.s32 4294967294, %s710_s15   ;;  %s710_s15 = sphi %s745_s15, %s951_s15   ;;  %s706_s14 = sphi %s743_s14, %s950_s14   ;;  %s702_s13 = sphi %s741_s13, %s949_s13   ;;  %s698_s12 = sphi %s739_s12, %s948_s12  }
   0x6   : > { %s764_s18 = sadd.s32 1, %s710_s15   ;;  %s20_s19 = sshrl.u32 %s710_s15, 3 }
   0x7   : > { %s21_s20 = sshrl.u32 %s764_s18, 3  ;;  %s25_s21 = sadd.s32 1, %s706_s14 }
   0x8   : > { %s22_s22 = ssub.s32 %s20_s19, %s21_s20  ;;  %p35_p0 = scmp.ne.s32.totalorder %s706_s14, %s702_s13 }
   0x9   : > { %p23_p1 = scmp.eq.s32.totalorder %s22_s22, 0  ;;  %p36_p2 = scmp.eq.s32.totalorder %s760_s16, 1 }
   0xa   : > { %p41_p3 = scmp.ne.s32.totalorder %s702_s13, %s698_s12  ;;  %p42_p4 = scmp.eq.s32.totalorder %s536_s17, 1 }
   0xb   : > { %s775_s23 = scalar_select %p23_p1, %s706_s14, %s25_s21  }
   0xc   : > { %p777_p5 = por %p36_p2, %p35_p0  ;;  %p781_p6 = por %p42_p4, %p41_p3 }
   0xd   : > { %p538_p7 = scmp.ge.s32.totalorder %s710_s15, 2 }
   0xe   : > { %s88_s26 = sand.u32 (!%p538_p7), 1, %s710_s15   ;;  %s540_s27 = sshll.u32 (!%p538_p7), %s710_s15, 2 }
   0xf   : > { %86 = sbr.rel (%p538_p7) target bundleno = 22 (0x16), region = 16  ;;  %s539_s28 = sshll.u32 (!%p538_p7), %s88_s26, 2 }
  0x10   : > { %s92_s4 = scalar_lea.vmem (!%p538_p7), %s942_s0, %s540_s27  ;;  %s90_s5 = scalar_lea.vmem (!%p538_p7), [#allocation1], %s539_s28 }
  0x11   : > { %v108_v0 = vld [vmem:[%s92_s4] sm:$0xf] (!%p538_p7) }
  0x12   : > { %109 = vst [vmem:[%s90_s5] sm:$0xf] (!%p538_p7), %v108_v0 }
  0x16 PF: > { %p541_p8 = scmp.ge.s32.totalorder %s710_s15, 1  ;;  %p125_p9 = scmp.lt.s32.totalorder %s710_s15, 3 }
  0x18   : > { %p126_p10 = pnand %p541_p8, %p125_p9 }
  0x1a   : > { %129 = sbr.rel (%p126_p10) target bundleno = 456 (0x1c8), region = 50 }
  0x21   : > { %s136_s6 = sand.u32 1, %s760_s16   ;;  %s797_s7 = sand.u32 1, %s702_s13   ;;  %v170_v1 = vlaneseq  ;;  %v716_v4 = vmov 0  }
  0x22   : > { %s799_s8 = sshll.u32 %s136_s6, 2  ;;  %s544_s9 = sshll.u32 %s797_s7, 1 }
  0x23   : > { %v803_v2 = vshrl.u32 %v170_v1, 7  ;;  %s138_s10 = scalar_lea.vmem [#allocation1], %s799_s8  ;;  %s165_s11 = sand.u32 7, %s760_s16  }
  0x24   : > { %v159_v3 = vld [vmem:[%s138_s10] sm:$0xf]  ;;  %s808_s17 = scalar_lea.vmem [#allocation4], %s165_s11  ;;  %s142_s19 = scalar_lea.vmem [#allocation3], %s799_s8 }
  0x25   : > { %160 = vst [vmem:[#allocation0] sm:$0xf] %v159_v3  ;;  %174 = vst [vmem:[#allocation10] sm:$0xff] %v803_v2  ;;  %s812_s20 = scalar_lea.vmem [#allocation5], %s544_s9  ;;  %s814_s21 = scalar_lea.vmem [#allocation8], %s544_s9 }
  0x26   : > { %169 = vst [vmem:[%s808_s17] sm:$0x1] %v716_v4  ;;  %s816_s22 = scalar_lea.vmem [#allocation7], %s165_s11  ;;  %s818_s26 = smov 0  }
  0x2c   : > { %v163_v5 = vld [vmem:[#allocation0] sm:$0xff] }
  0x2d   : > { %164 = vst [vmem:[#allocation2] sm:$0xff] %v163_v5 }
  0x2e LB: >> { %vm190_vm0 = vcmp.lt.s32.totalorder %v803_v2, 4  ;;  %v825_v8 = vstv %s714_s26  ;;  %s231_s27 = ssub.s32 128, %s714_s26  ;;  %v237_v38 = vand.u32 127, %v170_v1  ;;  %v240_v40 = vld [vmem:[%s808_s17] ss:$0 sm:$0xff]  ;;  %s243_s28 = scalar_lea.vmem [#allocation2], %s714_s26  ;;  %s714_s26 = sphi %s818_s26, %s180_s26  }
  0x2f   : >> { %vm189_vm1 = vcmp.ge.s32.totalorder %v803_v2, %v825_v8  ;;  %s249_s30 = scalar_lea.vmem [#allocation10], %s714_s26  ;;  %vm269_vm15 = vcmp.gt.s32.totalorder %v803_v2, %v825_v8  ;;  %s180_s26 = sadd.s32 1, %s714_s26  }
  0x30   : >> { %vm191_vm3 = vmand %vm189_vm1, %vm190_vm0  ;;  %vm261_vm12 = vcmp.gt.s32.totalorder %v237_v38, %v825_v8  ;;  %vm238_vm13 = vcmp.eq.s32.totalorder %v237_v38, %v825_v8  ;;  %v251_v42 = vld [vmem:[%s249_s30] ss:$0 sm:$0xff]  ;;  %p177_p11 = scmp.ge.s32.totalorder %s180_s26, 4  }
  0x31   : >> { %vm273_vm1 = vmand %vm269_vm15, %vm238_vm13  ;;  %s550_s6 = sshll.u32 (%p177_p11), %s760_s16, 2  ;;  %s397_s9 = sshrl.u32 (%p177_p11), %s760_s16, 3 }
  0x32   : > { %s857_s10 = sshll.u32 (%p177_p11), %s397_s9, 5  ;;  %s404_s11 = sshll.u32 (%p177_p11), %s812_s20, 4  ;;  %s405_s11 = int_to_ptr.vmem [resolvable:$true] %s404_s11 }
  0x34   : >> { %v185_v6 = vld [vmem:[#allocation2] sm:$0xff]  ;;  %v245_v41 = vld [vmem:[%s243_s28] ss:$0 sm:$0xff] }
  0x35   : >> { %v186_v7 = vand.u32 2147483647, %v185_v6 }
  0x37   : >> { %vm546_vm2 = vcmp.gt.f32.partialorder %v186_v7, -inf }
  0x38   : >> { %vm193_vm4 = vmand %vm191_vm3, %vm546_vm2 }
  0x39   : >> { %v194_v9 = vsel %vm193_vm4, %v803_v2, %v825_v8  ;;  %v195_v10 = vsel %vm193_vm4, %v186_v7, -inf }
  0x3a   : >> { %v196_v11 = vrot.slane %v195_v10, 1  ;;  %v197_v12 = vrot.slane %v194_v9, 1 }
  0x3c   : >> { %vm198_vm5 = vcmp.ge.f32.partialorder %v196_v11, %v195_v10  ;;  %v201_v13 = vrot.slane %v196_v11, 1  ;;  %v202_v14 = vrot.slane %v197_v12, 1 }
  0x3d   : >> { %v199_v15 = vsel %vm198_vm5, %v196_v11, %v195_v10  ;;  %v200_v16 = vsel %vm198_vm5, %v197_v12, %v194_v9 }
  0x3e   : >> { %vm203_vm6 = vcmp.ge.f32.partialorder %v201_v13, %v199_v15  ;;  %v206_v17 = vrot.slane %v201_v13, 1  ;;  %v207_v18 = vrot.slane %v202_v14, 1 }
  0x3f   : >> { %v204_v19 = vsel %vm203_vm6, %v201_v13, %v199_v15  ;;  %v205_v20 = vsel %vm203_vm6, %v202_v14, %v200_v16 }
  0x40   : >> { %vm208_vm7 = vcmp.ge.f32.partialorder %v206_v17, %v204_v19  ;;  %v211_v21 = vrot.slane %v206_v17, 1  ;;  %v212_v22 = vrot.slane %v207_v18, 1 }
  0x41   : >> { %v209_v23 = vsel %vm208_vm7, %v206_v17, %v204_v19  ;;  %v210_v24 = vsel %vm208_vm7, %v207_v18, %v205_v20 }
  0x42   : >> { %vm213_vm8 = vcmp.ge.f32.partialorder %v211_v21, %v209_v23  ;;  %v216_v25 = vrot.slane %v211_v21, 1  ;;  %v217_v26 = vrot.slane %v212_v22, 1 }
  0x43   : >> { %v214_v27 = vsel %vm213_vm8, %v211_v21, %v209_v23  ;;  %v215_v28 = vsel %vm213_vm8, %v212_v22, %v210_v24 }
  0x44   : >> { %vm218_vm9 = vcmp.ge.f32.partialorder %v216_v25, %v214_v27  ;;  %v221_v29 = vrot.slane %v216_v25, 1  ;;  %v222_v30 = vrot.slane %v217_v26, 1 }
  0x45   : >> { %v219_v31 = vsel %vm218_vm9, %v216_v25, %v214_v27  ;;  %v220_v32 = vsel %vm218_vm9, %v217_v26, %v215_v28 }
  0x46   : >> { %vm223_vm10 = vcmp.ge.f32.partialorder %v221_v29, %v219_v31  ;;  %v226_v33 = vrot.slane %v221_v29, 1  ;;  %v227_v34 = vrot.slane %v222_v30, 1 }
  0x47   : >> { %v224_v35 = vsel %vm223_vm10, %v221_v29, %v219_v31  ;;  %v225_v36 = vsel %vm223_vm10, %v222_v30, %v220_v32 }
  0x48   : >> { %vm228_vm11 = vcmp.ge.f32.partialorder %v226_v33, %v224_v35 }
  0x49   : >> { %v230_v37 = vsel %vm228_vm11, %v227_v34, %v225_v36 }
  0x4a   : >> { %232 = vrot.lane.b32.xlu0 %v230_v37, %s231_s27  ;;  %s864_s27 = scalar_lea.hbm (%p177_p11), %s944_s2, %s857_s10 }
  0xbc   : >> { %v233_v39 = vpop.permute.xlu0 %232 }
  0xbd   : >> { %555 = vpush %v233_v39 }
  0xee   : >> { %s556_s29 = spop %555 }
  0xef   : >> { %v239_v43 = vstv %s556_s29  ;;  %s244_s4 = scalar_lea.vmem [#allocation2], %s556_s29  ;;  %s250_s5 = scalar_lea.vmem [#allocation10], %s556_s29 }
  0xf0   : >> { %v246_v44 = vld [vmem:[%s244_s4] ss:$0 sm:$0xff]  ;;  %v241_v46 = vsel %vm238_vm13, %v239_v43, %v240_v40  ;;  %s612_s29 = scalar_lea.vmem (%p177_p11), %s405_s11, 32 }
  0xf1   : >> { %v252_v45 = vld [vmem:[%s250_s5] ss:$0 sm:$0xff]  ;;  %247 = vst [vmem:[%s244_s4] sm:$0x1] %v245_v41  ;;  %vm255_vm14 = vcmp.ne.f32.partialorder %v246_v44, 0.0  ;;  %242 = vst [vmem:[%s808_s17] sm:$0x1] %v241_v46  ;;  %v262_v53 = vsel %vm261_vm12, %v246_v44, 0.0  ;;  %p613_p12 = scmp.ne.s32.totalorder (%p177_p11), %s405_s11, %s612_s29 }
  0xf2   : >> { %253 = vst [vmem:[%s250_s5] sm:$0x1] %v251_v42  ;;  %248 = vst [vmem:[%s243_s28] sm:$0x1] %v246_v44  ;;  %s352_s28 = scalar_lea.sflag (%p177_p11), [#allocation6], %s797_s7 }
  0xf3   : >> { %254 = vst [vmem:[%s249_s30] sm:$0x1] %v252_v45  ;;  %vm256_vm0 = vmand %vm238_vm13, %vm255_vm14  ;;  %p614_p13 = pnand (%p177_p11), %p613_p12, %p777_p5  ;;  %s717_s30 = smov (%p177_p11), [#allocation5]  }
  0xf4   : >> { %v257_v47 = vsel %vm256_vm0, %v246_v44, 1.0  ;;  %s616_s4 = sshll.u32 (%p177_p11), %s717_s30, 4  ;;  %s617_s4 = int_to_ptr.vmem [resolvable:$false] %s616_s4 }
  0xf5   : >> { %v270_v48 = vsel %vm269_vm15, %v257_v47, 1.0  ;;  %p615_p0 = pneg (%p177_p11), %p614_p13  ;;  %s618_s5 = scalar_lea.vmem (%p177_p11), %s617_s4, 64 }
  0xf6   : >> { %610 = vrcp.f32 %v270_v48  ;;  %p619_p1 = scmp.lt.s32.totalorder (%p177_p11), %s405_s11, %s617_s4  ;;  %p620_p2 = scmp.lt.s32.totalorder (%p177_p11), %s618_s5, %s612_s29 }
  0xf8   : > { %v338_v59 = vld [vmem:[#allocation4] sm:$0x3] (%p177_p11)  ;;  %p621_p3 = por (%p177_p11), %p620_p2, %p619_p1 }
  0xf9   : >> { %v266_v50 = vld [vmem:[#allocation2] sm:$0xff]  ;;  %340 = vst [vmem:[%s812_s20] sm:$0x3] (%p177_p11), %v338_v59 }
  0xfa   : > { %v280_v57 = vld [vmem:[#allocation10] sm:$0xff] (%p177_p11)  ;;  %p622_p4 = pnand (%p177_p11), %p621_p3, %p615_p0 }
 0x100   : >> { %v611_v49 = vpop.eup %610 }
 0x101   : >> { %v272_v51 = vmul.f32 %v611_v49, %v266_v50 }
 0x103   : >> { %v274_v52 = vsel %vm273_vm1, %v272_v51, 0.0 }
 0x104   : >> { %275 = vadd.xlane.f32.xlu0 %v274_v52 }
 0x131   : > { %296 = vxpose.xlu0.b32.start.end [1/1] (short) (narrow) (%p177_p11), %v280_v57, 8 }
 0x190   : > { %179 = sbr.rel (!%p177_p11) target bundleno = 46 (0x2e), region = 173 }
 0x191   : >> { %v276_v54 = vpop.xlane.xlu0 %275 }
 0x192   : >> { %v277_v55 = vmul.f32 %v276_v54, %v262_v53 }
 0x194   : >> { %v278_v56 = vsub.f32 %v272_v51, %v277_v55 }
 0x196   : >> { %279 = vst [vmem:[#allocation2] sm:$0xff] %v278_v56 }
 0x19d   : > { %v332_v58 = vld [vmem:[#allocation2] sm:$0xf] }
 0x19e   : > { %334 = vst [vmem:[%s142_s19] sm:$0xf] %v332_v58 }
 0x19f   : > { %625 = shalt.err (!%p622_p4)
}
 0x1a0   : > { %s626_s20 = scalar_lea.hbm %s864_s27, 32  ;;  %s630_s26 = scalar_lea.hbm %s944_s2, 32 }
 0x1a1   : > { %p627_p8 = scmp.ne.s32.totalorder %s864_s27, %s626_s20  ;;  %p631_p11 = scmp.lt.u32.totalorder %s864_s27, %s944_s2 }
 0x1a2   : > { %p632_p12 = scmp.lt.u32.totalorder %s630_s26, %s626_s20  ;;  %p634_p0 = scmp.lt.u32.totalorder %s626_s20, %s864_s27 }
 0x1a3   : > { %p628_p9 = pnand %p627_p8, %p777_p5 }
 0x1a4   : > { %p633_p13 = por %p632_p12, %p631_p11 }
 0x1a5   : > { %p629_p10 = pneg %p628_p9 }
 0x1a6   : > { %p635_p1 = por %p634_p0, %p633_p13 }
 0x1a8   : > { %p636_p2 = pnand %p635_p1, %p629_p10 }
 0x1aa   : > { %639 = shalt.err (!%p636_p2)
}
 0x1ab   : > { %557 = dma.vmem_to_hbm [thread:$0]  (%p777_p5), %s405_s11, 32, %s864_s27, %s352_s28   ;;  %v378_v60 = vld [vmem:[%s142_s19] sm:$0xf] }
 0x1ac   : > { %s362_s20 = scalar_lea.vmem %s943_s1, %s550_s6  ;;  %s418_s9 = sshll.u32 %s814_s21, 4  ;;  %s899_s9 = int_to_ptr.vmem [resolvable:$true] %s418_s9 }
 0x1ad   : > { %379 = vst [vmem:[%s362_s20] sm:$0xf] %v378_v60  ;;  %s897_s30 = scalar_lea.hbm %s945_s3, %s857_s10  ;;  %s357_s16 = scalar_lea.sflag [#allocation9], %s797_s7 }
 0x1ae   : > { %s640_s6 = scalar_lea.vmem %s899_s9, 32  ;;  %s718_s8 = smov [#allocation8]  }
 0x1af   : > { %p641_p3 = scmp.ne.s32.totalorder %s899_s9, %s640_s6  ;;  %s644_s19 = sshll.u32 %s718_s8, 4  ;;  %s645_s19 = int_to_ptr.vmem [resolvable:$false] %s644_s19 }
 0x1b0   : > { %p647_p9 = scmp.lt.s32.totalorder %s899_s9, %s645_s19 }
 0x1b1   : > { %v312_v61 = vpop.trf.xlu0  ;;  %p642_p4 = pnand %p641_p3, %p777_p5 }
 0x1b2   : > { %328 = vst [vmem:[%s816_s22] sm:$0x1] %v312_v61  ;;  %s646_s22 = scalar_lea.vmem %s645_s19, 64 }
 0x1b3   : > { %p643_p8 = pneg %p642_p4  ;;  %p648_p10 = scmp.lt.s32.totalorder %s646_s22, %s640_s6 }
 0x1b5   : > { %p649_p11 = por %p648_p10, %p647_p9 }
 0x1b7   : > { %p650_p12 = pnand %p649_p11, %p643_p8 }
 0x1b9   : > { %v344_v62 = vld [vmem:[#allocation7] sm:$0x3] }
 0x1ba   : > { %346 = vst [vmem:[%s814_s21] sm:$0x3] %v344_v62 }
 0x1bb   : > { %653 = shalt.err (!%p650_p12)
}
 0x1bc   : > { %s654_s7 = scalar_lea.hbm %s897_s30, 32  ;;  %s658_s11 = scalar_lea.hbm %s945_s3, 32 }
 0x1bd   : > { %p655_p13 = scmp.ne.s32.totalorder %s897_s30, %s654_s7  ;;  %p659_p2 = scmp.lt.u32.totalorder %s897_s30, %s945_s3 }
 0x1be   : > { %p660_p3 = scmp.lt.u32.totalorder %s658_s11, %s654_s7  ;;  %p662_p8 = scmp.lt.u32.totalorder %s654_s7, %s897_s30 }
 0x1bf   : > { %p656_p0 = pnand %p655_p13, %p777_p5 }
 0x1c0   : > { %p661_p4 = por %p660_p3, %p659_p2 }
 0x1c1   : > { %p657_p1 = pneg %p656_p0 }
 0x1c2   : > { %p663_p9 = por %p662_p8, %p661_p4 }
 0x1c4   : > { %p664_p10 = pnand %p663_p9, %p657_p1 }
 0x1c6   : > { %667 = shalt.err (!%p664_p10)
}
 0x1c7   : > { %558 = dma.vmem_to_hbm [thread:$0]  (%p777_p5), %s899_s9, 32, %s897_s30, %s357_s16  }
 0x1c8 PF: > { %s434_s4 = sand.u32 1, %s698_s12   ;;  %p562_p11 = pnand %p538_p7, %p781_p6 }
 0x1c9   : > { %s435_s29 = scalar_lea.sflag [#allocation6], %s434_s4 }
 0x1ca   : > { %689 = dma.done.wait (!%p562_p11), %s435_s29, 32  }
 0x1cb   : > { %691 = vsyncadd (!%p562_p11), %s435_s29, 4294967264  ;;  %s444_s5 = scalar_lea.sflag [#allocation9], %s434_s4 }
 0x1cc   : > { %693 = dma.done.wait (!%p562_p11), %s444_s5, 32  }
 0x1cd   : > { %695 = vsyncadd (!%p562_p11), %s444_s5, 4294967264  ;;  %p13_p5 = scmp.ge.s32.totalorder %s764_s18, 4   ;;  %s948_s12 = smov %s702_s13 }
 0x1ce   : > { %s949_s13 = smov %s706_s14  ;;  %s950_s14 = smov %s775_s23 }
 0x1cf   : > { %s951_s15 = smov %s764_s18  ;;  %15 = sbr.rel (!%p13_p5) target bundleno = 5 (0x5), region = 184 }
 0x1d6   :  { %449 = vsyncpa [#allocation6], 1 }
 0x1d7   :  { %451 = vsyncpa [#allocation6 + $0x1], 1 }
 0x1d8   :  { %452 = vsyncpa [#allocation9], 1 }
 0x1d9   :  { %454 = vsyncpa [#allocation9 + $0x1], 1 }

// kernel: cinvertible_conv_forward.1
= control target key start
LH: loop header
LB: loop body
LE: loop exit
PB: predicated region body
PF: predicated region fallthrough
CT: control target
= control target key end

     0   :  { %s10764_s0 = inlined_call_operand.vmem [shape: bf16[512,8], index: 0, kind: input, shape index: {}]   ;;  %s10765_s1 = inlined_call_operand.vmem [shape: f32[2,4,64], index: 1, kind: input, shape index: {}]   ;;  %s10766_s2 = inlined_call_operand.hbm [shape: bf16[1152,512], index: 2, kind: input, shape index: {}]   ;;  %s10767_s3 = inlined_call_operand.vmem [shape: bf16[9,8,8], index: 3, kind: input, shape index: {}]   ;;  %s10768_s4 = inlined_call_operand.hbm [shape: f32[1,8], index: 4, kind: input, shape index: {}]   ;;  %s10769_s5 = inlined_call_operand.hbm [shape: bf16[288,128], index: 5, kind: input, shape index: {}]   ;;  %s10770_s6 = inlined_call_operand.vmem [shape: bf16[9,8,8], index: 6, kind: input, shape index: {}]   ;;  %s10771_s7 = inlined_call_operand.hbm [shape: f32[1,8], index: 7, kind: input, shape index: {}]   ;;  %s10772_s8 = inlined_call_operand.vmem [shape: bf16[72,32], index: 8, kind: input, shape index: {}]   ;;  %s10773_s9 = inlined_call_operand.vmem [shape: bf16[9,8,8], index: 9, kind: input, shape index: {}]   ;;  %s10774_s10 = inlined_call_operand.hbm [shape: f32[1,8], index: 10, kind: input, shape index: {}]   ;;  %s10775_s11 = inlined_call_operand.hbm [shape: bf16[4,2,8], index: 11, kind: input, shape index: {}]   ;;  %s10776_s12 = inlined_call_operand.hbm [shape: bf16[4,8,32], index: 12, kind: input, shape index: {}]   ;;  %s10777_s13 = inlined_call_operand.hbm [shape: f32[1,32], index: 13, kind: input, shape index: {}]   ;;  %s10778_s14 = inlined_call_operand.hbm [shape: bf16[32,32], index: 14, kind: input, shape index: {}]   ;;  %s10779_s15 = inlined_call_operand.hbm [shape: f32[1,32], index: 15, kind: input, shape index: {}]   ;;  %s10780_s16 = inlined_call_operand.vmem [shape: bf16[8,2], index: 16, kind: input, shape index: {}]   ;;  %s10781_s17 = inlined_call_operand.vmem [shape: bf16[4,32,4], index: 17, kind: input, shape index: {}]   ;;  %s10782_s18 = inlined_call_operand.hbm [shape: f32[4,1,4], index: 18, kind: input, shape index: {}]   ;;  %s10783_s19 = inlined_call_operand.vmem [shape: f32[4,8,1], index: 19, kind: input, shape index: {}]   ;;  %s10784_s20 = inlined_call_operand.vmem [shape: f32[8,4], index: 20, kind: output, shape index: {0}]   ;;  %s10785_s21 = inlined_call_operand.vmem [shape: f32[2,4,64], index: 21, kind: output, shape index: {1}]  }
   0x1   :  { %10792 = sst [smem:[#allocation30_spill]] %s10764_s0 }
   0x2   :  { %10793 = sst [smem:[#allocation31_spill]] %s10765_s1 }
   0x3   :  { %10794 = sst [smem:[#allocation32_spill]] %s10766_s2 }
   0x4   :  { %10795 = sst [smem:[#allocation33_spill]] %s10767_s3 }
   0x5   :  { %10796 = sst [smem:[#allocation34_spill]] %s10768_s4 }
   0x6   :  { %10797 = sst [smem:[#allocation35_spill]] %s10769_s5 }
   0x7   :  { %27 = vsyncpa [#allocation3], 0 }
   0x8   :  { %28 = vsyncpa [#allocation5], 0 }
   0x9   :  { %29 = vsyncpa [#allocation8], 0 }
   0xa   :  { %30 = vsyncpa [#allocation11], 0 }
   0xb   :  { %31 = vsyncpa [#allocation14], 0 }
   0xc   :  { %32 = vsyncpa [#allocation17], 0  ;;  %s9636_s2 = smov [#allocation4]   ;;  %s9637_s26 = smov [#allocation7]  }
   0xd   :  { %s57_s25 = sshll.u32 %s9636_s2, 4  ;;  %s81_s27 = sshll.u32 %s9637_s26, 4  ;;  %s58_s25 = int_to_ptr.vmem [resolvable:$true] %s57_s25  ;;  %s82_s27 = int_to_ptr.vmem [resolvable:$true] %s81_s27 }
   0xe   :  { %s10798_s29 = sld [smem:[#allocation34_spill]] }
  0x14   :  { %s9382_s0 = scalar_lea.hbm %s10798_s29, 16 }
  0x15   :  { %p9383_p0 = scmp.ne.s32.totalorder %s10798_s29, %s9382_s0  ;;  %p9386_p1 = scmp.lt.u32.totalorder %s9382_s0, %s10798_s29 }
  0x17   :  { %p9388_p2 = pnand %p9386_p1, %p9383_p0 }
  0x19   :  { %9391 = shalt.err (!%p9388_p2)
}
  0x1a   :  { %s9392_s23 = scalar_lea.vmem %s58_s25, 16  ;;  %s9396_s1 = scalar_lea.vmem %s58_s25, 32 }
  0x1b   :  { %p9393_p3 = scmp.ne.s32.totalorder %s58_s25, %s9392_s23  ;;  %p9397_p4 = scmp.lt.s32.totalorder %s58_s25, %s58_s25 }
  0x1c   :  { %p9398_p5 = scmp.lt.s32.totalorder %s9396_s1, %s9392_s23 }
  0x1e   :  { %p9399_p6 = por %p9398_p5, %p9397_p4 }
  0x20   :  { %p9400_p7 = pnand %p9399_p6, %p9393_p3 }
  0x22   :  { %9403 = shalt.err (!%p9400_p7)
}
  0x23   :  { %60 = dma.hbm_to_vmem [thread:$0]  %s10798_s29, 16, %s58_s25, [#allocation5]  }
  0x24   :  { %s9404_s28 = scalar_lea.hbm %s10771_s7, 16 }
  0x25   :  { %p9405_p8 = scmp.ne.s32.totalorder %s10771_s7, %s9404_s28  ;;  %p9408_p9 = scmp.lt.u32.totalorder %s9404_s28, %s10771_s7 }
  0x27   :  { %p9410_p10 = pnand %p9408_p9, %p9405_p8 }
  0x29   :  { %9413 = shalt.err (!%p9410_p10)
}
  0x2a   :  { %s9414_s22 = scalar_lea.vmem %s82_s27, 16  ;;  %s9418_s23 = scalar_lea.vmem %s82_s27, 32 }
  0x2b   :  { %p9415_p11 = scmp.ne.s32.totalorder %s82_s27, %s9414_s22  ;;  %p9419_p12 = scmp.lt.s32.totalorder %s82_s27, %s82_s27 }
  0x2c   :  { %p9420_p13 = scmp.lt.s32.totalorder %s9418_s23, %s9414_s22 }
  0x2e   :  { %p9421_p0 = por %p9420_p13, %p9419_p12 }
  0x30   :  { %p9422_p1 = pnand %p9421_p0, %p9415_p11 }
  0x32   :  { %9425 = shalt.err (!%p9422_p1)
}
  0x33   :  { %84 = dma.hbm_to_vmem [thread:$0]  %s10771_s7, 16, %s82_s27, [#allocation8]  }
  0x34   :  { %s9638_s1 = smov [#allocation10]   ;;  %s9426_s3 = scalar_lea.hbm %s10775_s11, 64 }
  0x35   :  { %s104_s24 = sshll.u32 %s9638_s1, 4  ;;  %p9427_p2 = scmp.ne.s32.totalorder %s10775_s11, %s9426_s3  ;;  %s105_s24 = int_to_ptr.vmem [resolvable:$true] %s104_s24 }
  0x36   :  { %p9430_p3 = scmp.lt.u32.totalorder %s9426_s3, %s10775_s11 }
  0x38   :  { %p9432_p4 = pnand %p9430_p3, %p9427_p2 }
  0x3a   :  { %9435 = shalt.err (!%p9432_p4)
}
  0x3b   :  { %s9436_s5 = scalar_lea.vmem %s105_s24, 64  ;;  %p9441_p6 = scmp.lt.s32.totalorder %s105_s24, %s105_s24 }
  0x3c   :  { %p9437_p5 = scmp.ne.s32.totalorder %s105_s24, %s9436_s5  ;;  %p9442_p7 = scmp.lt.s32.totalorder %s9436_s5, %s9436_s5 }
  0x3e   :  { %p9443_p8 = por %p9442_p7, %p9441_p6 }
  0x40   :  { %p9444_p9 = pnand %p9443_p8, %p9437_p5 }
  0x42   :  { %9447 = shalt.err (!%p9444_p9)
}
  0x43   :  { %s9639_s7 = smov 16   ;;  %s9640_s27 = smov 1  }
  0x44   :  { %110 = dma.hbm_to_vmem [thread:$0]  %s10775_s11, 64, %s105_s24, [#allocation11], %s9639_s7, %s9639_s7, %s9640_s27  }
  0x45   :  { %s9641_s25 = smov [#allocation13]   ;;  %s9642_s1 = smov [#allocation16]  }
  0x46   :  { %s129_s29 = sshll.u32 %s9641_s25, 4  ;;  %s151_s2 = sshll.u32 %s9642_s1, 4  ;;  %s130_s29 = int_to_ptr.vmem [resolvable:$true] %s129_s29  ;;  %s152_s2 = int_to_ptr.vmem [resolvable:$true] %s151_s2 }
  0x47   :  { %s9448_s28 = scalar_lea.hbm %s10777_s13, 16 }
  0x48   :  { %p9449_p10 = scmp.ne.s32.totalorder %s10777_s13, %s9448_s28  ;;  %p9452_p11 = scmp.lt.u32.totalorder %s9448_s28, %s10777_s13 }
  0x4a   :  { %p9454_p12 = pnand %p9452_p11, %p9449_p10 }
  0x4c   :  { %9457 = shalt.err (!%p9454_p12)
}
  0x4d   :  { %s9458_s11 = scalar_lea.vmem %s130_s29, 16  ;;  %s9462_s24 = scalar_lea.vmem %s130_s29, 32 }
  0x4e   :  { %p9459_p13 = scmp.ne.s32.totalorder %s130_s29, %s9458_s11  ;;  %p9463_p0 = scmp.lt.s32.totalorder %s130_s29, %s130_s29 }
  0x4f   :  { %p9464_p1 = scmp.lt.s32.totalorder %s9462_s24, %s9458_s11 }
  0x51   :  { %p9465_p2 = por %p9464_p1, %p9463_p0 }
  0x53   :  { %p9466_p3 = pnand %p9465_p2, %p9459_p13 }
  0x55   :  { %9469 = shalt.err (!%p9466_p3)
}
  0x56   :  { %132 = dma.hbm_to_vmem [thread:$0]  %s10777_s13, 16, %s130_s29, [#allocation14]  }
  0x57   :  { %s9470_s26 = scalar_lea.hbm %s10779_s15, 16 }
  0x58   :  { %p9471_p4 = scmp.ne.s32.totalorder %s10779_s15, %s9470_s26  ;;  %p9474_p5 = scmp.lt.u32.totalorder %s9470_s26, %s10779_s15 }
  0x5a   :  { %p9476_p6 = pnand %p9474_p5, %p9471_p4 }
  0x5c   :  { %9479 = shalt.err (!%p9476_p6)
}
  0x5d   :  { %s9480_s30 = scalar_lea.vmem %s152_s2, 16  ;;  %s9484_s5 = scalar_lea.vmem %s152_s2, 32 }
  0x5e   :  { %p9481_p7 = scmp.ne.s32.totalorder %s152_s2, %s9480_s30  ;;  %p9485_p8 = scmp.lt.s32.totalorder %s152_s2, %s152_s2 }
  0x5f   :  { %p9486_p9 = scmp.lt.s32.totalorder %s9484_s5, %s9480_s30 }
  0x61   :  { %p9487_p10 = por %p9486_p9, %p9485_p8 }
  0x63   :  { %p9488_p11 = pnand %p9487_p10, %p9481_p7 }
  0x65   :  { %9491 = shalt.err (!%p9488_p11)
}
  0x66   :  { %154 = dma.hbm_to_vmem [thread:$0]  %s10779_s15, 16, %s152_s2, [#allocation17]  }
  0x67   :  { %s9643_s11 = smov [#allocation2]   ;;  %s10799_s25 = sld [smem:[#allocation32_spill]] }
  0x68   :  { %s42_s24 = sshll.u32 %s9643_s11, 4  ;;  %s43_s24 = int_to_ptr.vmem [resolvable:$true] %s42_s24 }
  0x6d   :  { %s9492_s1 = scalar_lea.hbm %s10799_s25, 36864 }
  0x6e   :  { %p9493_p12 = scmp.ne.s32.totalorder %s10799_s25, %s9492_s1  ;;  %p9496_p13 = scmp.lt.u32.totalorder %s9492_s1, %s10799_s25 }
  0x70   :  { %p9498_p0 = pnand %p9496_p13, %p9493_p12 }
  0x72   :  { %9501 = shalt.err (!%p9498_p0)
}
  0x73   :  { %s9502_s0 = scalar_lea.vmem %s43_s24, 36864  ;;  %p9507_p2 = scmp.lt.s32.totalorder %s43_s24, %s43_s24 }
  0x74   :  { %p9503_p1 = scmp.ne.s32.totalorder %s43_s24, %s9502_s0  ;;  %p9508_p3 = scmp.lt.s32.totalorder %s9502_s0, %s9502_s0 }
  0x76   :  { %p9509_p4 = por %p9508_p3, %p9507_p2 }
  0x78   :  { %p9510_p5 = pnand %p9509_p4, %p9503_p1 }
  0x7a   :  { %9513 = shalt.err (!%p9510_p5)
}
  0x7b   :  { %s9644_s15 = smov 256   ;;  %s9645_s5 = smov [#allocation6]  }
  0x7c   :  { %48 = dma.hbm_to_vmem [thread:$0]  %s10799_s25, 36864, %s43_s24, [#allocation3], %s9644_s15, %s9644_s15, %s9639_s7  }
  0x7d   :  { %s66_s13 = sshll.u32 %s9645_s5, 4  ;;  %s10800_s22 = sld [smem:[#allocation35_spill]]  ;;  %s67_s13 = int_to_ptr.vmem [resolvable:$true] %s66_s13 }
  0x83   :  { %s9514_s23 = scalar_lea.hbm %s10800_s22, 2304 }
  0x84   :  { %p9515_p6 = scmp.ne.s32.totalorder %s10800_s22, %s9514_s23  ;;  %p9518_p7 = scmp.lt.u32.totalorder %s9514_s23, %s10800_s22 }
  0x86   :  { %p9520_p8 = pnand %p9518_p7, %p9515_p6 }
  0x88   :  { %9523 = shalt.err (!%p9520_p8)
}
  0x89   :  { %s9524_s4 = scalar_lea.vmem %s67_s13, 2304  ;;  %p9529_p10 = scmp.lt.s32.totalorder %s67_s13, %s67_s13 }
  0x8a   :  { %p9525_p9 = scmp.ne.s32.totalorder %s67_s13, %s9524_s4  ;;  %p9530_p11 = scmp.lt.s32.totalorder %s9524_s4, %s9524_s4 }
  0x8c   :  { %p9531_p12 = por %p9530_p11, %p9529_p10 }
  0x8e   :  { %p9532_p13 = pnand %p9531_p12, %p9525_p9 }
  0x90   :  { %9535 = shalt.err (!%p9532_p13)
}
  0x91   :  { %s9646_s24 = smov 64   ;;  %s9647_s25 = smov 4  }
  0x92   :  { %72 = dma.hbm_to_vmem [thread:$0]  %s10800_s22, 2304, %s67_s13, [#allocation5], %s9646_s24, %s9646_s24, %s9647_s25  }
  0x93   :  { %s9648_s2 = smov [#allocation9]   ;;  %s9649_s5 = smov [#allocation12]  }
  0x94   :  { %s95_s30 = sshll.u32 %s9648_s2, 4  ;;  %s116_s29 = sshll.u32 %s9649_s5, 4  ;;  %s96_s30 = int_to_ptr.vmem [resolvable:$true] %s95_s30  ;;  %s9856_s29 = int_to_ptr.vmem [resolvable:$true] %s116_s29 }
  0x95   :  { %s9536_s1 = scalar_lea.hbm %s10774_s10, 16 }
  0x96   :  { %p9537_p0 = scmp.ne.s32.totalorder %s10774_s10, %s9536_s1  ;;  %p9540_p1 = scmp.lt.u32.totalorder %s9536_s1, %s10774_s10 }
  0x98   :  { %p9542_p2 = pnand %p9540_p1, %p9537_p0 }
  0x9a   :  { %9545 = shalt.err (!%p9542_p2)
}
  0x9b   :  { %s9546_s13 = scalar_lea.vmem %s96_s30, 16  ;;  %s9550_s22 = scalar_lea.vmem %s96_s30, 32 }
  0x9c   :  { %p9547_p3 = scmp.ne.s32.totalorder %s96_s30, %s9546_s13  ;;  %p9551_p4 = scmp.lt.s32.totalorder %s96_s30, %s96_s30 }
  0x9d   :  { %p9552_p5 = scmp.lt.s32.totalorder %s9550_s22, %s9546_s13 }
  0x9f   :  { %p9553_p6 = por %p9552_p5, %p9551_p4 }
  0xa1   :  { %p9554_p7 = pnand %p9553_p6, %p9547_p3 }
  0xa3   :  { %9557 = shalt.err (!%p9554_p7)
}
  0xa4   :  { %98 = dma.hbm_to_vmem [thread:$0]  %s10774_s10, 16, %s96_s30, [#allocation8]  }
  0xa5   :  { %s9558_s11 = scalar_lea.hbm %s10776_s12, 256 }
  0xa6   :  { %p9559_p8 = scmp.ne.s32.totalorder %s10776_s12, %s9558_s11  ;;  %p9562_p9 = scmp.lt.u32.totalorder %s9558_s11, %s10776_s12 }
  0xa8   :  { %p9564_p10 = pnand %p9562_p9, %p9559_p8 }
  0xaa   :  { %9567 = shalt.err (!%p9564_p10)
}
  0xab   :  { %s9568_s28 = scalar_lea.vmem %s9856_s29, 256  ;;  %p9573_p12 = scmp.lt.s32.totalorder %s9856_s29, %s9856_s29 }
  0xac   :  { %p9569_p11 = scmp.ne.s32.totalorder %s9856_s29, %s9568_s28  ;;  %p9574_p13 = scmp.lt.s32.totalorder %s9568_s28, %s9568_s28 }
  0xae   :  { %p9575_p0 = por %p9574_p13, %p9573_p12 }
  0xb0   :  { %p9576_p1 = pnand %p9575_p0, %p9569_p11 }
  0xb2   :  { %9579 = shalt.err (!%p9576_p1)
}
  0xb3   :  { %122 = dma.hbm_to_vmem [thread:$0]  %s10776_s12, 256, %s9856_s29, [#allocation11], %s9646_s24, %s9646_s24, %s9647_s25  }
  0xb4   :  { %s9650_s4 = smov [#allocation15]   ;;  %s9651_s22 = smov [#allocation18]  }
  0xb5   :  { %s138_s13 = sshll.u32 %s9650_s4, 4  ;;  %s164_s0 = sshll.u32 %s9651_s22, 4  ;;  %s139_s13 = int_to_ptr.vmem [resolvable:$true] %s138_s13  ;;  %s9890_s0 = int_to_ptr.vmem [resolvable:$true] %s164_s0 }
  0xb6   :  { %s9580_s5 = scalar_lea.hbm %s10778_s14, 256 }
  0xb7   :  { %p9581_p2 = scmp.ne.s32.totalorder %s10778_s14, %s9580_s5  ;;  %p9584_p3 = scmp.lt.u32.totalorder %s9580_s5, %s10778_s14 }
  0xb9   :  { %p9586_p4 = pnand %p9584_p3, %p9581_p2 }
  0xbb   :  { %9589 = shalt.err (!%p9586_p4)
}
  0xbc   :  { %s9590_s12 = scalar_lea.vmem %s139_s13, 256  ;;  %p9595_p6 = scmp.lt.s32.totalorder %s139_s13, %s139_s13 }
  0xbd   :  { %p9591_p5 = scmp.ne.s32.totalorder %s139_s13, %s9590_s12  ;;  %p9596_p7 = scmp.lt.s32.totalorder %s9590_s12, %s9590_s12 }
  0xbf   :  { %p9597_p8 = por %p9596_p7, %p9595_p6 }
  0xc1   :  { %p9598_p9 = pnand %p9597_p8, %p9591_p5 }
  0xc3   :  { %9601 = shalt.err (!%p9598_p9)
}
  0xc4   :  { %144 = dma.hbm_to_vmem [thread:$0]  %s10778_s14, 256, %s139_s13, [#allocation14], %s9646_s24, %s9646_s24, %s9647_s25  }
  0xc5   :  { %s9602_s30 = scalar_lea.hbm %s10782_s18, 64 }
  0xc6   :  { %p9603_p10 = scmp.ne.s32.totalorder %s10782_s18, %s9602_s30  ;;  %p9606_p11 = scmp.lt.u32.totalorder %s9602_s30, %s10782_s18 }
  0xc8   :  { %p9608_p12 = pnand %p9606_p11, %p9603_p10 }
  0xca   :  { %9611 = shalt.err (!%p9608_p12)
}
  0xcb   :  { %s9612_s5 = scalar_lea.vmem %s9890_s0, 64  ;;  %p9617_p0 = scmp.lt.s32.totalorder %s9890_s0, %s9890_s0 }
  0xcc   :  { %p9613_p13 = scmp.ne.s32.totalorder %s9890_s0, %s9612_s5  ;;  %p9618_p1 = scmp.lt.s32.totalorder %s9612_s5, %s9612_s5 }
  0xce   :  { %p9619_p2 = por %p9618_p1, %p9617_p0 }
  0xd0   :  { %p9620_p3 = pnand %p9619_p2, %p9613_p13 }
  0xd2   :  { %9623 = shalt.err (!%p9620_p3)
}
  0xd3   :  { %170 = dma.hbm_to_vmem [thread:$0]  %s10782_s18, 64, %s9890_s0, [#allocation17], %s9639_s7, %s9639_s7, %s9640_s27  }
  0xd4   :  { %9624 = dma.done.wait [#allocation3], 36864  }
  0xd5   :  { %9625 = vsyncadd [#allocation3], 4294930432 }
  0xd6   :  { %9626 = dma.done.wait [#allocation5], 2320  }
  0xd7   :  { %9627 = vsyncadd [#allocation5], 4294964976 }
  0xd8   :  { %9628 = dma.done.wait [#allocation8], 32  }
  0xd9   :  { %9629 = vsyncadd [#allocation8], 4294967264 }
  0xda   :  { %9630 = dma.done.wait [#allocation11], 320  }
  0xdb   :  { %9631 = vsyncadd [#allocation11], 4294966976 }
  0xdc   :  { %9632 = dma.done.wait [#allocation14], 272  }
  0xdd   :  { %9633 = vsyncadd [#allocation14], 4294967024 }
  0xde   :  { %9634 = dma.done.wait [#allocation17], 80  }
  0xdf   :  { %9635 = vsyncadd [#allocation17], 4294967216  ;;  %v9652_v0 = vmov 0   ;;  %s10801_s27 = sld [smem:[#allocation30_spill]]  ;;  %v8901_v6 = vld [vmem:[#allocation2 + $0x4] ss:$16 sps:$4 sm:$0xff]  }
  0xe0   :  { %2191 = vmatprep.subr.bf16.mxu0 %v9652_v0  ;;  %8424 = vmatprep.subr.bf16.mxu1 %v9652_v0  ;;  %v8899_v18 = vld [vmem:[#allocation2] ss:$16 sps:$4 sm:$0xff]   ;;  %v8903_v20 = vld [vmem:[#allocation2 + $0x24] ss:$16 sps:$4 sm:$0xff]   ;;  %s10802_s24 = sld [smem:[#allocation33_spill]]  ;;  %vm3453_vm0 = vcmask 1043456  }
  0xe1   :  { %8881 = vset.pattern.permute.xlu0 %v9652_v0  ;;  %8882 = vset.pattern.permute.xlu1 %v9652_v0  ;;  %v8905_v22 = vld [vmem:[#allocation2 + $0x20] ss:$16 sps:$4 sm:$0xff]   ;;  %v8906_v23 = vld [vmem:[#allocation2 + $0x44] ss:$16 sps:$4 sm:$0xff]   ;;  %vm3428_vm1 = vcmask 64512   ;;  %vm9654_vm2 = vmmov 0  }
  0xe2   :  { %2223 = vmatprep.mubr.bf16.mxu0 %v8901_v6  ;;  %v8908_v26 = vld [vmem:[#allocation2 + $0x40] ss:$16 sps:$4 sm:$0xff]   ;;  %v8909_v27 = vld [vmem:[#allocation2 + $0x64] ss:$16 sps:$4 sm:$0xff]   ;;  %vm5730_vm3 = vcmask 261120   ;;  %vm6737_vm4 = vcmask 1040384  }
  0xe3   :  { %v8911_v30 = vld [vmem:[#allocation2 + $0x60] ss:$16 sps:$4 sm:$0xff]   ;;  %v8913_v31 = vld [vmem:[#allocation2 + $0x84] ss:$16 sps:$4 sm:$0xff]   ;;  %vm6733_vm5 = vcmask 15360   ;;  %vm7078_vm6 = vcmask 31744  }
  0xe4   :  { %v8915_v34 = vld [vmem:[#allocation2 + $0x80] ss:$16 sps:$4 sm:$0xff]   ;;  %v8916_v35 = vld [vmem:[#allocation2 + $0xa4] ss:$16 sps:$4 sm:$0xff]   ;;  %vm7157_vm7 = vcmask 519168  }
  0xe5   :  { %v8883_v1 = vld [vmem:[%s10801_s27] sm:$0xff]   ;;  %v8884_v2 = vld [vmem:[%s10801_s27 + $0x8] sm:$0xff]   ;;  %v8885_v3 = vld [vmem:[%s10801_s27 + $0x10] sm:$0xff]  }
  0xe6   :  { %2192 = vmatpush1.bf16.msra.mxu0 %v8883_v1  ;;  %8440 = vmatpush1.bf16.msra.mxu1 %v8883_v1  ;;  %v8886_v4 = vld [vmem:[%s10801_s27 + $0x18] sm:$0xff]   ;;  %v8887_v5 = vld [vmem:[%s10801_s27 + $0x20] sm:$0xff]   ;;  %v8888_v7 = vld [vmem:[%s10801_s27 + $0x28] sm:$0xff]  }
  0xe7   :  { %2193 = vmatprep.subr.bf16.mxu0 %v9652_v0  ;;  %8425 = vmatprep.subr.bf16.mxu1 %v9652_v0  ;;  %v8889_v8 = vld [vmem:[%s10801_s27 + $0x30] sm:$0xff]   ;;  %v8890_v9 = vld [vmem:[%s10801_s27 + $0x38] sm:$0xff]   ;;  %v8891_v10 = vld [vmem:[%s10801_s27 + $0x40] sm:$0xff]  }
  0xe8   :  { %v8892_v11 = vld [vmem:[%s10801_s27 + $0x48] sm:$0xff]   ;;  %v8893_v12 = vld [vmem:[%s10801_s27 + $0x50] sm:$0xff]   ;;  %v8894_v13 = vld [vmem:[%s10801_s27 + $0x58] sm:$0xff]  }
  0xe9   :  { %v8895_v14 = vld [vmem:[%s10801_s27 + $0x60] sm:$0xff]   ;;  %v8896_v15 = vld [vmem:[%s10801_s27 + $0x68] sm:$0xff]   ;;  %v8897_v16 = vld [vmem:[%s10801_s27 + $0x70] sm:$0xff]  }
  0xea   :  { %2194 = vmatpush1.bf16.msra.mxu0 %v8884_v2  ;;  %8441 = vmatpush1.bf16.msra.mxu1 %v8884_v2  ;;  %v8898_v17 = vld [vmem:[%s10801_s27 + $0x78] sm:$0xff]   ;;  %v8902_v19 = vld [vmem:[%s10801_s27 + $0x80] sm:$0xff]   ;;  %v8912_v21 = vld [vmem:[%s10801_s27 + $0x88] sm:$0xff]  }
  0xeb   :  { %2195 = vmatprep.subr.bf16.mxu0 %v9652_v0  ;;  %8426 = vmatprep.subr.bf16.mxu1 %v9652_v0  ;;  %v8921_v24 = vld [vmem:[%s10801_s27 + $0x90] sm:$0xff]   ;;  %v8929_v25 = vld [vmem:[%s10801_s27 + $0x98] sm:$0xff]   ;;  %v8939_v28 = vld [vmem:[%s10801_s27 + $0xa0] sm:$0xff]  }
  0xec   :  { %v8946_v29 = vld [vmem:[%s10801_s27 + $0xa8] sm:$0xff]   ;;  %v8956_v32 = vld [vmem:[%s10801_s27 + $0xb0] sm:$0xff]   ;;  %v8966_v33 = vld [vmem:[%s10801_s27 + $0xb8] sm:$0xff]  }
  0xed   :  { %v8918_v36 = vld [vmem:[#allocation2 + $0xa0] ss:$16 sps:$4 sm:$0xff]   ;;  %v8919_v37 = vld [vmem:[#allocation2 + $0xc4] ss:$16 sps:$4 sm:$0xff]   ;;  %v8983_v45 = vld [vmem:[%s10801_s27 + $0xc8] sm:$0xff]  }
  0xee   :  { %2196 = vmatpush1.bf16.msra.mxu0 %v8885_v3  ;;  %8442 = vmatpush1.bf16.msra.mxu1 %v8885_v3  ;;  %v8973_v38 = vld [vmem:[%s10801_s27 + $0xc0] sm:$0xff]   ;;  %v8992_v50 = vld [vmem:[%s10801_s27 + $0xd0] sm:$0xff]   ;;  %v9000_v57 = vld [vmem:[%s10801_s27 + $0xd8] sm:$0xff]  }
  0xef   :  { %2197 = vmatprep.subr.bf16.mxu0 %v9652_v0  ;;  %8427 = vmatprep.subr.bf16.mxu1 %v9652_v0  ;;  %v8922_v39 = vld [vmem:[#allocation2 + $0xc0] ss:$16 sps:$4 sm:$0xff]   ;;  %v8923_v40 = vld [vmem:[#allocation2 + $0xe4] ss:$16 sps:$4 sm:$0xff]   ;;  %v9017_v6 = vld [vmem:[%s10801_s27 + $0xe8] sm:$0xff]  }
  0xf0   :  { %v8925_v41 = vld [vmem:[#allocation2 + $0xe0] ss:$16 sps:$4 sm:$0xff]   ;;  %v8926_v42 = vld [vmem:[#allocation2 + $0x104] ss:$16 sps:$4 sm:$0xff]  }
  0xf1   :  { %v8928_v43 = vld [vmem:[#allocation2 + $0x100] ss:$16 sps:$4 sm:$0xff]   ;;  %v8930_v44 = vld [vmem:[#allocation2 + $0x124] ss:$16 sps:$4 sm:$0xff]  }
  0xf2   :  { %2198 = vmatpush1.bf16.msra.mxu0 %v8886_v4  ;;  %8443 = vmatpush1.bf16.msra.mxu1 %v8886_v4  ;;  %v8932_v46 = vld [vmem:[#allocation2 + $0x120] ss:$16 sps:$4 sm:$0xff]   ;;  %v8933_v47 = vld [vmem:[#allocation2 + $0x144] ss:$16 sps:$4 sm:$0xff]  }
  0xf3   :  { %2199 = vmatprep.subr.bf16.mxu0 %v9652_v0  ;;  %8428 = vmatprep.subr.bf16.mxu1 %v9652_v0  ;;  %v8935_v48 = vld [vmem:[#allocation2 + $0x140] ss:$16 sps:$4 sm:$0xff]   ;;  %v8936_v49 = vld [vmem:[#allocation2 + $0x164] ss:$16 sps:$4 sm:$0xff]  }
  0xf4   :  { %v8938_v51 = vld [vmem:[#allocation2 + $0x160] ss:$16 sps:$4 sm:$0xff]   ;;  %v8940_v52 = vld [vmem:[#allocation2 + $0x184] ss:$16 sps:$4 sm:$0xff]  }
  0xf5   :  { %v8942_v53 = vld [vmem:[#allocation2 + $0x180] ss:$16 sps:$4 sm:$0xff]   ;;  %v8943_v54 = vld [vmem:[#allocation2 + $0x1a4] ss:$16 sps:$4 sm:$0xff]  }
  0xf6   :  { %2200 = vmatpush1.bf16.msra.mxu0 %v8887_v5  ;;  %8444 = vmatpush1.bf16.msra.mxu1 %v8887_v5  ;;  %v8945_v55 = vld [vmem:[#allocation2 + $0x1a0] ss:$16 sps:$4 sm:$0xff]   ;;  %v8947_v56 = vld [vmem:[#allocation2 + $0x1c4] ss:$16 sps:$4 sm:$0xff]  }
  0xf7   :  { %2201 = vmatprep.subr.bf16.mxu0 %v9652_v0  ;;  %8429 = vmatprep.subr.bf16.mxu1 %v9652_v0  ;;  %v8949_v58 = vld [vmem:[#allocation2 + $0x1c0] ss:$16 sps:$4 sm:$0xff]   ;;  %v8950_v59 = vld [vmem:[#allocation2 + $0x1e4] ss:$16 sps:$4 sm:$0xff]  }
  0xf8   :  { %v8952_v60 = vld [vmem:[#allocation2 + $0x1e0] ss:$16 sps:$4 sm:$0xff]   ;;  %v8953_v61 = vld [vmem:[#allocation2 + $0x204] ss:$16 sps:$4 sm:$0xff]  }
  0xf9   :  { %v8955_v62 = vld [vmem:[#allocation2 + $0x200] ss:$16 sps:$4 sm:$0xff]   ;;  %v8957_v63 = vld [vmem:[#allocation2 + $0x224] ss:$16 sps:$4 sm:$0xff]  }
  0xfa   :  { %2202 = vmatpush1.bf16.msra.mxu0 %v8888_v7  ;;  %8445 = vmatpush1.bf16.msra.mxu1 %v8888_v7  ;;  %v9010_v1 = vld [vmem:[%s10801_s27 + $0xe0] sm:$0xff]  }
  0xfb   :  { %2203 = vmatprep.subr.bf16.mxu0 %v9652_v0  ;;  %8430 = vmatprep.subr.bf16.mxu1 %v9652_v0  ;;  %v8959_v2 = vld [vmem:[#allocation2 + $0x220] ss:$16 sps:$4 sm:$0xff]   ;;  %v8960_v3 = vld [vmem:[#allocation2 + $0x244] ss:$16 sps:$4 sm:$0xff]  }
  0xfc   :  { %v8962_v4 = vld [vmem:[#allocation2 + $0x240] ss:$16 sps:$4 sm:$0xff]   ;;  %v8963_v5 = vld [vmem:[#allocation2 + $0x264] ss:$16 sps:$4 sm:$0xff]  }
  0xfd   :  { %v8965_v7 = vld [vmem:[#allocation2 + $0x260] ss:$16 sps:$4 sm:$0xff]  }
  0xfe   :  { %2204 = vmatpush1.bf16.msra.mxu0 %v8889_v8  ;;  %8446 = vmatpush1.bf16.msra.mxu1 %v8889_v8  ;;  %v8967_v8 = vld [vmem:[#allocation2 + $0x284] ss:$16 sps:$4 sm:$0xff]  }
  0xff   :  { %2205 = vmatprep.subr.bf16.mxu0 %v9652_v0  ;;  %8431 = vmatprep.subr.bf16.mxu1 %v9652_v0 }
 0x102   :  { %2206 = vmatpush1.bf16.msra.mxu0 %v8890_v9  ;;  %8447 = vmatpush1.bf16.msra.mxu1 %v8890_v9  ;;  %v8969_v9 = vld [vmem:[#allocation2 + $0x280] ss:$16 sps:$4 sm:$0xff]  }
 0x103   :  { %2207 = vmatprep.subr.bf16.mxu0 %v9652_v0  ;;  %8432 = vmatprep.subr.bf16.mxu1 %v9652_v0 }
 0x106   :  { %2208 = vmatpush1.bf16.msra.mxu0 %v8891_v10  ;;  %8448 = vmatpush1.bf16.msra.mxu1 %v8891_v10  ;;  %v8970_v10 = vld [vmem:[#allocation2 + $0x2a4] ss:$16 sps:$4 sm:$0xff]  }
 0x107   :  { %2209 = vmatprep.subr.bf16.mxu0 %v9652_v0  ;;  %8433 = vmatprep.subr.bf16.mxu1 %v9652_v0 }
 0x10a   :  { %2210 = vmatpush1.bf16.msra.mxu0 %v8892_v11  ;;  %8449 = vmatpush1.bf16.msra.mxu1 %v8892_v11  ;;  %v8972_v11 = vld [vmem:[#allocation2 + $0x2a0] ss:$16 sps:$4 sm:$0xff]  }
 0x10b   :  { %2211 = vmatprep.subr.bf16.mxu0 %v9652_v0  ;;  %8434 = vmatprep.subr.bf16.mxu1 %v9652_v0 }
 0x10e   :  { %2212 = vmatpush1.bf16.msra.mxu0 %v8893_v12  ;;  %8450 = vmatpush1.bf16.msra.mxu1 %v8893_v12  ;;  %v8974_v12 = vld [vmem:[#allocation2 + $0x2c4] ss:$16 sps:$4 sm:$0xff]  }
 0x10f   :  { %2213 = vmatprep.subr.bf16.mxu0 %v9652_v0  ;;  %8435 = vmatprep.subr.bf16.mxu1 %v9652_v0 }
 0x112   :  { %2214 = vmatpush1.bf16.msra.mxu0 %v8894_v13  ;;  %8451 = vmatpush1.bf16.msra.mxu1 %v8894_v13  ;;  %v9027_v13 = vld [vmem:[%s10801_s27 + $0xf0] sm:$0xff]  }
 0x113   :  { %2215 = vmatprep.subr.bf16.mxu0 %v9652_v0  ;;  %8436 = vmatprep.subr.bf16.mxu1 %v9652_v0 }
 0x116   :  { %2216 = vmatpush1.bf16.msra.mxu0 %v8895_v14  ;;  %8452 = vmatpush1.bf16.msra.mxu1 %v8895_v14  ;;  %v8976_v14 = vld [vmem:[#allocation2 + $0x2c0] ss:$16 sps:$4 sm:$0xff]  }
 0x117   :  { %2217 = vmatprep.subr.bf16.mxu0 %v9652_v0  ;;  %8437 = vmatprep.subr.bf16.mxu1 %v9652_v0 }
 0x11a   :  { %2218 = vmatpush1.bf16.msra.mxu0 %v8896_v15  ;;  %8453 = vmatpush1.bf16.msra.mxu1 %v8896_v15  ;;  %v8977_v15 = vld [vmem:[#allocation2 + $0x2e4] ss:$16 sps:$4 sm:$0xff]  }
 0x11b   :  { %2219 = vmatprep.subr.bf16.mxu0 %v9652_v0  ;;  %8438 = vmatprep.subr.bf16.mxu1 %v9652_v0 }
 0x11e   :  { %2220 = vmatpush1.bf16.msra.mxu0 %v8897_v16  ;;  %8454 = vmatpush1.bf16.msra.mxu1 %v8897_v16  ;;  %v8979_v16 = vld [vmem:[#allocation2 + $0x2e0] ss:$16 sps:$4 sm:$0xff]  }
 0x11f   :  { %2221 = vmatprep.subr.bf16.mxu0 %v9652_v0  ;;  %8439 = vmatprep.subr.bf16.mxu1 %v9652_v0 }
 0x122   :  { %2222 = vmatpush1.bf16.msra.mxu0 %v8898_v17  ;;  %8455 = vmatpush1.bf16.msra.mxu1 %v8898_v17  ;;  %v8980_v17 = vld [vmem:[#allocation2 + $0x304] ss:$16 sps:$4 sm:$0xff]  }
 0x123   :  { %2800 = vmatprep.subr.bf16.mxu0 %v9652_v0 }
 0x125   :  { %2224 = vmatmul.mubr.bf16.vlgmr.msra.gmra.mrb[0].mxu0 %v8899_v18  ;;  %v8982_v18 = vld [vmem:[#allocation2 + $0x300] ss:$16 sps:$4 sm:$0xff]  }
 0x126   :  { %2801 = vmatpush1.bf16.msra.mxu0 %v8902_v19  ;;  %2231 = vmatprep.mubr.bf16.mxu0 %v8903_v20  ;;  %v8984_v19 = vld [vmem:[#allocation2 + $0x324] ss:$16 sps:$4 sm:$0xff]   ;;  %v9037_v20 = vld [vmem:[%s10801_s27 + $0xf8] sm:$0xff]  }
 0x127   :  { %2802 = vmatprep.subr.bf16.mxu0 %v9652_v0 }
 0x12a   :  { %2803 = vmatpush1.bf16.msra.mxu0 %v8912_v21  ;;  %v8986_v21 = vld [vmem:[#allocation2 + $0x320] ss:$16 sps:$4 sm:$0xff]  }
 0x12b   :  { %2804 = vmatprep.subr.bf16.mxu0 %v9652_v0 }
 0x12d   :  { %2232 = vmatmul.mubr.bf16.gmra.mrb[4].mxu0 %v8905_v22  ;;  %v8987_v22 = vld [vmem:[#allocation2 + $0x344] ss:$16 sps:$4 sm:$0xff]  }
 0x12e   :  { %2239 = vmatprep.mubr.bf16.mxu0 %v8906_v23  ;;  %2805 = vmatpush1.bf16.msra.mxu0 %v8921_v24  ;;  %v8990_v23 = vld [vmem:[#allocation2 + $0x364] ss:$16 sps:$4 sm:$0xff]   ;;  %v8993_v24 = vld [vmem:[#allocation2 + $0x360] ss:$16 sps:$4 sm:$0xff]  }
 0x12f   :  { %2806 = vmatprep.subr.bf16.mxu0 %v9652_v0 }
 0x132   :  { %2807 = vmatpush1.bf16.msra.mxu0 %v8929_v25  ;;  %v8994_v25 = vld [vmem:[#allocation2 + $0x384] ss:$16 sps:$4 sm:$0xff]  }
 0x133   :  { %2808 = vmatprep.subr.bf16.mxu0 %v9652_v0 }
 0x135   :  { %2240 = vmatmul.mubr.bf16.gmra.mrb[8].mxu0 %v8908_v26  ;;  %v8996_v26 = vld [vmem:[#allocation2 + $0x380] ss:$16 sps:$4 sm:$0xff]  }
 0x136   :  { %2247 = vmatprep.mubr.bf16.mxu0 %v8909_v27  ;;  %2809 = vmatpush1.bf16.msra.mxu0 %v8939_v28  ;;  %v8997_v27 = vld [vmem:[#allocation2 + $0x3a4] ss:$16 sps:$4 sm:$0xff]   ;;  %v8999_v28 = vld [vmem:[#allocation2 + $0x3a0] ss:$16 sps:$4 sm:$0xff]  }
 0x137   :  { %2810 = vmatprep.subr.bf16.mxu0 %v9652_v0 }
 0x13a   :  { %2811 = vmatpush1.bf16.msra.mxu0 %v8946_v29  ;;  %v9001_v29 = vld [vmem:[#allocation2 + $0x3c4] ss:$16 sps:$4 sm:$0xff]  }
 0x13b   :  { %2812 = vmatprep.subr.bf16.mxu0 %v9652_v0 }
 0x13d   :  { %2248 = vmatmul.mubr.bf16.gmra.mrb[12].mxu0 %v8911_v30  ;;  %v9003_v30 = vld [vmem:[#allocation2 + $0x3c0] ss:$16 sps:$4 sm:$0xff]  }
 0x13e   :  { %2255 = vmatprep.mubr.bf16.mxu0 %v8913_v31  ;;  %2813 = vmatpush1.bf16.msra.mxu0 %v8956_v32  ;;  %v9004_v31 = vld [vmem:[#allocation2 + $0x3e4] ss:$16 sps:$4 sm:$0xff]   ;;  %v9006_v32 = vld [vmem:[#allocation2 + $0x3e0] ss:$16 sps:$4 sm:$0xff]  }
 0x13f   :  { %2814 = vmatprep.subr.bf16.mxu0 %v9652_v0 }
 0x142   :  { %2815 = vmatpush1.bf16.msra.mxu0 %v8966_v33  ;;  %v9007_v33 = vld [vmem:[#allocation2 + $0x404] ss:$16 sps:$4 sm:$0xff]  }
 0x143   :  { %2816 = vmatprep.subr.bf16.mxu0 %v9652_v0 }
 0x145   :  { %2256 = vmatmul.mubr.bf16.gmra.mrb[16].mxu0 %v8915_v34  ;;  %v9059_v34 = vld [vmem:[#allocation2 + $0x540] ss:$16 sps:$4 sm:$0xff]  }
 0x146   :  { %2263 = vmatprep.mubr.bf16.mxu0 %v8916_v35  ;;  %2817 = vmatpush1.bf16.msra.mxu0 %v8973_v38  ;;  %v9061_v35 = vld [vmem:[#allocation2 + $0x544] ss:$16 sps:$4 sm:$0xff]  }
 0x147   :  { %2818 = vmatprep.subr.bf16.mxu0 %v9652_v0  ;;  %2559 = vmatprep.mubr.bf16.mxu1 %v9061_v35  ;;  %v9065_v38 = vld [vmem:[#allocation2 + $0x564] ss:$16 sps:$4 sm:$0xff]   ;;  %v9157_v35 = vld [vmem:[#allocation2 + $0x740] ss:$16 sps:$4 sm:$0xff]  }
 0x148   :  { %2560 = vmatmul.mubr.bf16.vlgmr.msra.gmra.mrb[0].mxu1 %v9059_v34  ;;  %v9155_v34 = vld [vmem:[#allocation2 + $0x744] ss:$16 sps:$4 sm:$0xff]  }
 0x149   :  { %2567 = vmatprep.mubr.bf16.mxu1 %v9065_v38  ;;  %v9161_v38 = vld [vmem:[#allocation2 + $0x764] ss:$16 sps:$4 sm:$0xff]  }
 0x14a   :  { %2819 = vmatpush1.bf16.msra.mxu0 %v8983_v45  ;;  %v9018_v45 = vld [vmem:[#allocation2 + $0x464] ss:$16 sps:$4 sm:$0xff]  }
 0x14b   :  { %2820 = vmatprep.subr.bf16.mxu0 %v9652_v0 }
 0x14d   :  { %2264 = vmatmul.mubr.bf16.gmra.mrb[20].mxu0 %v8918_v36  ;;  %v9009_v36 = vld [vmem:[#allocation2 + $0x400] ss:$16 sps:$4 sm:$0xff]  }
 0x14e   :  { %2271 = vmatprep.mubr.bf16.mxu0 %v8919_v37  ;;  %2821 = vmatpush1.bf16.msra.mxu0 %v8992_v50  ;;  %v9011_v37 = vld [vmem:[#allocation2 + $0x424] ss:$16 sps:$4 sm:$0xff]  }
 0x14f   :  { %2822 = vmatprep.subr.bf16.mxu0 %v9652_v0  ;;  %v9083_v50 = vld [vmem:[#allocation2 + $0x5c4] ss:$16 sps:$4 sm:$0xff]  }
 0x152   :  { %2823 = vmatpush1.bf16.msra.mxu0 %v9000_v57  ;;  %v9028_v57 = vld [vmem:[#allocation2 + $0x4c4] ss:$16 sps:$4 sm:$0xff]  }
 0x153   :  { %2824 = vmatprep.subr.bf16.mxu0 %v9652_v0 }
 0x155   :  { %2272 = vmatmul.mubr.bf16.gmra.mrb[24].mxu0 %v8922_v39  ;;  %v9067_v39 = vld [vmem:[#allocation2 + $0x560] ss:$16 sps:$4 sm:$0xff]  }
 0x156   :  { %2279 = vmatprep.mubr.bf16.mxu0 %v8923_v40  ;;  %2825 = vmatpush1.bf16.msra.mxu0 %v9010_v1  ;;  %v9013_v40 = vld [vmem:[#allocation2 + $0x420] ss:$16 sps:$4 sm:$0xff]  }
 0x157   :  { %2826 = vmatprep.subr.bf16.mxu0 %v9652_v0  ;;  %2568 = vmatmul.mubr.bf16.gmra.mrb[4].mxu1 %v9067_v39  ;;  %v9033_v1 = vld [vmem:[#allocation2 + $0x4e0] ss:$16 sps:$4 sm:$0xff]  }
 0x158   :  { %v9163_v39 = vld [vmem:[#allocation2 + $0x760] ss:$16 sps:$4 sm:$0xff]  }
 0x15a   :  { %2827 = vmatpush1.bf16.msra.mxu0 %v9017_v6  ;;  %v9038_v6 = vld [vmem:[#allocation2 + $0x524] ss:$16 sps:$4 sm:$0xff]  }
 0x15b   :  { %2828 = vmatprep.subr.bf16.mxu0 %v9652_v0 }
 0x15d   :  { %2280 = vmatmul.mubr.bf16.gmra.mrb[28].mxu0 %v8925_v41  ;;  %v9014_v41 = vld [vmem:[#allocation2 + $0x444] ss:$16 sps:$4 sm:$0xff]  }
 0x15e   :  { %2287 = vmatprep.mubr.bf16.mxu0 %v8926_v42  ;;  %2829 = vmatpush1.bf16.msra.mxu0 %v9027_v13  ;;  %v9071_v42 = vld [vmem:[#allocation2 + $0x584] ss:$16 sps:$4 sm:$0xff]   ;;  %v9041_v13 = vld [vmem:[#allocation2 + $0x8] ss:$16 sps:$4 sm:$0xff]  }
 0x15f   :  { %2830 = vmatprep.subr.bf16.mxu0 %v9652_v0  ;;  %v8989_v0 = vld [vmem:[#allocation2 + $0x340] ss:$16 sps:$4 sm:$0xff]   ;;  %2575 = vmatprep.mubr.bf16.mxu1 %v9071_v42  ;;  %v9167_v42 = vld [vmem:[#allocation2 + $0x784] ss:$16 sps:$4 sm:$0xff]  }
 0x162   :  { %2831 = vmatpush1.bf16.msra.mxu0 %v9037_v20  ;;  %v9133_v20 = vld [vmem:[#allocation2 + $0x6c0] ss:$16 sps:$4 sm:$0xff]  }
 0x165   :  { %2288 = vmatmul.mubr.bf16.gmra.mrb[32].mxu0 %v8928_v43  ;;  %v9073_v43 = vld [vmem:[#allocation2 + $0x580] ss:$16 sps:$4 sm:$0xff]  }
 0x166   :  { %2295 = vmatprep.mubr.bf16.mxu0 %v8930_v44  ;;  %2576 = vmatmul.mubr.bf16.gmra.mrb[8].mxu1 %v9073_v43  ;;  %v9016_v44 = vld [vmem:[#allocation2 + $0x440] ss:$16 sps:$4 sm:$0xff]  }
 0x167   :  { %v9169_v43 = vld [vmem:[#allocation2 + $0x780] ss:$16 sps:$4 sm:$0xff]  }
 0x16d   :  { %2296 = vmatmul.mubr.bf16.gmra.mrb[36].mxu0 %v8932_v46  ;;  %v9077_v46 = vld [vmem:[#allocation2 + $0x5a4] ss:$16 sps:$4 sm:$0xff]  }
 0x16e   :  { %2303 = vmatprep.mubr.bf16.mxu0 %v8933_v47  ;;  %v9079_v47 = vld [vmem:[#allocation2 + $0x5a0] ss:$16 sps:$4 sm:$0xff]   ;;  %2583 = vmatprep.mubr.bf16.mxu1 %v9077_v46  ;;  %v9173_v46 = vld [vmem:[#allocation2 + $0x7a4] ss:$16 sps:$4 sm:$0xff]  }
 0x16f   :  { %2584 = vmatmul.mubr.bf16.gmra.mrb[12].mxu1 %v9079_v47  ;;  %v9175_v47 = vld [vmem:[#allocation2 + $0x7a0] ss:$16 sps:$4 sm:$0xff]  }
 0x170   :  { %2591 = vmatprep.mubr.bf16.mxu1 %v9083_v50  ;;  %v9179_v50 = vld [vmem:[#allocation2 + $0x7c4] ss:$16 sps:$4 sm:$0xff]  }
 0x175   :  { %2304 = vmatmul.mubr.bf16.gmra.mrb[40].mxu0 %v8935_v48  ;;  %v9020_v48 = vld [vmem:[#allocation2 + $0x460] ss:$16 sps:$4 sm:$0xff]  }
 0x176   :  { %2311 = vmatprep.mubr.bf16.mxu0 %v8936_v49  ;;  %v9021_v49 = vld [vmem:[#allocation2 + $0x484] ss:$16 sps:$4 sm:$0xff]  }
 0x17d   :  { %2312 = vmatmul.mubr.bf16.gmra.mrb[44].mxu0 %v8938_v51  ;;  %v9085_v51 = vld [vmem:[#allocation2 + $0x5c0] ss:$16 sps:$4 sm:$0xff]  }
 0x17e   :  { %2319 = vmatprep.mubr.bf16.mxu0 %v8940_v52  ;;  %2592 = vmatmul.mubr.bf16.gmra.mrb[16].mxu1 %v9085_v51  ;;  %v9023_v52 = vld [vmem:[#allocation2 + $0x480] ss:$16 sps:$4 sm:$0xff]  }
 0x17f   :  { %v9181_v51 = vld [vmem:[#allocation2 + $0x7c0] ss:$16 sps:$4 sm:$0xff]  }
 0x185   :  { %2320 = vmatmul.mubr.bf16.gmra.mrb[48].mxu0 %v8942_v53  ;;  %v9024_v53 = vld [vmem:[#allocation2 + $0x4a4] ss:$16 sps:$4 sm:$0xff]  }
 0x186   :  { %2327 = vmatprep.mubr.bf16.mxu0 %v8943_v54  ;;  %v9089_v54 = vld [vmem:[#allocation2 + $0x5e4] ss:$16 sps:$4 sm:$0xff]  }
 0x187   :  { %2599 = vmatprep.mubr.bf16.mxu1 %v9089_v54  ;;  %v9094_v54 = vld [vmem:[#allocation2 + $0x168] ss:$16 sps:$4 sm:$0xff]  }
 0x18d   :  { %2328 = vmatmul.mubr.bf16.gmra.mrb[52].mxu0 %v8945_v55  ;;  %v9091_v55 = vld [vmem:[#allocation2 + $0x5e0] ss:$16 sps:$4 sm:$0xff]  }
 0x18e   :  { %2335 = vmatprep.mubr.bf16.mxu0 %v8947_v56  ;;  %2600 = vmatmul.mubr.bf16.gmra.mrb[20].mxu1 %v9091_v55  ;;  %v9026_v56 = vld [vmem:[#allocation2 + $0x4a0] ss:$16 sps:$4 sm:$0xff]   ;;  %v9185_v55 = vld [vmem:[#allocation2 + $0x7e4] ss:$16 sps:$4 sm:$0xff]  }
 0x195   :  { %2336 = vmatmul.mubr.bf16.gmra.mrb[56].mxu0 %v8949_v58  ;;  %v9095_v58 = vld [vmem:[#allocation2 + $0x604] ss:$16 sps:$4 sm:$0xff]  }
 0x196   :  { %2343 = vmatprep.mubr.bf16.mxu0 %v8950_v59  ;;  %v9097_v59 = vld [vmem:[#allocation2 + $0x600] ss:$16 sps:$4 sm:$0xff]   ;;  %2607 = vmatprep.mubr.bf16.mxu1 %v9095_v58  ;;  %v9100_v58 = vld [vmem:[#allocation2 + $0x188] ss:$16 sps:$4 sm:$0xff]  }
 0x197   :  { %2608 = vmatmul.mubr.bf16.gmra.mrb[24].mxu1 %v9097_v59  ;;  %v9191_v59 = vld [vmem:[#allocation2 + $0x804] ss:$16 sps:$4 sm:$0xff]  }
 0x19d   :  { %2344 = vmatmul.mubr.bf16.gmra.mrb[60].mxu0 %v8952_v60  ;;  %v9030_v60 = vld [vmem:[#allocation2 + $0x4c0] ss:$16 sps:$4 sm:$0xff]  }
 0x19e   :  { %2351 = vmatprep.mubr.bf16.mxu0 %v8953_v61  ;;  %v9031_v61 = vld [vmem:[#allocation2 + $0x4e4] ss:$16 sps:$4 sm:$0xff]  }
 0x1a5   :  { %2352 = vmatmul.mubr.bf16.gmra.mrb[64].mxu0 %v8955_v62  ;;  %v9101_v62 = vld [vmem:[#allocation2 + $0x624] ss:$16 sps:$4 sm:$0xff]  }
 0x1a6   :  { %2359 = vmatprep.mubr.bf16.mxu0 %v8957_v63  ;;  %v9103_v63 = vld [vmem:[#allocation2 + $0x620] ss:$16 sps:$4 sm:$0xff]   ;;  %2615 = vmatprep.mubr.bf16.mxu1 %v9101_v62  ;;  %v9106_v62 = vld [vmem:[#allocation2 + $0x1a8] ss:$16 sps:$4 sm:$0xff]  }
 0x1a7   :  { %2616 = vmatmul.mubr.bf16.gmra.mrb[28].mxu1 %v9103_v63  ;;  %v9197_v63 = vld [vmem:[#allocation2 + $0x824] ss:$16 sps:$4 sm:$0xff]  }
 0x1ad   :  { %2360 = vmatmul.mubr.bf16.gmra.mrb[68].mxu0 %v8959_v2  ;;  %v9034_v2 = vld [vmem:[#allocation2 + $0x504] ss:$16 sps:$4 sm:$0xff]  }
 0x1ae   :  { %2367 = vmatprep.mubr.bf16.mxu0 %v8960_v3  ;;  %v9107_v3 = vld [vmem:[#allocation2 + $0x644] ss:$16 sps:$4 sm:$0xff]  }
 0x1af   :  { %2623 = vmatprep.mubr.bf16.mxu1 %v9107_v3  ;;  %v9112_v3 = vld [vmem:[#allocation2 + $0x1c8] ss:$16 sps:$4 sm:$0xff]  }
 0x1b5   :  { %2368 = vmatmul.mubr.bf16.gmra.mrb[72].mxu0 %v8962_v4  ;;  %v9109_v4 = vld [vmem:[#allocation2 + $0x640] ss:$16 sps:$4 sm:$0xff]  }
 0x1b6   :  { %2375 = vmatprep.mubr.bf16.mxu0 %v8963_v5  ;;  %2624 = vmatmul.mubr.bf16.gmra.mrb[32].mxu1 %v9109_v4  ;;  %v9036_v5 = vld [vmem:[#allocation2 + $0x500] ss:$16 sps:$4 sm:$0xff]   ;;  %v9203_v4 = vld [vmem:[#allocation2 + $0x844] ss:$16 sps:$4 sm:$0xff]  }
 0x1bd   :  { %2376 = vmatmul.mubr.bf16.gmra.mrb[76].mxu0 %v8965_v7  ;;  %v9113_v7 = vld [vmem:[#allocation2 + $0x664] ss:$16 sps:$4 sm:$0xff]  }
 0x1be   :  { %2383 = vmatprep.mubr.bf16.mxu0 %v8967_v8  ;;  %v9115_v8 = vld [vmem:[#allocation2 + $0x660] ss:$16 sps:$4 sm:$0xff]   ;;  %2631 = vmatprep.mubr.bf16.mxu1 %v9113_v7  ;;  %v9118_v7 = vld [vmem:[#allocation2 + $0x1e8] ss:$16 sps:$4 sm:$0xff]  }
 0x1bf   :  { %2632 = vmatmul.mubr.bf16.gmra.mrb[36].mxu1 %v9115_v8  ;;  %v9209_v8 = vld [vmem:[#allocation2 + $0x864] ss:$16 sps:$4 sm:$0xff]  }
 0x1c5   :  { %2384 = vmatmul.mubr.bf16.gmra.mrb[80].mxu0 %v8969_v9  ;;  %v9040_v9 = vld [vmem:[#allocation2 + $0x520] ss:$16 sps:$4 sm:$0xff]  }
 0x1c6   :  { %2391 = vmatprep.mubr.bf16.mxu0 %v8970_v10  ;;  %v9043_v10 = vld [vmem:[#allocation2 + $0xc] ss:$16 sps:$4 sm:$0xff]  }
 0x1cd   :  { %2392 = vmatmul.mubr.bf16.gmra.mrb[84].mxu0 %v8972_v11  ;;  %v9119_v11 = vld [vmem:[#allocation2 + $0x684] ss:$16 sps:$4 sm:$0xff]  }
 0x1ce   :  { %2399 = vmatprep.mubr.bf16.mxu0 %v8974_v12  ;;  %v9121_v12 = vld [vmem:[#allocation2 + $0x680] ss:$16 sps:$4 sm:$0xff]   ;;  %2639 = vmatprep.mubr.bf16.mxu1 %v9119_v11  ;;  %v9124_v11 = vld [vmem:[#allocation2 + $0x208] ss:$16 sps:$4 sm:$0xff]  }
 0x1cf   :  { %2640 = vmatmul.mubr.bf16.gmra.mrb[40].mxu1 %v9121_v12  ;;  %v9215_v12 = vld [vmem:[#allocation2 + $0x884] ss:$16 sps:$4 sm:$0xff]  }
 0x1d5   :  { %2400 = vmatmul.mubr.bf16.gmra.mrb[88].mxu0 %v8976_v14  ;;  %v9044_v14 = vld [vmem:[#allocation2 + $0x2c] ss:$16 sps:$4 sm:$0xff]  }
 0x1d6   :  { %2407 = vmatprep.mubr.bf16.mxu0 %v8977_v15  ;;  %v9125_v15 = vld [vmem:[#allocation2 + $0x6a4] ss:$16 sps:$4 sm:$0xff]  }
 0x1d7   :  { %2647 = vmatprep.mubr.bf16.mxu1 %v9125_v15  ;;  %v9130_v15 = vld [vmem:[#allocation2 + $0x228] ss:$16 sps:$4 sm:$0xff]  }
 0x1dd   :  { %2408 = vmatmul.mubr.bf16.gmra.mrb[92].mxu0 %v8979_v16  ;;  %v9127_v16 = vld [vmem:[#allocation2 + $0x6a0] ss:$16 sps:$4 sm:$0xff]  }
 0x1de   :  { %2415 = vmatprep.mubr.bf16.mxu0 %v8980_v17  ;;  %2648 = vmatmul.mubr.bf16.gmra.mrb[44].mxu1 %v9127_v16  ;;  %v9046_v17 = vld [vmem:[#allocation2 + $0x28] ss:$16 sps:$4 sm:$0xff]   ;;  %v9221_v16 = vld [vmem:[#allocation2 + $0x8a4] ss:$16 sps:$4 sm:$0xff]  }
 0x1e5   :  { %2416 = vmatmul.mubr.bf16.gmra.mrb[96].mxu0 %v8982_v18  ;;  %v9047_v18 = vld [vmem:[#allocation2 + $0x4c] ss:$16 sps:$4 sm:$0xff]  }
 0x1e6   :  { %2423 = vmatprep.mubr.bf16.mxu0 %v8984_v19  ;;  %v9131_v19 = vld [vmem:[#allocation2 + $0x6c4] ss:$16 sps:$4 sm:$0xff]  }
 0x1e7   :  { %2655 = vmatprep.mubr.bf16.mxu1 %v9131_v19  ;;  %v9136_v19 = vld [vmem:[#allocation2 + $0x248] ss:$16 sps:$4 sm:$0xff]  }
 0x1e8   :  { %2656 = vmatmul.mubr.bf16.gmra.mrb[48].mxu1 %v9133_v20  ;;  %v9227_v20 = vld [vmem:[#allocation2 + $0x8c4] ss:$16 sps:$4 sm:$0xff]  }
 0x1ed   :  { %2424 = vmatmul.mubr.bf16.gmra.mrb[100].mxu0 %v8986_v21  ;;  %v9049_v21 = vld [vmem:[#allocation2 + $0x48] ss:$16 sps:$4 sm:$0xff]  }
 0x1ee   :  { %2431 = vmatprep.mubr.bf16.mxu0 %v8987_v22  ;;  %v9050_v22 = vld [vmem:[#allocation2 + $0x6c] ss:$16 sps:$4 sm:$0xff]  }
 0x1f5   :  { %2432 = vmatmul.mubr.bf16.gmra.mrb[104].mxu0 %v8989_v0  ;;  %v9137_v0 = vld [vmem:[#allocation2 + $0x6e4] ss:$16 sps:$4 sm:$0xff]  }
 0x1f6   :  { %2439 = vmatprep.mubr.bf16.mxu0 %v8990_v23  ;;  %v9139_v23 = vld [vmem:[#allocation2 + $0x6e0] ss:$16 sps:$4 sm:$0xff]   ;;  %2663 = vmatprep.mubr.bf16.mxu1 %v9137_v0  ;;  %v7573_v0 = vld [vmem:[%s10802_s24 + $0x4] sm:$0xf] }
 0x1f7   :  { %2664 = vmatmul.mubr.bf16.gmra.mrb[52].mxu1 %v9139_v23  ;;  %8844 = vmatprep.subr.msk.bf16.mxu1 %vm3453_vm0, %v7573_v0  ;;  %v3455_v23 = vsel %vm3453_vm0, %v7573_v0, 0 }
 0x1f8   :  { %7975 = vmatpush3.bf16.msra.mxu1 %v3455_v23  ;;  %v9226_v23 = vld [vmem:[#allocation2 + $0x428] ss:$16 sps:$4 sm:$0xff]  }
 0x1fd   :  { %2440 = vmatmul.mubr.bf16.gmra.mrb[108].mxu0 %v8993_v24  ;;  %v9052_v24 = vld [vmem:[#allocation2 + $0x68] ss:$16 sps:$4 sm:$0xff]  }
 0x1fe   :  { %2447 = vmatprep.mubr.bf16.mxu0 %v8994_v25  ;;  %v9053_v25 = vld [vmem:[#allocation2 + $0x8c] ss:$16 sps:$4 sm:$0xff]  }
 0x205   :  { %2448 = vmatmul.mubr.bf16.gmra.mrb[112].mxu0 %v8996_v26  ;;  %v9143_v26 = vld [vmem:[#allocation2 + $0x704] ss:$16 sps:$4 sm:$0xff]  }
 0x206   :  { %2455 = vmatprep.mubr.bf16.mxu0 %v8997_v27  ;;  %v9145_v27 = vld [vmem:[#allocation2 + $0x700] ss:$16 sps:$4 sm:$0xff]   ;;  %2671 = vmatprep.mubr.bf16.mxu1 %v9143_v26  ;;  %v9146_v26 = vld [vmem:[#allocation2 + $0x28c] ss:$16 sps:$4 sm:$0xff]  }
 0x207   :  { %2672 = vmatmul.mubr.bf16.gmra.mrb[56].mxu1 %v9145_v27  ;;  %v9235_v27 = vld [vmem:[#allocation2 + $0x8e0] ss:$16 sps:$4 sm:$0xff]  }
 0x20d   :  { %2456 = vmatmul.mubr.bf16.gmra.mrb[116].mxu0 %v8999_v28  ;;  %v9055_v28 = vld [vmem:[#allocation2 + $0x88] ss:$16 sps:$4 sm:$0xff]  }
 0x20e   :  { %2463 = vmatprep.mubr.bf16.mxu0 %v9001_v29  ;;  %v9056_v29 = vld [vmem:[#allocation2 + $0xac] ss:$16 sps:$4 sm:$0xff]  }
 0x215   :  { %2464 = vmatmul.mubr.bf16.gmra.mrb[120].mxu0 %v9003_v30  ;;  %v9149_v30 = vld [vmem:[#allocation2 + $0x724] ss:$16 sps:$4 sm:$0xff]  }
 0x216   :  { %2471 = vmatprep.mubr.bf16.mxu0 %v9004_v31  ;;  %v9151_v31 = vld [vmem:[#allocation2 + $0x720] ss:$16 sps:$4 sm:$0xff]   ;;  %2679 = vmatprep.mubr.bf16.mxu1 %v9149_v30  ;;  %v9154_v30 = vld [vmem:[#allocation2 + $0x2a8] ss:$16 sps:$4 sm:$0xff]  }
 0x217   :  { %2680 = vmatmul.mubr.bf16.gmra.mrb[60].mxu1 %v9151_v31  ;;  %v9158_v31 = vld [vmem:[#allocation2 + $0x2cc] ss:$16 sps:$4 sm:$0xff]  }
 0x218   :  { %2687 = vmatprep.mubr.bf16.mxu1 %v9155_v34  ;;  %v9166_v34 = vld [vmem:[#allocation2 + $0x2e8] ss:$16 sps:$4 sm:$0xff]  }
 0x21d   :  { %2472 = vmatmul.mubr.bf16.gmra.mrb[124].mxu0 %v9006_v32  ;;  %v9058_v32 = vld [vmem:[#allocation2 + $0xa8] ss:$16 sps:$4 sm:$0xff]  }
 0x21e   :  { %2479 = vmatprep.mubr.bf16.mxu0 %v9007_v33  ;;  %v9062_v33 = vld [vmem:[#allocation2 + $0xcc] ss:$16 sps:$4 sm:$0xff]  }
 0x21f   :  { %2688 = vmatmul.mubr.bf16.gmra.mrb[64].mxu1 %v9157_v35  ;;  %v9170_v35 = vld [vmem:[#allocation2 + $0x30c] ss:$16 sps:$4 sm:$0xff]  }
 0x220   :  { %2695 = vmatprep.mubr.bf16.mxu1 %v9161_v38  ;;  %v9178_v38 = vld [vmem:[#allocation2 + $0x328] ss:$16 sps:$4 sm:$0xff]  }
 0x225   :  { %2480 = vmatmul.mubr.bf16.gmra.mrb[128].mxu0 %v9009_v36  ;;  %v9064_v36 = vld [vmem:[#allocation2 + $0xc8] ss:$16 sps:$4 sm:$0xff]  }
 0x226   :  { %2487 = vmatprep.mubr.bf16.mxu0 %v9011_v37  ;;  %v9068_v37 = vld [vmem:[#allocation2 + $0xec] ss:$16 sps:$4 sm:$0xff]  }
 0x227   :  { %2696 = vmatmul.mubr.bf16.gmra.mrb[68].mxu1 %v9163_v39  ;;  %v9182_v39 = vld [vmem:[#allocation2 + $0x34c] ss:$16 sps:$4 sm:$0xff]  }
 0x228   :  { %2703 = vmatprep.mubr.bf16.mxu1 %v9167_v42 }
 0x22d   :  { %2488 = vmatmul.mubr.bf16.gmra.mrb[132].mxu0 %v9013_v40  ;;  %v9070_v40 = vld [vmem:[#allocation2 + $0xe8] ss:$16 sps:$4 sm:$0xff]  }
 0x22e   :  { %2495 = vmatprep.mubr.bf16.mxu0 %v9014_v41  ;;  %v9074_v41 = vld [vmem:[#allocation2 + $0x10c] ss:$16 sps:$4 sm:$0xff]  }
 0x22f   :  { %2704 = vmatmul.mubr.bf16.gmra.mrb[72].mxu1 %v9169_v43  ;;  %v10083_v43 = vld [vmem:[%s10802_s24] sm:$0xf] }
 0x230   :  { %2711 = vmatprep.mubr.bf16.mxu1 %v9173_v46  ;;  %8845 = vmatprep.subr.msk.bf16.mxu1 %vm3453_vm0, %v10083_v43 }
 0x235   :  { %2496 = vmatmul.mubr.bf16.gmra.mrb[136].mxu0 %v9016_v44  ;;  %v9076_v44 = vld [vmem:[#allocation2 + $0x108] ss:$16 sps:$4 sm:$0xff]  }
 0x236   :  { %2503 = vmatprep.mubr.bf16.mxu0 %v9018_v45  ;;  %v9080_v45 = vld [vmem:[#allocation2 + $0x12c] ss:$16 sps:$4 sm:$0xff]  }
 0x237   :  { %2712 = vmatmul.mubr.bf16.gmra.mrb[76].mxu1 %v9175_v47  ;;  %v9194_v47 = vld [vmem:[#allocation2 + $0x38c] ss:$16 sps:$4 sm:$0xff]  }
 0x238   :  { %2719 = vmatprep.mubr.bf16.mxu1 %v9179_v50 }
 0x23d   :  { %2504 = vmatmul.mubr.bf16.gmra.mrb[140].mxu0 %v9020_v48  ;;  %v9082_v48 = vld [vmem:[#allocation2 + $0x128] ss:$16 sps:$4 sm:$0xff]  }
 0x23e   :  { %2511 = vmatprep.mubr.bf16.mxu0 %v9021_v49  ;;  %v9086_v49 = vld [vmem:[#allocation2 + $0x14c] ss:$16 sps:$4 sm:$0xff]  }
 0x23f   :  { %2720 = vmatmul.mubr.bf16.gmra.mrb[80].mxu1 %v9181_v51 }
 0x240   :  { %2727 = vmatprep.mubr.bf16.mxu1 %v9185_v55 }
 0x245   :  { %2512 = vmatmul.mubr.bf16.gmra.mrb[144].mxu0 %v9023_v52  ;;  %v9088_v52 = vld [vmem:[#allocation2 + $0x148] ss:$16 sps:$4 sm:$0xff]  }
 0x246   :  { %2519 = vmatprep.mubr.bf16.mxu0 %v9024_v53  ;;  %v9092_v53 = vld [vmem:[#allocation2 + $0x16c] ss:$16 sps:$4 sm:$0xff]  }
 0x24d   :  { %2520 = vmatmul.mubr.bf16.gmra.mrb[148].mxu0 %v9026_v56  ;;  %v9098_v56 = vld [vmem:[#allocation2 + $0x18c] ss:$16 sps:$4 sm:$0xff]  }
 0x24e   :  { %2527 = vmatprep.mubr.bf16.mxu0 %v9028_v57  ;;  %v9187_v57 = vld [vmem:[#allocation2 + $0x7e0] ss:$16 sps:$4 sm:$0xff]  }
 0x24f   :  { %2728 = vmatmul.mubr.bf16.gmra.mrb[84].mxu1 %v9187_v57 }
 0x250   :  { %2735 = vmatprep.mubr.bf16.mxu1 %v9191_v59  ;;  %v9202_v59 = vld [vmem:[#allocation2 + $0x3a8] ss:$16 sps:$4 sm:$0xff]  }
 0x255   :  { %2528 = vmatmul.mubr.bf16.gmra.mrb[152].mxu0 %v9030_v60  ;;  %v9104_v60 = vld [vmem:[#allocation2 + $0x1ac] ss:$16 sps:$4 sm:$0xff]  }
 0x256   :  { %2535 = vmatprep.mubr.bf16.mxu0 %v9031_v61  ;;  %v9193_v61 = vld [vmem:[#allocation2 + $0x800] ss:$16 sps:$4 sm:$0xff]  }
 0x257   :  { %2736 = vmatmul.mubr.bf16.gmra.mrb[88].mxu1 %v9193_v61  ;;  %v9206_v61 = vld [vmem:[#allocation2 + $0x3cc] ss:$16 sps:$4 sm:$0xff]  }
 0x258   :  { %2743 = vmatprep.mubr.bf16.mxu1 %v9197_v63 }
 0x25d   :  { %2536 = vmatmul.mubr.bf16.gmra.mrb[156].mxu0 %v9033_v1  ;;  %v9110_v1 = vld [vmem:[#allocation2 + $0x1cc] ss:$16 sps:$4 sm:$0xff]  }
 0x25e   :  { %2543 = vmatprep.mubr.bf16.mxu0 %v9034_v2  ;;  %v9199_v2 = vld [vmem:[#allocation2 + $0x820] ss:$16 sps:$4 sm:$0xff]  }
 0x25f   :  { %2744 = vmatmul.mubr.bf16.gmra.mrb[92].mxu1 %v9199_v2 }
 0x260   :  { %2751 = vmatprep.mubr.bf16.mxu1 %v9203_v4 }
 0x265   :  { %2544 = vmatmul.mubr.bf16.gmra.mrb[160].mxu0 %v9036_v5  ;;  %v9116_v5 = vld [vmem:[#allocation2 + $0x1ec] ss:$16 sps:$4 sm:$0xff]  }
 0x266   :  { %2551 = vmatprep.mubr.bf16.mxu0 %v9038_v6  ;;  %v9205_v6 = vld [vmem:[#allocation2 + $0x840] ss:$16 sps:$4 sm:$0xff]  }
 0x267   :  { %2752 = vmatmul.mubr.bf16.gmra.mrb[96].mxu1 %v9205_v6 }
 0x268   :  { %2759 = vmatprep.mubr.bf16.mxu1 %v9209_v8 }
 0x26d   :  { %2552 = vmatmul.mubr.bf16.gmra.mrb[164].mxu0 %v9040_v9  ;;  %v9122_v9 = vld [vmem:[#allocation2 + $0x20c] ss:$16 sps:$4 sm:$0xff]  }
 0x26e   :  { %2832 = vmatprep.mubr.bf16.mxu0 %v9043_v10  ;;  %v9211_v10 = vld [vmem:[#allocation2 + $0x860] ss:$16 sps:$4 sm:$0xff]  }
 0x26f   :  { %2760 = vmatmul.mubr.bf16.gmra.mrb[100].mxu1 %v9211_v10  ;;  %v9214_v10 = vld [vmem:[#allocation2 + $0x3e8] ss:$16 sps:$4 sm:$0xff]  }
 0x270   :  { %2767 = vmatprep.mubr.bf16.mxu1 %v9215_v12  ;;  %v9218_v12 = vld [vmem:[#allocation2 + $0x40c] ss:$16 sps:$4 sm:$0xff]  }
 0x275   :  { %2833 = vmatmul.mubr.bf16.vlgmr.msra.gmra.mrb[0].mxu0 %v9041_v13  ;;  %v9128_v13 = vld [vmem:[#allocation2 + $0x22c] ss:$16 sps:$4 sm:$0xff]  }
 0x276   :  { %2840 = vmatprep.mubr.bf16.mxu0 %v9044_v14  ;;  %v9217_v14 = vld [vmem:[#allocation2 + $0x880] ss:$16 sps:$4 sm:$0xff]  }
 0x277   :  { %2768 = vmatmul.mubr.bf16.gmra.mrb[104].mxu1 %v9217_v14 }
 0x278   :  { %2775 = vmatprep.mubr.bf16.mxu1 %v9221_v16 }
 0x27d   :  { %2841 = vmatmul.mubr.bf16.gmra.mrb[4].mxu0 %v9046_v17  ;;  %v9134_v17 = vld [vmem:[#allocation2 + $0x24c] ss:$16 sps:$4 sm:$0xff]  }
 0x27e   :  { %2848 = vmatprep.mubr.bf16.mxu0 %v9047_v18  ;;  %v9223_v18 = vld [vmem:[#allocation2 + $0x8a0] ss:$16 sps:$4 sm:$0xff]  }
 0x27f   :  { %2776 = vmatmul.mubr.bf16.gmra.mrb[108].mxu1 %v9223_v18 }
 0x280   :  { %2783 = vmatprep.mubr.bf16.mxu1 %v9227_v20 }
 0x285   :  { %2849 = vmatmul.mubr.bf16.gmra.mrb[8].mxu0 %v9049_v21  ;;  %v9140_v21 = vld [vmem:[#allocation2 + $0x26c] ss:$16 sps:$4 sm:$0xff]  }
 0x286   :  { %2856 = vmatprep.mubr.bf16.mxu0 %v9050_v22  ;;  %v9229_v22 = vld [vmem:[#allocation2 + $0x8c0] ss:$16 sps:$4 sm:$0xff]  }
 0x287   :  { %2784 = vmatmul.mubr.bf16.gmra.mrb[112].mxu1 %v9229_v22 }
 0x28d   :  { %2857 = vmatmul.mubr.bf16.gmra.mrb[12].mxu0 %v9052_v24  ;;  %v9142_v24 = vld [vmem:[#allocation2 + $0x268] ss:$16 sps:$4 sm:$0xff]  }
 0x28e   :  { %2864 = vmatprep.mubr.bf16.mxu0 %v9053_v25  ;;  %v9233_v25 = vld [vmem:[#allocation2 + $0x8e4] ss:$16 sps:$4 sm:$0xff]  }
 0x28f   :  { %2791 = vmatprep.mubr.bf16.mxu1 %v9233_v25  ;;  %v9230_v25 = vld [vmem:[#allocation2 + $0x44c] ss:$16 sps:$4 sm:$0xff]  }
 0x290   :  { %2792 = vmatmul.mubr.bf16.gmra.mrb[116].mxu1 %v9235_v27 }
 0x295   :  { %2865 = vmatmul.mubr.bf16.gmra.mrb[16].mxu0 %v9055_v28  ;;  %v9148_v28 = vld [vmem:[#allocation2 + $0x288] ss:$16 sps:$4 sm:$0xff]  }
 0x296   :  { %2872 = vmatprep.mubr.bf16.mxu0 %v9056_v29  ;;  %v9152_v29 = vld [vmem:[#allocation2 + $0x2ac] ss:$16 sps:$4 sm:$0xff]  }
 0x29d   :  { %2873 = vmatmul.mubr.bf16.gmra.mrb[20].mxu0 %v9058_v32  ;;  %v9160_v32 = vld [vmem:[#allocation2 + $0x2c8] ss:$16 sps:$4 sm:$0xff]  }
 0x29e   :  { %2880 = vmatprep.mubr.bf16.mxu0 %v9062_v33  ;;  %v9164_v33 = vld [vmem:[#allocation2 + $0x2ec] ss:$16 sps:$4 sm:$0xff]  }
 0x2a5   :  { %2881 = vmatmul.mubr.bf16.gmra.mrb[24].mxu0 %v9064_v36  ;;  %v9172_v36 = vld [vmem:[#allocation2 + $0x308] ss:$16 sps:$4 sm:$0xff]  }
 0x2a6   :  { %2888 = vmatprep.mubr.bf16.mxu0 %v9068_v37  ;;  %v9176_v37 = vld [vmem:[#allocation2 + $0x32c] ss:$16 sps:$4 sm:$0xff]  }
 0x2ad   :  { %2889 = vmatmul.mubr.bf16.gmra.mrb[28].mxu0 %v9070_v40  ;;  %v9184_v40 = vld [vmem:[#allocation2 + $0x348] ss:$16 sps:$4 sm:$0xff]  }
 0x2ae   :  { %2896 = vmatprep.mubr.bf16.mxu0 %v9074_v41  ;;  %v9188_v41 = vld [vmem:[#allocation2 + $0x36c] ss:$16 sps:$4 sm:$0xff]  }
 0x2b5   :  { %2897 = vmatmul.mubr.bf16.gmra.mrb[32].mxu0 %v9076_v44 }
 0x2b6   :  { %2904 = vmatprep.mubr.bf16.mxu0 %v9080_v45  ;;  %v9190_v45 = vld [vmem:[#allocation2 + $0x368] ss:$16 sps:$4 sm:$0xff]  }
 0x2bd   :  { %2905 = vmatmul.mubr.bf16.gmra.mrb[36].mxu0 %v9082_v48 }
 0x2be   :  { %2912 = vmatprep.mubr.bf16.mxu0 %v9086_v49 }
 0x2c5   :  { %2913 = vmatmul.mubr.bf16.gmra.mrb[40].mxu0 %v9088_v52  ;;  %v9196_v52 = vld [vmem:[#allocation2 + $0x388] ss:$16 sps:$4 sm:$0xff]  }
 0x2c6   :  { %2920 = vmatprep.mubr.bf16.mxu0 %v9092_v53 }
 0x2cd   :  { %2921 = vmatmul.mubr.bf16.gmra.mrb[44].mxu0 %v9094_v54  ;;  %v9200_v54 = vld [vmem:[#allocation2 + $0x3ac] ss:$16 sps:$4 sm:$0xff]  }
 0x2ce   :  { %2928 = vmatprep.mubr.bf16.mxu0 %v9098_v56 }
 0x2d5   :  { %2929 = vmatmul.mubr.bf16.gmra.mrb[48].mxu0 %v9100_v58 }
 0x2d6   :  { %2936 = vmatprep.mubr.bf16.mxu0 %v9104_v60 }
 0x2dd   :  { %2937 = vmatmul.mubr.bf16.gmra.mrb[52].mxu0 %v9106_v62 }
 0x2de   :  { %2944 = vmatprep.mubr.bf16.mxu0 %v9110_v1 }
 0x2e5   :  { %2945 = vmatmul.mubr.bf16.gmra.mrb[56].mxu0 %v9112_v3  ;;  %v9208_v3 = vld [vmem:[#allocation2 + $0x3c8] ss:$16 sps:$4 sm:$0xff]  }
 0x2e6   :  { %2952 = vmatprep.mubr.bf16.mxu0 %v9116_v5  ;;  %v9212_v5 = vld [vmem:[#allocation2 + $0x3ec] ss:$16 sps:$4 sm:$0xff]  }
 0x2ed   :  { %2953 = vmatmul.mubr.bf16.gmra.mrb[60].mxu0 %v9118_v7 }
 0x2ee   :  { %2960 = vmatprep.mubr.bf16.mxu0 %v9122_v9 }
 0x2f5   :  { %2961 = vmatmul.mubr.bf16.gmra.mrb[64].mxu0 %v9124_v11 }
 0x2f6   :  { %2968 = vmatprep.mubr.bf16.mxu0 %v9128_v13 }
 0x2fd   :  { %2969 = vmatmul.mubr.bf16.gmra.mrb[68].mxu0 %v9130_v15 }
 0x2fe   :  { %2976 = vmatprep.mubr.bf16.mxu0 %v9134_v17  ;;  %v9220_v17 = vld [vmem:[#allocation2 + $0x408] ss:$16 sps:$4 sm:$0xff]  }
 0x305   :  { %2977 = vmatmul.mubr.bf16.gmra.mrb[72].mxu0 %v9136_v19  ;;  %v9224_v19 = vld [vmem:[#allocation2 + $0x42c] ss:$16 sps:$4 sm:$0xff]  }
 0x306   :  { %2984 = vmatprep.mubr.bf16.mxu0 %v9140_v21 }
 0x30d   :  { %2985 = vmatmul.mubr.bf16.gmra.mrb[76].mxu0 %v9142_v24 }
 0x30e   :  { %2992 = vmatprep.mubr.bf16.mxu0 %v9146_v26 }
 0x315   :  { %2993 = vmatmul.mubr.bf16.gmra.mrb[80].mxu0 %v9148_v28 }
 0x316   :  { %3000 = vmatprep.mubr.bf16.mxu0 %v9152_v29 }
 0x31d   :  { %3001 = vmatmul.mubr.bf16.gmra.mrb[84].mxu0 %v9154_v30  ;;  %v9232_v30 = vld [vmem:[#allocation2 + $0x448] ss:$16 sps:$4 sm:$0xff]  }
 0x31e   :  { %3008 = vmatprep.mubr.bf16.mxu0 %v9158_v31 }
 0x325   :  { %3009 = vmatmul.mubr.bf16.gmra.mrb[88].mxu0 %v9160_v32  ;;  %v9236_v32 = vld [vmem:[#allocation2 + $0x46c] ss:$16 sps:$4 sm:$0xff]  }
 0x326   :  { %3016 = vmatprep.mubr.bf16.mxu0 %v9164_v33 }
 0x32d   :  { %3017 = vmatmul.mubr.bf16.gmra.mrb[92].mxu0 %v9166_v34 }
 0x32e   :  { %3024 = vmatprep.mubr.bf16.mxu0 %v9170_v35 }
 0x335   :  { %3025 = vmatmul.mubr.bf16.gmra.mrb[96].mxu0 %v9172_v36 }
 0x336   :  { %3032 = vmatprep.mubr.bf16.mxu0 %v9176_v37  ;;  %v9238_v37 = vld [vmem:[#allocation2 + $0x468] ss:$16 sps:$4 sm:$0xff]  }
 0x33d   :  { %3033 = vmatmul.mubr.bf16.gmra.mrb[100].mxu0 %v9178_v38 }
 0x33e   :  { %3040 = vmatprep.mubr.bf16.mxu0 %v9182_v39  ;;  %v9239_v39 = vld [vmem:[#allocation2 + $0x48c] ss:$16 sps:$4 sm:$0xff]  }
 0x345   :  { %3041 = vmatmul.mubr.bf16.gmra.mrb[104].mxu0 %v9184_v40 }
 0x346   :  { %3048 = vmatprep.mubr.bf16.mxu0 %v9188_v41 }
 0x348   :  { %v10078_v42 = vpop.f32.mrb[0].mxu0 }
 0x349   :  { %v2836_v44 = vpop.f32.mrb[1].mxu0 }
 0x34a   :  { %v10087_v46 = vpop.f32.mrb[2].mxu0 }
 0x34b   :  { %v3409_v48 = vpack.c.bf16 %v10087_v46, %v10078_v42  ;;  %v2839_v49 = vpop.f32.mrb[3].mxu0  ;;  %v7599_v42 = vld [vmem:[%s10802_s24 + $0xc] sm:$0xf]  ;;  %v10163_v46 = vpop.f32.mrb[0].mxu1 }
 0x34d   :  { %3049 = vmatmul.mubr.bf16.gmra.mrb[108].mxu0 %v9190_v45 }
 0x34e   :  { %3056 = vmatprep.mubr.bf16.mxu0 %v9194_v47  ;;  %v9241_v47 = vld [vmem:[#allocation2 + $0x488] ss:$16 sps:$4 sm:$0xff]  }
 0x350   :  { %v10091_v50 = vpop.f32.mrb[4].mxu0 }
 0x351   :  { %v2844_v51 = vpop.f32.mrb[5].mxu0 }
 0x352   :  { %v10093_v53 = vpop.f32.mrb[6].mxu0  ;;  %v9242_v51 = vld [vmem:[#allocation2 + $0x4ac] ss:$16 sps:$4 sm:$0xff]  }
 0x353   :  { %v3410_v55 = vpack.c.bf16 %v10093_v53, %v10091_v50  ;;  %v2847_v56 = vpop.f32.mrb[7].mxu0 }
 0x354   :  { %v3579_v56 = vsel %vm3453_vm0, %v10083_v43, 0 }
 0x355   :  { %3057 = vmatmul.mubr.bf16.gmra.mrb[112].mxu0 %v9196_v52 }
 0x356   :  { %3064 = vmatprep.mubr.bf16.mxu0 %v9200_v54 }
 0x358   :  { %v10097_v57 = vpop.f32.mrb[8].mxu0 }
 0x359   :  { %v2852_v58 = vpop.f32.mrb[9].mxu0 }
 0x35a   :  { %v10099_v60 = vpop.f32.mrb[10].mxu0  ;;  %v10139_v58 = vld [vmem:[%s10802_s24 + $0x8] sm:$0xf] }
 0x35b   :  { %v3411_v62 = vpack.c.bf16 %v10099_v60, %v10097_v57  ;;  %v2855_v63 = vpop.f32.mrb[11].mxu0 }
 0x35c   :  { %v9244_v63 = vld [vmem:[#allocation2 + $0x4a8] ss:$16 sps:$4 sm:$0xff]  }
 0x35d   :  { %3065 = vmatmul.mubr.bf16.gmra.mrb[116].mxu0 %v9202_v59 }
 0x35e   :  { %3072 = vmatprep.mubr.bf16.mxu0 %v9206_v61 }
 0x360   :  { %v10103_v1 = vpop.f32.mrb[12].mxu0 }
 0x361   :  { %v2860_v2 = vpop.f32.mrb[13].mxu0 }
 0x362   :  { %v10105_v4 = vpop.f32.mrb[14].mxu0 }
 0x363   :  { %v3412_v6 = vpack.c.bf16 %v10105_v4, %v10103_v1  ;;  %v2863_v7 = vpop.f32.mrb[15].mxu0 }
 0x365   :  { %3073 = vmatmul.mubr.bf16.gmra.mrb[120].mxu0 %v9208_v3  ;;  %v9245_v3 = vld [vmem:[#allocation2 + $0x4cc] ss:$16 sps:$4 sm:$0xff]  }
 0x366   :  { %3080 = vmatprep.mubr.bf16.mxu0 %v9212_v5 }
 0x368   :  { %v10109_v8 = vpop.f32.mrb[16].mxu0 }
 0x369   :  { %v2868_v9 = vpop.f32.mrb[17].mxu0 }
 0x36a   :  { %v10111_v11 = vpop.f32.mrb[18].mxu0 }
 0x36b   :  { %v3413_v13 = vpack.c.bf16 %v10111_v11, %v10109_v8  ;;  %v2871_v14 = vpop.f32.mrb[19].mxu0 }
 0x36c   :  { %v9248_v14 = vld [vmem:[#allocation2 + $0x4ec] ss:$16 sps:$4 sm:$0xff]  }
 0x36d   :  { %3081 = vmatmul.mubr.bf16.gmra.mrb[124].mxu0 %v9214_v10  ;;  %v9247_v10 = vld [vmem:[#allocation2 + $0x4c8] ss:$16 sps:$4 sm:$0xff]  }
 0x36e   :  { %3088 = vmatprep.mubr.bf16.mxu0 %v9218_v12 }
 0x370   :  { %v10115_v15 = vpop.f32.mrb[20].mxu0 }
 0x371   :  { %v2876_v16 = vpop.f32.mrb[21].mxu0 }
 0x372   :  { %v10117_v18 = vpop.f32.mrb[22].mxu0 }
 0x373   :  { %v3414_v20 = vpack.c.bf16 %v10117_v18, %v10115_v15  ;;  %v2879_v21 = vpop.f32.mrb[23].mxu0 }
 0x375   :  { %3089 = vmatmul.mubr.bf16.gmra.mrb[128].mxu0 %v9220_v17 }
 0x376   :  { %3096 = vmatprep.mubr.bf16.mxu0 %v9224_v19 }
 0x378   :  { %v10121_v22 = vpop.f32.mrb[24].mxu0 }
 0x379   :  { %v2884_v0 = vpop.f32.mrb[25].mxu0 }
 0x37a   :  { %v10123_v24 = vpop.f32.mrb[26].mxu0  ;;  %v9250_v0 = vld [vmem:[#allocation2 + $0x4e8] ss:$16 sps:$4 sm:$0xff]  }
 0x37b   :  { %v3415_v26 = vpack.c.bf16 %v10123_v24, %v10121_v22  ;;  %v2887_v27 = vpop.f32.mrb[27].mxu0 }
 0x37d   :  { %3097 = vmatmul.mubr.bf16.gmra.mrb[132].mxu0 %v9226_v23 }
 0x37e   :  { %3104 = vmatprep.mubr.bf16.mxu0 %v9230_v25  ;;  %v9251_v25 = vld [vmem:[#allocation2 + $0x50c] ss:$16 sps:$4 sm:$0xff]  }
 0x380   :  { %v10127_v28 = vpop.f32.mrb[28].mxu0 }
 0x381   :  { %v2892_v29 = vpop.f32.mrb[29].mxu0 }
 0x382   :  { %v10129_v31 = vpop.f32.mrb[30].mxu0 }
 0x383   :  { %v3416_v33 = vpack.c.bf16 %v10129_v31, %v10127_v28  ;;  %v2895_v34 = vpop.f32.mrb[31].mxu0  ;;  %v3863_v28 = vsel %vm3453_vm0, %v7599_v42, 0  ;;  %v10210_v31 = vld [vmem:[%s10802_s24 + $0x10] sm:$0xf] }
 0x384   :  { %v9253_v34 = vld [vmem:[#allocation2 + $0x508] ss:$16 sps:$4 sm:$0xff]  }
 0x385   :  { %3105 = vmatmul.mubr.bf16.gmra.mrb[136].mxu0 %v9232_v30 }
 0x386   :  { %3112 = vmatprep.mubr.bf16.mxu0 %v9236_v32 }
 0x388   :  { %v2898_v35 = vpop.f32.mrb[32].mxu0 }
 0x389   :  { %v2900_v36 = vpop.f32.mrb[33].mxu0 }
 0x38a   :  { %v2901_v38 = vpop.f32.mrb[34].mxu0  ;;  %v9254_v36 = vld [vmem:[#allocation2 + $0x52c] ss:$16 sps:$4 sm:$0xff]  }
 0x38b   :  { %v3418_v40 = vpack.c.bf16 %v2901_v38, %v2898_v35  ;;  %v2903_v41 = vpop.f32.mrb[35].mxu0 }
 0x38c   :  { %v9256_v41 = vld [vmem:[#allocation2 + $0x528] ss:$16 sps:$4 sm:$0xff]  }
 0x38d   :  { %3113 = vmatmul.mubr.bf16.gmra.mrb[140].mxu0 %v9238_v37  ;;  %7976 = vmatprep.mubr.msk.bf16.mxu1 %vm3428_vm1, %v3418_v40 }
 0x38e   :  { %3120 = vmatprep.mubr.bf16.mxu0 %v9239_v39 }
 0x390   :  { %v2906_v44 = vpop.f32.mrb[36].mxu0 }
 0x391   :  { %v2908_v45 = vpop.f32.mrb[37].mxu0 }
 0x392   :  { %v2909_v49 = vpop.f32.mrb[38].mxu0  ;;  %v9257_v45 = vld [vmem:[#allocation2 + $0x54c] ss:$16 sps:$4 sm:$0xff]  }
 0x393   :  { %v3419_v52 = vpack.c.bf16 %v2909_v49, %v2906_v44  ;;  %v2911_v54 = vpop.f32.mrb[39].mxu0 }
 0x394   :  { %v9259_v54 = vld [vmem:[#allocation2 + $0x548] ss:$16 sps:$4 sm:$0xff]  }
 0x395   :  { %3121 = vmatmul.mubr.bf16.gmra.mrb[144].mxu0 %v9241_v47  ;;  %7977 = vmatmul.mubr.msk.bf16.vlgmr.msra.gmra.mrb[120].mxu1 %vm3428_vm1, %v3419_v52 }
 0x396   :  { %3128 = vmatprep.mubr.bf16.mxu0 %v9242_v51  ;;  %7993 = vmatpush3.bf16.msra.mxu1 %v3579_v56 }
 0x397   :  { %8846 = vmatprep.subr.msk.bf16.mxu1 %vm3453_vm0, %v10139_v58 }
 0x398   :  { %v2914_v59 = vpop.f32.mrb[40].mxu0 }
 0x399   :  { %v2916_v61 = vpop.f32.mrb[41].mxu0 }
 0x39a   :  { %v2917_v2 = vpop.f32.mrb[42].mxu0 }
 0x39b   :  { %v3420_v5 = vpack.c.bf16 %v2917_v2, %v2914_v59  ;;  %v2919_v43 = vpop.f32.mrb[43].mxu0  ;;  %v9260_v59 = vld [vmem:[#allocation2 + $0x56c] ss:$16 sps:$4 sm:$0xff]  }
 0x39d   :  { %3129 = vmatmul.mubr.bf16.gmra.mrb[148].mxu0 %v9244_v63  ;;  %7980 = vmatprep.mubr.msk.bf16.mxu1 %vm3428_vm1, %v3420_v5  ;;  %v9262_v5 = vld [vmem:[#allocation2 + $0x568] ss:$16 sps:$4 sm:$0xff]  }
 0x39e   :  { %3136 = vmatprep.mubr.bf16.mxu0 %v9245_v3 }
 0x3a0   :  { %v2922_v7 = vpop.f32.mrb[44].mxu0 }
 0x3a1   :  { %v2924_v9 = vpop.f32.mrb[45].mxu0 }
 0x3a2   :  { %v2925_v12 = vpop.f32.mrb[46].mxu0 }
 0x3a3   :  { %v3421_v16 = vpack.c.bf16 %v2925_v12, %v2922_v7  ;;  %v2927_v17 = vpop.f32.mrb[47].mxu0  ;;  %v9263_v7 = vld [vmem:[#allocation2 + $0x58c] ss:$16 sps:$4 sm:$0xff]   ;;  %v3713_v12 = vsel %vm3453_vm0, %v10139_v58, 0 }
 0x3a4   :  { %v9266_v17 = vld [vmem:[#allocation2 + $0x5ac] ss:$16 sps:$4 sm:$0xff]  }
 0x3a5   :  { %3137 = vmatmul.mubr.bf16.gmra.mrb[152].mxu0 %v9247_v10  ;;  %7981 = vmatmul.mubr.msk.bf16.gmra.mrb[124].mxu1 %vm3428_vm1, %v3421_v16 }
 0x3a6   :  { %3144 = vmatprep.mubr.bf16.mxu0 %v9248_v14 }
 0x3a8   :  { %v2930_v19 = vpop.f32.mrb[48].mxu0 }
 0x3a9   :  { %v2932_v21 = vpop.f32.mrb[49].mxu0 }
 0x3aa   :  { %v2933_v23 = vpop.f32.mrb[50].mxu0 }
 0x3ab   :  { %v3422_v27 = vpack.c.bf16 %v2933_v23, %v2930_v19  ;;  %v2935_v29 = vpop.f32.mrb[51].mxu0 }
 0x3ad   :  { %3145 = vmatmul.mubr.bf16.gmra.mrb[156].mxu0 %v9250_v0  ;;  %7984 = vmatprep.mubr.msk.bf16.mxu1 %vm3428_vm1, %v3422_v27 }
 0x3ae   :  { %3152 = vmatprep.mubr.bf16.mxu0 %v9251_v25  ;;  %v9268_v25 = vld [vmem:[#allocation2 + $0x5a8] ss:$16 sps:$4 sm:$0xff]  }
 0x3b0   :  { %v2938_v30 = vpop.f32.mrb[52].mxu0 }
 0x3b1   :  { %v2940_v32 = vpop.f32.mrb[53].mxu0 }
 0x3b2   :  { %v2941_v35 = vpop.f32.mrb[54].mxu0 }
 0x3b3   :  { %v3423_v37 = vpack.c.bf16 %v2941_v35, %v2938_v30  ;;  %v2943_v38 = vpop.f32.mrb[55].mxu0  ;;  %v9269_v30 = vld [vmem:[#allocation2 + $0x5cc] ss:$16 sps:$4 sm:$0xff]  }
 0x3b5   :  { %3153 = vmatmul.mubr.bf16.gmra.mrb[160].mxu0 %v9253_v34  ;;  %7985 = vmatmul.mubr.msk.bf16.gmra.mrb[128].mxu1 %vm3428_vm1, %v3423_v37  ;;  %v9271_v34 = vld [vmem:[#allocation2 + $0x5c8] ss:$16 sps:$4 sm:$0xff]   ;;  %v9272_v37 = vld [vmem:[#allocation2 + $0x5ec] ss:$16 sps:$4 sm:$0xff]  }
 0x3b6   :  { %3160 = vmatprep.mubr.bf16.mxu0 %v9254_v36 }
 0x3b8   :  { %v2946_v39 = vpop.f32.mrb[56].mxu0 }
 0x3b9   :  { %v2948_v40 = vpop.f32.mrb[57].mxu0 }
 0x3ba   :  { %v2949_v44 = vpop.f32.mrb[58].mxu0 }
 0x3bb   :  { %v3424_v47 = vpack.c.bf16 %v2949_v44, %v2946_v39  ;;  %v2951_v49 = vpop.f32.mrb[59].mxu0  ;;  %v9274_v39 = vld [vmem:[#allocation2 + $0x5e8] ss:$16 sps:$4 sm:$0xff]   ;;  %v9275_v44 = vld [vmem:[#allocation2 + $0x60c] ss:$16 sps:$4 sm:$0xff]  }
 0x3bd   :  { %3161 = vmatmul.mubr.bf16.gmra.mrb[164].mxu0 %v9256_v41  ;;  %7988 = vmatprep.mubr.msk.bf16.mxu1 %vm3428_vm1, %v3424_v47 }
 0x3be   :  { %3168 = vmatprep.mubr.bf16.mxu0 %v9257_v45 }
 0x3c0   :  { %v2954_v51 = vpop.f32.mrb[60].mxu0 }
 0x3c1   :  { %v2956_v52 = vpop.f32.mrb[61].mxu0 }
 0x3c2   :  { %v2957_v56 = vpop.f32.mrb[62].mxu0 }
 0x3c3   :  { %v3425_v61 = vpack.c.bf16 %v2957_v56, %v2954_v51  ;;  %v2959_v63 = vpop.f32.mrb[63].mxu0  ;;  %v9277_v56 = vld [vmem:[#allocation2 + $0x608] ss:$16 sps:$4 sm:$0xff]  }
 0x3c4   :  { %v9278_v63 = vld [vmem:[#allocation2 + $0x62c] ss:$16 sps:$4 sm:$0xff]  }
 0x3c5   :  { %3169 = vmatmul.mubr.bf16.gmra.mrb[168].mxu0 %v9259_v54  ;;  %7989 = vmatmul.mubr.msk.bf16.gmra.mrb[132].mxu1 %vm3428_vm1, %v3425_v61 }
 0x3c6   :  { %7994 = vmatprep.mubr.msk.bf16.mxu1 %vm3428_vm1, %v3409_v48  ;;  %3176 = vmatprep.mubr.bf16.mxu0 %v9260_v59  ;;  %v2563_v48 = vpop.f32.mrb[1].mxu1 }
 0x3c7   :  { %v10170_v50 = vpop.f32.mrb[2].mxu1 }
 0x3c8   :  { %v2962_v2 = vpop.f32.mrb[64].mxu0  ;;  %v2566_v14 = vpop.f32.mrb[3].mxu1 }
 0x3c9   :  { %v2964_v3 = vpop.f32.mrb[65].mxu0  ;;  %v10176_v57 = vpop.f32.mrb[4].mxu1 }
 0x3ca   :  { %v2965_v43 = vpop.f32.mrb[66].mxu0  ;;  %v2571_v60 = vpop.f32.mrb[5].mxu1 }
 0x3cb   :  { %v3678_v9 = vpack.c.bf16 %v2965_v43, %v2962_v2  ;;  %v2967_v10 = vpop.f32.mrb[67].mxu0  ;;  %v10182_v0 = vpop.f32.mrb[6].mxu1  ;;  %v9283_v60 = vld [vmem:[#allocation2 + $0x648] ss:$16 sps:$4 sm:$0xff]  }
 0x3cc   :  { %v2574_v27 = vpop.f32.mrb[7].mxu1 }
 0x3cd   :  { %3177 = vmatmul.mubr.bf16.gmra.mrb[172].mxu0 %v9262_v5  ;;  %7995 = vmatmul.mubr.msk.bf16.vlgmr.msra.gmra.mrb[120].mxu1 %vm3428_vm1, %v3410_v55  ;;  %v9265_v55 = vld [vmem:[#allocation2 + $0x588] ss:$16 sps:$4 sm:$0xff]  }
 0x3ce   :  { %7998 = vmatprep.mubr.msk.bf16.mxu1 %vm3428_vm1, %v3411_v62  ;;  %3184 = vmatprep.mubr.bf16.mxu0 %v9263_v7 }
 0x3cf   :  { %8011 = vmatpush3.bf16.msra.mxu1 %v3713_v12  ;;  %v9280_v12 = vld [vmem:[#allocation2 + $0x628] ss:$16 sps:$4 sm:$0xff]  }
 0x3d0   :  { %v2970_v58 = vpop.f32.mrb[68].mxu0  ;;  %8847 = vmatprep.subr.msk.bf16.mxu1 %vm3453_vm0, %v7599_v42 }
 0x3d1   :  { %v2972_v53 = vpop.f32.mrb[69].mxu0 }
 0x3d2   :  { %v2973_v16 = vpop.f32.mrb[70].mxu0 }
 0x3d3   :  { %v3679_v19 = vpack.c.bf16 %v2973_v16, %v2970_v58  ;;  %v2975_v21 = vpop.f32.mrb[71].mxu0  ;;  %v9281_v58 = vld [vmem:[#allocation2 + $0x64c] ss:$16 sps:$4 sm:$0xff]  }
 0x3d5   :  { %3185 = vmatmul.mubr.bf16.gmra.mrb[176].mxu0 %v9265_v55  ;;  %7999 = vmatmul.mubr.msk.bf16.gmra.mrb[124].mxu1 %vm3428_vm1, %v3412_v6  ;;  %v10188_v6 = vpop.f32.mrb[8].mxu1 }
 0x3d6   :  { %8002 = vmatprep.mubr.msk.bf16.mxu1 %vm3428_vm1, %v3413_v13  ;;  %3192 = vmatprep.mubr.bf16.mxu0 %v9266_v17  ;;  %v2579_v8 = vpop.f32.mrb[9].mxu1 }
 0x3d7   :  { %v10194_v13 = vpop.f32.mrb[10].mxu1 }
 0x3d8   :  { %v2978_v62 = vpop.f32.mrb[72].mxu0  ;;  %v2582_v35 = vpop.f32.mrb[11].mxu1 }
 0x3d9   :  { %v2980_v23 = vpop.f32.mrb[73].mxu0 }
 0x3da   :  { %v2981_v29 = vpop.f32.mrb[74].mxu0 }
 0x3db   :  { %v3680_v1 = vpack.c.bf16 %v2981_v29, %v2978_v62  ;;  %v2983_v4 = vpop.f32.mrb[75].mxu0 }
 0x3dd   :  { %3193 = vmatmul.mubr.bf16.gmra.mrb[180].mxu0 %v9268_v25  ;;  %8003 = vmatmul.mubr.msk.bf16.gmra.mrb[128].mxu1 %vm3428_vm1, %v3414_v20  ;;  %v10200_v20 = vpop.f32.mrb[12].mxu1  ;;  %v9284_v25 = vld [vmem:[#allocation2 + $0x66c] ss:$16 sps:$4 sm:$0xff]  }
 0x3de   :  { %8006 = vmatprep.mubr.msk.bf16.mxu1 %vm3428_vm1, %v3415_v26  ;;  %3200 = vmatprep.mubr.bf16.mxu0 %v9269_v30  ;;  %v2587_v22 = vpop.f32.mrb[13].mxu1 }
 0x3df   :  { %v10203_v26 = vpop.f32.mrb[14].mxu1 }
 0x3e0   :  { %v2986_v11 = vpop.f32.mrb[76].mxu0  ;;  %v2590_v40 = vpop.f32.mrb[15].mxu1 }
 0x3e1   :  { %v2988_v32 = vpop.f32.mrb[77].mxu0  ;;  %v9289_v40 = vld [vmem:[#allocation2 + $0x688] ss:$16 sps:$4 sm:$0xff]  }
 0x3e2   :  { %v2989_v36 = vpop.f32.mrb[78].mxu0  ;;  %v9286_v32 = vld [vmem:[#allocation2 + $0x668] ss:$16 sps:$4 sm:$0xff]  }
 0x3e3   :  { %v3681_v15 = vpack.c.bf16 %v2989_v36, %v2986_v11  ;;  %v2991_v18 = vpop.f32.mrb[79].mxu0  ;;  %v9287_v36 = vld [vmem:[#allocation2 + $0x68c] ss:$16 sps:$4 sm:$0xff]  }
 0x3e5   :  { %3201 = vmatmul.mubr.bf16.gmra.mrb[184].mxu0 %v9271_v34  ;;  %8007 = vmatmul.mubr.msk.bf16.gmra.mrb[132].mxu1 %vm3428_vm1, %v3416_v33  ;;  %v10212_v33 = vpop.f32.mrb[16].mxu1 }
 0x3e6   :  { %8012 = vmatprep.mubr.msk.bf16.mxu1 %vm3428_vm1, %v3678_v9  ;;  %3208 = vmatprep.mubr.bf16.mxu0 %v9272_v37  ;;  %v2595_v49 = vpop.f32.mrb[17].mxu1 }
 0x3e7   :  { %v10217_v52 = vpop.f32.mrb[18].mxu1  ;;  %v4013_v49 = vsel %vm3453_vm0, %v10210_v31, 0 }
 0x3e8   :  { %v2994_v24 = vpop.f32.mrb[80].mxu0  ;;  %v2598_v59 = vpop.f32.mrb[19].mxu1 }
 0x3e9   :  { %v2996_v38 = vpop.f32.mrb[81].mxu0  ;;  %v10220_v5 = vpop.f32.mrb[20].mxu1 }
 0x3ea   :  { %v2997_v41 = vpop.f32.mrb[82].mxu0  ;;  %v2603_v43 = vpop.f32.mrb[21].mxu1 }
 0x3eb   :  { %v3682_v45 = vpack.c.bf16 %v2997_v41, %v2994_v24  ;;  %v2999_v47 = vpop.f32.mrb[83].mxu0  ;;  %v10223_v9 = vpop.f32.mrb[22].mxu1 }
 0x3ec   :  { %v2606_v42 = vpop.f32.mrb[23].mxu1 }
 0x3ed   :  { %3209 = vmatmul.mubr.bf16.gmra.mrb[188].mxu0 %v9274_v39  ;;  %8013 = vmatmul.mubr.msk.bf16.vlgmr.msra.gmra.mrb[120].mxu1 %vm3428_vm1, %v3679_v19  ;;  %v10226_v14 = vpop.f32.mrb[24].mxu1 }
 0x3ee   :  { %8016 = vmatprep.mubr.msk.bf16.mxu1 %vm3428_vm1, %v3680_v1  ;;  %3216 = vmatprep.mubr.bf16.mxu0 %v9275_v44  ;;  %v2611_v16 = vpop.f32.mrb[25].mxu1 }
 0x3ef   :  { %8029 = vmatpush3.bf16.msra.mxu1 %v3863_v28  ;;  %v10229_v19 = vpop.f32.mrb[26].mxu1 }
 0x3f0   :  { %v3002_v51 = vpop.f32.mrb[84].mxu0  ;;  %8848 = vmatprep.subr.msk.bf16.mxu1 %vm3453_vm0, %v10210_v31  ;;  %v2614_v62 = vpop.f32.mrb[27].mxu1 }
 0x3f1   :  { %v3004_v54 = vpop.f32.mrb[85].mxu0  ;;  %v10232_v30 = vpop.f32.mrb[28].mxu1 }
 0x3f2   :  { %v3005_v61 = vpop.f32.mrb[86].mxu0  ;;  %v2619_v1 = vpop.f32.mrb[29].mxu1 }
 0x3f3   :  { %v3683_v2 = vpack.c.bf16 %v3005_v61, %v3002_v51  ;;  %v3007_v3 = vpop.f32.mrb[87].mxu0  ;;  %v10234_v8 = vpop.f32.mrb[30].mxu1  ;;  %v10246_v51 = vld [vmem:[%s10802_s24 + $0x14] sm:$0xf]  ;;  %v9298_v1 = vld [vmem:[#allocation2 + $0x6e8] ss:$16 sps:$4 sm:$0xff]  }
 0x3f4   :  { %v2622_v34 = vpop.f32.mrb[31].mxu1  ;;  %v9293_v3 = vld [vmem:[#allocation2 + $0x6cc] ss:$16 sps:$4 sm:$0xff]  }
 0x3f5   :  { %3217 = vmatmul.mubr.bf16.gmra.mrb[192].mxu0 %v9277_v56  ;;  %8017 = vmatmul.mubr.msk.bf16.gmra.mrb[124].mxu1 %vm3428_vm1, %v3681_v15  ;;  %v10237_v18 = vpop.f32.mrb[32].mxu1 }
 0x3f6   :  { %8020 = vmatprep.mubr.msk.bf16.mxu1 %vm3428_vm1, %v3682_v45  ;;  %3224 = vmatprep.mubr.bf16.mxu0 %v9278_v63  ;;  %v2627_v22 = vpop.f32.mrb[33].mxu1  ;;  %v9290_v45 = vld [vmem:[#allocation2 + $0x6ac] ss:$16 sps:$4 sm:$0xff]   ;;  %v9292_v63 = vld [vmem:[#allocation2 + $0x6a8] ss:$16 sps:$4 sm:$0xff]  }
 0x3f7   :  { %v10239_v38 = vpop.f32.mrb[34].mxu1 }
 0x3f8   :  { %v3010_v7 = vpop.f32.mrb[88].mxu0  ;;  %v2630_v41 = vpop.f32.mrb[35].mxu1 }
 0x3f9   :  { %v3012_v10 = vpop.f32.mrb[89].mxu0  ;;  %v10249_v54 = vpop.f32.mrb[36].mxu1 }
 0x3fa   :  { %v3013_v48 = vpop.f32.mrb[90].mxu0  ;;  %v2635_v56 = vpop.f32.mrb[37].mxu1 }
 0x3fb   :  { %v3684_v53 = vpack.c.bf16 %v3013_v48, %v3010_v7  ;;  %v3015_v55 = vpop.f32.mrb[91].mxu0  ;;  %v10253_v31 = vpop.f32.mrb[38].mxu1 }
 0x3fc   :  { %v2638_v43 = vpop.f32.mrb[39].mxu1 }
 0x3fd   :  { %3225 = vmatmul.mubr.bf16.gmra.mrb[196].mxu0 %v9280_v12  ;;  %8021 = vmatmul.mubr.msk.bf16.gmra.mrb[128].mxu1 %vm3428_vm1, %v3683_v2  ;;  %v10256_v12 = vpop.f32.mrb[40].mxu1  ;;  %v9305_v43 = vld [vmem:[#allocation2 + $0x74c] ss:$16 sps:$4 sm:$0xff]  }
 0x3fe   :  { %8024 = vmatprep.mubr.msk.bf16.mxu1 %vm3428_vm1, %v3684_v53  ;;  %3232 = vmatprep.mubr.bf16.mxu0 %v9281_v58  ;;  %v2643_v42 = vpop.f32.mrb[41].mxu1  ;;  %v9295_v53 = vld [vmem:[#allocation2 + $0x6c8] ss:$16 sps:$4 sm:$0xff]  }
 0x3ff   :  { %v10258_v55 = vpop.f32.mrb[42].mxu1 }
 0x400   :  { %v3018_v17 = vpop.f32.mrb[92].mxu0 }
 0x401   :  { %v3020_v21 = vpop.f32.mrb[93].mxu0 }
 0x402   :  { %v3021_v23 = vpop.f32.mrb[94].mxu0  ;;  %v2646_v21 = vpop.f32.mrb[43].mxu1 }
 0x403   :  { %v3685_v27 = vpack.c.bf16 %v3021_v23, %v3018_v17  ;;  %v3023_v29 = vpop.f32.mrb[95].mxu0  ;;  %v9296_v17 = vld [vmem:[#allocation2 + $0x6ec] ss:$16 sps:$4 sm:$0xff]   ;;  %v10261_v23 = vpop.f32.mrb[44].mxu1 }
 0x405   :  { %3233 = vmatmul.mubr.bf16.gmra.mrb[200].mxu0 %v9283_v60  ;;  %8025 = vmatmul.mubr.msk.bf16.gmra.mrb[132].mxu1 %vm3428_vm1, %v3685_v27 }
 0x406   :  { %3240 = vmatprep.mubr.bf16.mxu0 %v9284_v25  ;;  %v2651_v25 = vpop.f32.mrb[45].mxu1 }
 0x408   :  { %v3026_v4 = vpop.f32.mrb[96].mxu0 }
 0x409   :  { %v3028_v11 = vpop.f32.mrb[97].mxu0 }
 0x40a   :  { %v3029_v35 = vpop.f32.mrb[98].mxu0 }
 0x40b   :  { %v3828_v37 = vpack.c.bf16 %v3029_v35, %v3026_v4  ;;  %v3031_v15 = vpop.f32.mrb[99].mxu0  ;;  %v10263_v4 = vpop.f32.mrb[46].mxu1 }
 0x40c   :  { %v2654_v34 = vpop.f32.mrb[47].mxu1 }
 0x40d   :  { %3241 = vmatmul.mubr.bf16.gmra.mrb[204].mxu0 %v9286_v32  ;;  %8030 = vmatprep.mubr.msk.bf16.mxu1 %vm3428_vm1, %v3828_v37  ;;  %v9299_v32 = vld [vmem:[#allocation2 + $0x70c] ss:$16 sps:$4 sm:$0xff]   ;;  %v10266_v37 = vpop.f32.mrb[48].mxu1 }
 0x40e   :  { %3248 = vmatprep.mubr.bf16.mxu0 %v9287_v36  ;;  %v2659_v15 = vpop.f32.mrb[49].mxu1 }
 0x410   :  { %v3034_v24 = vpop.f32.mrb[100].mxu0 }
 0x411   :  { %v3036_v39 = vpop.f32.mrb[101].mxu0 }
 0x412   :  { %v3037_v44 = vpop.f32.mrb[102].mxu0  ;;  %v9301_v39 = vld [vmem:[#allocation2 + $0x708] ss:$16 sps:$4 sm:$0xff]  }
 0x413   :  { %v3829_v47 = vpack.c.bf16 %v3037_v44, %v3034_v24  ;;  %v3039_v28 = vpop.f32.mrb[103].mxu0  ;;  %v9302_v44 = vld [vmem:[#allocation2 + $0x72c] ss:$16 sps:$4 sm:$0xff]  }
 0x415   :  { %3249 = vmatmul.mubr.bf16.gmra.mrb[208].mxu0 %v9289_v40  ;;  %8031 = vmatmul.mubr.msk.bf16.vlgmr.msra.gmra.mrb[120].mxu1 %vm3428_vm1, %v3829_v47  ;;  %v10268_v40 = vpop.f32.mrb[50].mxu1 }
 0x416   :  { %3256 = vmatprep.mubr.bf16.mxu0 %v9290_v45  ;;  %8047 = vmatpush3.bf16.msra.mxu1 %v4013_v49  ;;  %v2662_v45 = vpop.f32.mrb[51].mxu1 }
 0x417   :  { %8849 = vmatprep.subr.msk.bf16.mxu1 %vm3453_vm0, %v10246_v51  ;;  %v10271_v49 = vpop.f32.mrb[52].mxu1 }
 0x418   :  { %v3042_v59 = vpop.f32.mrb[104].mxu0  ;;  %v2667_v56 = vpop.f32.mrb[53].mxu1 }
 0x419   :  { %v3044_v61 = vpop.f32.mrb[105].mxu0  ;;  %v9313_v56 = vld [vmem:[#allocation2 + $0x788] ss:$16 sps:$4 sm:$0xff]  }
 0x41a   :  { %v3045_v2 = vpop.f32.mrb[106].mxu0 }
 0x41b   :  { %v3830_v7 = vpack.c.bf16 %v3045_v2, %v3042_v59  ;;  %v3047_v10 = vpop.f32.mrb[107].mxu0  ;;  %v10273_v2 = vpop.f32.mrb[54].mxu1 }
 0x41d   :  { %3257 = vmatmul.mubr.bf16.gmra.mrb[212].mxu0 %v9292_v63  ;;  %8034 = vmatprep.mubr.msk.bf16.mxu1 %vm3428_vm1, %v3830_v7  ;;  %v9304_v63 = vld [vmem:[#allocation2 + $0x728] ss:$16 sps:$4 sm:$0xff]   ;;  %v2670_v7 = vpop.f32.mrb[55].mxu1 }
 0x41e   :  { %3264 = vmatprep.mubr.bf16.mxu0 %v9293_v3 }
 0x420   :  { %v3050_v48 = vpop.f32.mrb[108].mxu0 }
 0x421   :  { %v3052_v58 = vpop.f32.mrb[109].mxu0 }
 0x422   :  { %v3053_v16 = vpop.f32.mrb[110].mxu0 }
 0x423   :  { %v3831_v60 = vpack.c.bf16 %v3053_v16, %v3050_v48  ;;  %v3055_v62 = vpop.f32.mrb[111].mxu0  ;;  %v10276_v48 = vpop.f32.mrb[56].mxu1 }
 0x424   :  { %v2675_v58 = vpop.f32.mrb[57].mxu1  ;;  %v9308_v62 = vld [vmem:[#allocation2 + $0x76c] ss:$16 sps:$4 sm:$0xff]  }
 0x425   :  { %3265 = vmatmul.mubr.bf16.gmra.mrb[216].mxu0 %v9295_v53  ;;  %8035 = vmatmul.mubr.msk.bf16.gmra.mrb[124].mxu1 %vm3428_vm1, %v3831_v60  ;;  %v10278_v21 = vpop.f32.mrb[58].mxu1 }
 0x426   :  { %3272 = vmatprep.mubr.bf16.mxu0 %v9296_v17  ;;  %v9307_v17 = vld [vmem:[#allocation2 + $0x748] ss:$16 sps:$4 sm:$0xff]   ;;  %v2678_v25 = vpop.f32.mrb[59].mxu1 }
 0x427   :  { %v9317_v25 = vld [vmem:[#allocation2 + $0x7cc] ss:$16 sps:$4 sm:$0xff]  }
 0x428   :  { %v3058_v27 = vpop.f32.mrb[112].mxu0 }
 0x429   :  { %v3060_v29 = vpop.f32.mrb[113].mxu0 }
 0x42a   :  { %v3061_v11 = vpop.f32.mrb[114].mxu0 }
 0x42b   :  { %v3832_v35 = vpack.c.bf16 %v3061_v11, %v3058_v27  ;;  %v3063_v36 = vpop.f32.mrb[115].mxu0 }
 0x42d   :  { %3273 = vmatmul.mubr.bf16.gmra.mrb[220].mxu0 %v9298_v1  ;;  %8038 = vmatprep.mubr.msk.bf16.mxu1 %vm3428_vm1, %v3832_v35  ;;  %v10281_v1 = vpop.f32.mrb[60].mxu1  ;;  %v9310_v35 = vld [vmem:[#allocation2 + $0x768] ss:$16 sps:$4 sm:$0xff]  }
 0x42e   :  { %3280 = vmatprep.mubr.bf16.mxu0 %v9299_v32  ;;  %v2683_v11 = vpop.f32.mrb[61].mxu1 }
 0x42f   :  { %v10283_v36 = vpop.f32.mrb[62].mxu1 }
 0x430   :  { %v3066_v22 = vpop.f32.mrb[116].mxu0 }
 0x431   :  { %v3068_v24 = vpop.f32.mrb[117].mxu0 }
 0x432   :  { %v3069_v41 = vpop.f32.mrb[118].mxu0  ;;  %v2686_v24 = vpop.f32.mrb[63].mxu1 }
 0x433   :  { %v3833_v47 = vpack.c.bf16 %v3069_v41, %v3066_v22  ;;  %v3071_v28 = vpop.f32.mrb[119].mxu0  ;;  %v9311_v22 = vld [vmem:[#allocation2 + $0x78c] ss:$16 sps:$4 sm:$0xff]  }
 0x435   :  { %3281 = vmatmul.mubr.bf16.gmra.mrb[224].mxu0 %v9301_v39  ;;  %8039 = vmatmul.mubr.msk.bf16.gmra.mrb[128].mxu1 %vm3428_vm1, %v3833_v47 }
 0x436   :  { %3288 = vmatprep.mubr.bf16.mxu0 %v9302_v44  ;;  %v10286_v44 = vpop.f32.mrb[64].mxu1 }
 0x437   :  { %v2691_v45 = vpop.f32.mrb[65].mxu1 }
 0x438   :  { %v3074_v59 = vpop.f32.mrb[120].mxu0 }
 0x439   :  { %v3076_v61 = vpop.f32.mrb[121].mxu0 }
 0x43a   :  { %v3077_v3 = vpop.f32.mrb[122].mxu0 }
 0x43b   :  { %v3834_v10 = vpack.c.bf16 %v3077_v3, %v3074_v59  ;;  %v3079_v42 = vpop.f32.mrb[123].mxu0  ;;  %v10288_v59 = vpop.f32.mrb[66].mxu1 }
 0x43c   :  { %v2694_v3 = vpop.f32.mrb[67].mxu1  ;;  %v10295_v42 = vld [vmem:[%s10802_s24 + $0x18] sm:$0xf] }
 0x43d   :  { %3289 = vmatmul.mubr.bf16.gmra.mrb[228].mxu0 %v9304_v63  ;;  %8042 = vmatprep.mubr.msk.bf16.mxu1 %vm3428_vm1, %v3834_v10  ;;  %v9314_v63 = vld [vmem:[#allocation2 + $0x7ac] ss:$16 sps:$4 sm:$0xff]   ;;  %v4163_v10 = vsel %vm3453_vm0, %v10246_v51, 0  ;;  %v10298_v58 = vpop.f32.mrb[68].mxu1 }
 0x43e   :  { %3296 = vmatprep.mubr.bf16.mxu0 %v9305_v43 }
 0x440   :  { %v3082_v53 = vpop.f32.mrb[124].mxu0 }
 0x441   :  { %v3084_v16 = vpop.f32.mrb[125].mxu0 }
 0x442   :  { %v3085_v60 = vpop.f32.mrb[126].mxu0 }
 0x443   :  { %v3835_v27 = vpack.c.bf16 %v3085_v60, %v3082_v53  ;;  %v3087_v29 = vpop.f32.mrb[127].mxu0  ;;  %v2699_v53 = vpop.f32.mrb[69].mxu1  ;;  %v9316_v60 = vld [vmem:[#allocation2 + $0x7a8] ss:$16 sps:$4 sm:$0xff]  }
 0x444   :  { %v10302_v51 = vpop.f32.mrb[70].mxu1  ;;  %v9325_v53 = vld [vmem:[#allocation2 + $0x80c] ss:$16 sps:$4 sm:$0xff]  }
 0x445   :  { %3297 = vmatmul.mubr.bf16.gmra.mrb[232].mxu0 %v9307_v17  ;;  %8043 = vmatmul.mubr.msk.bf16.gmra.mrb[132].mxu1 %vm3428_vm1, %v3835_v27  ;;  %v2702_v27 = vpop.f32.mrb[71].mxu1 }
 0x446   :  { %3304 = vmatprep.mubr.bf16.mxu0 %v9308_v62 }
 0x448   :  { %v3090_v32 = vpop.f32.mrb[128].mxu0 }
 0x449   :  { %v3092_v34 = vpop.f32.mrb[129].mxu0 }
 0x44a   :  { %v3093_v15 = vpop.f32.mrb[130].mxu0 }
 0x44b   :  { %v3978_v39 = vpack.c.bf16 %v3093_v15, %v3090_v32  ;;  %v3095_v41 = vpop.f32.mrb[131].mxu0  ;;  %v10305_v32 = vpop.f32.mrb[72].mxu1 }
 0x44c   :  { %v2707_v34 = vpop.f32.mrb[73].mxu1  ;;  %v9320_v41 = vld [vmem:[#allocation2 + $0x7ec] ss:$16 sps:$4 sm:$0xff]  }
 0x44d   :  { %3305 = vmatmul.mubr.bf16.gmra.mrb[236].mxu0 %v9310_v35  ;;  %8048 = vmatprep.mubr.msk.bf16.mxu1 %vm3428_vm1, %v3978_v39  ;;  %v10307_v24 = vpop.f32.mrb[74].mxu1 }
 0x44e   :  { %3312 = vmatprep.mubr.bf16.mxu0 %v9311_v22  ;;  %v9319_v22 = vld [vmem:[#allocation2 + $0x7c8] ss:$16 sps:$4 sm:$0xff]   ;;  %v2710_v45 = vpop.f32.mrb[75].mxu1 }
 0x450   :  { %v3098_v47 = vpop.f32.mrb[132].mxu0 }
 0x451   :  { %v3100_v28 = vpop.f32.mrb[133].mxu0 }
 0x452   :  { %v3101_v61 = vpop.f32.mrb[134].mxu0 }
 0x453   :  { %v3979_v43 = vpack.c.bf16 %v3101_v61, %v3098_v47  ;;  %v3103_v7 = vpop.f32.mrb[135].mxu0 }
 0x455   :  { %3313 = vmatmul.mubr.bf16.gmra.mrb[240].mxu0 %v9313_v56  ;;  %8049 = vmatmul.mubr.msk.bf16.vlgmr.msra.gmra.mrb[120].mxu1 %vm3428_vm1, %v3979_v43  ;;  %v10310_v56 = vpop.f32.mrb[76].mxu1  ;;  %v9322_v43 = vld [vmem:[#allocation2 + $0x7e8] ss:$16 sps:$4 sm:$0xff]  }
 0x456   :  { %3320 = vmatprep.mubr.bf16.mxu0 %v9314_v63  ;;  %8065 = vmatpush3.bf16.msra.mxu1 %v4163_v10  ;;  %v2715_v61 = vpop.f32.mrb[77].mxu1 }
 0x457   :  { %8850 = vmatprep.subr.msk.bf16.mxu1 %vm3453_vm0, %v10295_v42  ;;  %v10312_v7 = vpop.f32.mrb[78].mxu1 }
 0x458   :  { %v3106_v16 = vpop.f32.mrb[136].mxu0 }
 0x459   :  { %v3108_v17 = vpop.f32.mrb[137].mxu0 }
 0x45a   :  { %v3109_v62 = vpop.f32.mrb[138].mxu0 }
 0x45b   :  { %v3980_v29 = vpack.c.bf16 %v3109_v62, %v3106_v16  ;;  %v3111_v11 = vpop.f32.mrb[139].mxu0  ;;  %v2718_v16 = vpop.f32.mrb[79].mxu1 }
 0x45c   :  { %v10315_v62 = vpop.f32.mrb[80].mxu1  ;;  %v9323_v11 = vld [vmem:[#allocation2 + $0x808] ss:$16 sps:$4 sm:$0xff]  }
 0x45d   :  { %3321 = vmatmul.mubr.bf16.gmra.mrb[244].mxu0 %v9316_v60  ;;  %8052 = vmatprep.mubr.msk.bf16.mxu1 %vm3428_vm1, %v3980_v29 }
 0x45e   :  { %3328 = vmatprep.mubr.bf16.mxu0 %v9317_v25  ;;  %v2723_v25 = vpop.f32.mrb[81].mxu1 }
 0x45f   :  { %v10317_v34 = vpop.f32.mrb[82].mxu1 }
 0x460   :  { %v3114_v35 = vpop.f32.mrb[140].mxu0 }
 0x461   :  { %v3116_v15 = vpop.f32.mrb[141].mxu0 }
 0x462   :  { %v3117_v39 = vpop.f32.mrb[142].mxu0  ;;  %v9328_v15 = vld [vmem:[#allocation2 + $0x82c] ss:$16 sps:$4 sm:$0xff]  }
 0x463   :  { %v3981_v47 = vpack.c.bf16 %v3117_v39, %v3114_v35  ;;  %v3119_v28 = vpop.f32.mrb[143].mxu0 }
 0x465   :  { %3329 = vmatmul.mubr.bf16.gmra.mrb[248].mxu0 %v9319_v22  ;;  %8053 = vmatmul.mubr.msk.bf16.gmra.mrb[124].mxu1 %vm3428_vm1, %v3981_v47  ;;  %v2726_v22 = vpop.f32.mrb[83].mxu1 }
 0x466   :  { %3336 = vmatprep.mubr.bf16.mxu0 %v9320_v41  ;;  %v10320_v45 = vpop.f32.mrb[84].mxu1  ;;  %v9334_v22 = vld [vmem:[#allocation2 + $0x86c] ss:$16 sps:$4 sm:$0xff]  }
 0x467   :  { %v2731_v47 = vpop.f32.mrb[85].mxu1 }
 0x468   :  { %v3122_v63 = vpop.f32.mrb[144].mxu0 }
 0x469   :  { %v3124_v3 = vpop.f32.mrb[145].mxu0 }
 0x46a   :  { %v3125_v10 = vpop.f32.mrb[146].mxu0  ;;  %v10322_v3 = vpop.f32.mrb[86].mxu1 }
 0x46b   :  { %v3982_v17 = vpack.c.bf16 %v3125_v10, %v3122_v63  ;;  %v3127_v60 = vpop.f32.mrb[147].mxu0  ;;  %v9326_v63 = vld [vmem:[#allocation2 + $0x828] ss:$16 sps:$4 sm:$0xff]   ;;  %v9331_v10 = vld [vmem:[#allocation2 + $0x84c] ss:$16 sps:$4 sm:$0xff]  }
 0x46d   :  { %3337 = vmatmul.mubr.bf16.gmra.mrb[252].mxu0 %v9322_v43  ;;  %8056 = vmatprep.mubr.msk.bf16.mxu1 %vm3428_vm1, %v3982_v17 }
 0x46e   :  { %3344 = vmatprep.mubr.bf16.mxu0 %v9325_v53  ;;  %v2734_v53 = vpop.f32.mrb[87].mxu1 }
 0x46f   :  { %v10325_v60 = vpop.f32.mrb[88].mxu1 }
 0x470   :  { %v3130_v27 = vpop.f32.mrb[148].mxu0  ;;  %v2739_v25 = vpop.f32.mrb[89].mxu1 }
 0x471   :  { %v3132_v29 = vpop.f32.mrb[149].mxu0 }
 0x472   :  { %v3133_v35 = vpop.f32.mrb[150].mxu0 }
 0x473   :  { %v3983_v39 = vpack.c.bf16 %v3133_v35, %v3130_v27  ;;  %v3135_v41 = vpop.f32.mrb[151].mxu0  ;;  %v10327_v35 = vpop.f32.mrb[90].mxu1 }
 0x474   :  { %10803 = vst [vmem:[#allocation25_spill] sm:$0xff] %v10327_v35 }
 0x475   :  { %3345 = vmatmul.mubr.bf16.gmra.mrb[0].mxu0 %v9323_v11  ;;  %8057 = vmatmul.mubr.msk.bf16.gmra.mrb[128].mxu1 %vm3428_vm1, %v3983_v39  ;;  %v9329_v11 = vld [vmem:[#allocation2 + $0x848] ss:$16 sps:$4 sm:$0xff]   ;;  %v2742_v39 = vpop.f32.mrb[91].mxu1 }
 0x476   :  { %3352 = vmatprep.mubr.bf16.mxu0 %v9328_v15  ;;  %v9335_v39 = vld [vmem:[#allocation2 + $0x888] ss:$16 sps:$4 sm:$0xff]  }
 0x478   :  { %v3138_v28 = vpop.f32.mrb[152].mxu0 }
 0x479   :  { %v3140_v61 = vpop.f32.mrb[153].mxu0 }
 0x47a   :  { %v3141_v43 = vpop.f32.mrb[154].mxu0 }
 0x47b   :  { %v3984_v16 = vpack.c.bf16 %v3141_v43, %v3138_v28  ;;  %v3143_v17 = vpop.f32.mrb[155].mxu0  ;;  %v10330_v28 = vpop.f32.mrb[92].mxu1 }
 0x47c   :  { %10804 = vst [vmem:[#allocation26_spill] sm:$0xff] %v10330_v28  ;;  %v2747_v61 = vpop.f32.mrb[93].mxu1  ;;  %v9337_v17 = vld [vmem:[#allocation2 + $0x88c] ss:$16 sps:$4 sm:$0xff]  }
 0x47d   :  { %3353 = vmatmul.mubr.bf16.gmra.mrb[4].mxu0 %v9326_v63  ;;  %8060 = vmatprep.mubr.msk.bf16.mxu1 %vm3428_vm1, %v3984_v16  ;;  %v10332_v53 = vpop.f32.mrb[94].mxu1  ;;  %v9340_v61 = vld [vmem:[#allocation2 + $0x8ac] ss:$16 sps:$4 sm:$0xff]  }
 0x47e   :  { %3360 = vmatprep.mubr.bf16.mxu0 %v9331_v10  ;;  %v9332_v10 = vld [vmem:[#allocation2 + $0x868] ss:$16 sps:$4 sm:$0xff]   ;;  %10805 = vst [vmem:[#allocation27_spill] sm:$0xff] %v10332_v53  ;;  %v2750_v25 = vpop.f32.mrb[95].mxu1 }
 0x47f   :  { %v9338_v25 = vld [vmem:[#allocation2 + $0x8a8] ss:$16 sps:$4 sm:$0xff]  }
 0x480   :  { %v3146_v27 = vpop.f32.mrb[156].mxu0 }
 0x481   :  { %v3148_v29 = vpop.f32.mrb[157].mxu0 }
 0x482   :  { %v3149_v15 = vpop.f32.mrb[158].mxu0 }
 0x483   :  { %v3985_v41 = vpack.c.bf16 %v3149_v15, %v3146_v27  ;;  %v3151_v47 = vpop.f32.mrb[159].mxu0  ;;  %v10335_v27 = vpop.f32.mrb[96].mxu1 }
 0x485   :  { %3361 = vmatmul.mubr.bf16.gmra.mrb[8].mxu0 %v9329_v11  ;;  %8061 = vmatmul.mubr.msk.bf16.gmra.mrb[132].mxu1 %vm3428_vm1, %v3985_v41  ;;  %v2755_v11 = vpop.f32.mrb[97].mxu1 }
 0x486   :  { %3368 = vmatprep.mubr.bf16.mxu0 %v9334_v22  ;;  %v10337_v41 = vpop.f32.mrb[98].mxu1 }
 0x488   :  { %v3154_v63 = vpop.f32.mrb[160].mxu0 }
 0x489   :  { %v3156_v43 = vpop.f32.mrb[161].mxu0 }
 0x48a   :  { %v3157_v16 = vpop.f32.mrb[162].mxu0  ;;  %v2758_v43 = vpop.f32.mrb[99].mxu1 }
 0x48b   :  { %v4128_v29 = vpack.c.bf16 %v3157_v16, %v3154_v63  ;;  %v3159_v35 = vpop.f32.mrb[163].mxu0  ;;  %v10344_v63 = vld [vmem:[%s10802_s24 + $0x1c] sm:$0xf] }
 0x48c   :  { %v4313_v35 = vsel %vm3453_vm0, %v10295_v42, 0 }
 0x48d   :  { %3369 = vmatmul.mubr.bf16.gmra.mrb[12].mxu0 %v9332_v10  ;;  %8066 = vmatprep.mubr.msk.bf16.mxu1 %vm3428_vm1, %v4128_v29  ;;  %v10347_v10 = vpop.f32.mrb[100].mxu1 }
 0x48e   :  { %3376 = vmatprep.mubr.bf16.mxu0 %v9337_v17  ;;  %10806 = vst [vmem:[#allocation28_spill] sm:$0xff] %v10347_v10  ;;  %v2763_v16 = vpop.f32.mrb[101].mxu1 }
 0x48f   :  { %v10352_v29 = vpop.f32.mrb[102].mxu1 }
 0x490   :  { %v3162_v15 = vpop.f32.mrb[164].mxu0  ;;  %10807 = vst [vmem:[#allocation29_spill] sm:$0xff] %v10352_v29 }
 0x491   :  { %v3164_v22 = vpop.f32.mrb[165].mxu0 }
 0x492   :  { %v3165_v47 = vpop.f32.mrb[166].mxu0  ;;  %v2766_v22 = vpop.f32.mrb[103].mxu1 }
 0x493   :  { %v4129_v53 = vpack.c.bf16 %v3165_v47, %v3162_v15  ;;  %v3167_v28 = vpop.f32.mrb[167].mxu0  ;;  %v9343_v15 = vld [vmem:[#allocation2 + $0x8cc] ss:$16 sps:$4 sm:$0xff]  }
 0x494   :  { %v9346_v22 = vld [vmem:[#allocation2 + $0x8ec] ss:$16 sps:$4 sm:$0xff]  }
 0x495   :  { %3377 = vmatmul.mubr.bf16.gmra.mrb[16].mxu0 %v9335_v39  ;;  %8067 = vmatmul.mubr.msk.bf16.vlgmr.msra.gmra.mrb[120].mxu1 %vm3428_vm1, %v4129_v53 }
 0x496   :  { %3384 = vmatprep.mubr.bf16.mxu0 %v9340_v61  ;;  %8083 = vmatpush3.bf16.msra.mxu1 %v4313_v35  ;;  %v10355_v61 = vpop.f32.mrb[104].mxu1 }
 0x497   :  { %8851 = vmatprep.subr.msk.bf16.mxu1 %vm3453_vm0, %v10344_v63  ;;  %v2771_v43 = vpop.f32.mrb[105].mxu1 }
 0x498   :  { %v3170_v28 = vpop.f32.mrb[168].mxu0 }
 0x499   :  { %v3171_v17 = vadd.f32 %v3170_v28, %v10163_v46  ;;  %v3172_v42 = vpop.f32.mrb[169].mxu0  ;;  %v9341_v28 = vld [vmem:[#allocation2 + $0x8c8] ss:$16 sps:$4 sm:$0xff]  }
 0x49a   :  { %v3173_v11 = vpop.f32.mrb[170].mxu0  ;;  %v10359_v42 = vpop.f32.mrb[106].mxu1 }
 0x49b   :  { %v3174_v53 = vadd.f32 %v3173_v11, %v10170_v50  ;;  %v3175_v39 = vpop.f32.mrb[171].mxu0  ;;  %v2774_v10 = vpop.f32.mrb[107].mxu1 }
 0x49c   :  { %v10362_v11 = vpop.f32.mrb[108].mxu1 }
 0x49d   :  { %v4130_v47 = vpack.c.bf16 %v3174_v53, %v3171_v17  ;;  %3385 = vmatmul.mubr.bf16.gmra.mrb[20].mxu0 %v9338_v25 }
 0x49e   :  { %3392 = vmatprep.mubr.bf16.mxu0 %v9343_v15  ;;  %v2779_v15 = vpop.f32.mrb[109].mxu1 }
 0x49f   :  { %8070 = vmatprep.mubr.msk.bf16.mxu1 %vm3428_vm1, %v4130_v47  ;;  %v9344_v47 = vld [vmem:[#allocation2 + $0x8e8] ss:$16 sps:$4 sm:$0xff]   ;;  %v10366_v43 = vpop.f32.mrb[110].mxu1 }
 0x4a0   :  { %v3178_v35 = vpop.f32.mrb[172].mxu0  ;;  %v2782_v10 = vpop.f32.mrb[111].mxu1 }
 0x4a1   :  { %v3179_v46 = vadd.f32 %v3178_v35, %v10176_v57  ;;  %v3180_v16 = vpop.f32.mrb[173].mxu0 }
 0x4a2   :  { %v3181_v29 = vpop.f32.mrb[174].mxu0  ;;  %v10369_v16 = vpop.f32.mrb[112].mxu1 }
 0x4a3   :  { %v3182_v50 = vadd.f32 %v3181_v29, %v10182_v0  ;;  %v3183_v17 = vpop.f32.mrb[175].mxu0 }
 0x4a5   :  { %v4131_v25 = vpack.c.bf16 %v3182_v50, %v3179_v46  ;;  %3393 = vmatmul.mubr.bf16.gmra.mrb[24].mxu0 %v9341_v28  ;;  %v2787_v28 = vpop.f32.mrb[113].mxu1 }
 0x4a6   :  { %3400 = vmatprep.mubr.bf16.mxu0 %v9346_v22  ;;  %v10373_v17 = vpop.f32.mrb[114].mxu1 }
 0x4a7   :  { %8071 = vmatmul.mubr.msk.bf16.gmra.mrb[124].mxu1 %vm3428_vm1, %v4131_v25  ;;  %v2790_v15 = vpop.f32.mrb[115].mxu1 }
 0x4a8   :  { %v3186_v53 = vpop.f32.mrb[176].mxu0 }
 0x4a9   :  { %v3187_v57 = vadd.f32 %v3186_v53, %v10188_v6  ;;  %v3188_v39 = vpop.f32.mrb[177].mxu0 }
 0x4aa   :  { %v3189_v35 = vpop.f32.mrb[178].mxu0 }
 0x4ab   :  { %v3190_v0 = vadd.f32 %v3189_v35, %v10194_v13  ;;  %v3191_v29 = vpop.f32.mrb[179].mxu0  ;;  %v10376_v35 = vpop.f32.mrb[116].mxu1 }
 0x4ad   :  { %v4132_v46 = vpack.c.bf16 %v3190_v0, %v3187_v57  ;;  %3401 = vmatmul.mubr.bf16.gmra.mrb[28].mxu0 %v9344_v47  ;;  %v2795_v57 = vpop.f32.mrb[117].mxu1 }
 0x4ae   :  { %v10380_v29 = vpop.f32.mrb[118].mxu1 }
 0x4af   :  { %8074 = vmatprep.mubr.msk.bf16.mxu1 %vm3428_vm1, %v4132_v46  ;;  %v2798_v46 = vpop.f32.mrb[119].mxu1 }
 0x4b0   :  { %v3194_v22 = vpop.f32.mrb[180].mxu0 }
 0x4b1   :  { %v3195_v50 = vadd.f32 %v3194_v22, %v10200_v20  ;;  %v3196_v6 = vpop.f32.mrb[181].mxu0 }
 0x4b2   :  { %v3197_v25 = vpop.f32.mrb[182].mxu0 }
 0x4b3   :  { %v3198_v53 = vadd.f32 %v3197_v25, %v10203_v26  ;;  %v3199_v39 = vpop.f32.mrb[183].mxu0 }
 0x4b5   :  { %v4133_v13 = vpack.c.bf16 %v3198_v53, %v3195_v50 }
 0x4b7   :  { %8075 = vmatmul.mubr.msk.bf16.gmra.mrb[128].mxu1 %vm3428_vm1, %v4133_v13 }
 0x4b8   :  { %v3202_v47 = vpop.f32.mrb[184].mxu0 }
 0x4b9   :  { %v3203_v10 = vadd.f32 %v3202_v47, %v10212_v33  ;;  %v3204_v0 = vpop.f32.mrb[185].mxu0 }
 0x4ba   :  { %v3205_v20 = vpop.f32.mrb[186].mxu0 }
 0x4bb   :  { %v3206_v28 = vadd.f32 %v3205_v20, %v10217_v52  ;;  %v3207_v22 = vpop.f32.mrb[187].mxu0 }
 0x4bd   :  { %v4134_v6 = vpack.c.bf16 %v3206_v28, %v3203_v10 }
 0x4bf   :  { %8078 = vmatprep.mubr.msk.bf16.mxu1 %vm3428_vm1, %v4134_v6 }
 0x4c0   :  { %v3210_v26 = vpop.f32.mrb[188].mxu0 }
 0x4c1   :  { %v3211_v50 = vadd.f32 %v3210_v26, %v10220_v5  ;;  %v3212_v25 = vpop.f32.mrb[189].mxu0 }
 0x4c2   :  { %v3213_v15 = vpop.f32.mrb[190].mxu0 }
 0x4c3   :  { %v3214_v53 = vadd.f32 %v3213_v15, %v10223_v9  ;;  %v3215_v39 = vpop.f32.mrb[191].mxu0 }
 0x4c5   :  { %v4135_v33 = vpack.c.bf16 %v3214_v53, %v3211_v50 }
 0x4c7   :  { %8079 = vmatmul.mubr.msk.bf16.gmra.mrb[132].mxu1 %vm3428_vm1, %v4135_v33 }
 0x4c8   :  { %v3218_v13 = vpop.f32.mrb[192].mxu0 }
 0x4c9   :  { %v3219_v57 = vadd.f32 %v3218_v13, %v10226_v14  ;;  %v3220_v47 = vpop.f32.mrb[193].mxu0  ;;  %v4463_v14 = vsel %vm3453_vm0, %v10344_v63, 0 }
 0x4ca   :  { %v3221_v52 = vpop.f32.mrb[194].mxu0 }
 0x4cb   :  { %v3222_v10 = vadd.f32 %v3221_v52, %v10229_v19  ;;  %v3223_v0 = vpop.f32.mrb[195].mxu0  ;;  %v10397_v19 = vld [vmem:[%s10802_s24 + $0x20] sm:$0xf] }
 0x4cd   :  { %v4278_v20 = vpack.c.bf16 %v3222_v10, %v3219_v57 }
 0x4cf   :  { %8084 = vmatprep.mubr.msk.bf16.mxu1 %vm3428_vm1, %v4278_v20 }
 0x4d0   :  { %v3226_v5 = vpop.f32.mrb[196].mxu0 }
 0x4d1   :  { %v3227_v46 = vadd.f32 %v3226_v5, %v10232_v30  ;;  %v3228_v28 = vpop.f32.mrb[197].mxu0 }
 0x4d2   :  { %v3229_v9 = vpop.f32.mrb[198].mxu0 }
 0x4d3   :  { %v3230_v22 = vadd.f32 %v3229_v9, %v10234_v8  ;;  %v3231_v6 = vpop.f32.mrb[199].mxu0 }
 0x4d5   :  { %v4279_v26 = vpack.c.bf16 %v3230_v22, %v3227_v46 }
 0x4d7   :  { %8085 = vmatmul.mubr.msk.bf16.vlgmr.msra.gmra.mrb[120].mxu1 %vm3428_vm1, %v4279_v26 }
 0x4d8   :  { %v3234_v50 = vpop.f32.mrb[200].mxu0  ;;  %8101 = vmatpush3.bf16.msra.mxu1 %v4463_v14 }
 0x4d9   :  { %v3235_v30 = vadd.f32 %v3234_v50, %v10237_v18  ;;  %v3236_v25 = vpop.f32.mrb[201].mxu0  ;;  %8852 = vmatprep.subr.msk.bf16.mxu1 %vm3453_vm0, %v10397_v19 }
 0x4da   :  { %v3237_v8 = vpop.f32.mrb[202].mxu0 }
 0x4db   :  { %v3238_v15 = vadd.f32 %v3237_v8, %v10239_v38  ;;  %v3239_v53 = vpop.f32.mrb[203].mxu0 }
 0x4dd   :  { %v4280_v63 = vpack.c.bf16 %v3238_v15, %v3235_v30 }
 0x4df   :  { %8088 = vmatprep.mubr.msk.bf16.mxu1 %vm3428_vm1, %v4280_v63 }
 0x4e0   :  { %v3242_v39 = vpop.f32.mrb[204].mxu0 }
 0x4e1   :  { %v3243_v33 = vadd.f32 %v3242_v39, %v10249_v54  ;;  %v3244_v13 = vpop.f32.mrb[205].mxu0 }
 0x4e2   :  { %v3245_v57 = vpop.f32.mrb[206].mxu0 }
 0x4e3   :  { %v3246_v47 = vadd.f32 %v3245_v57, %v10253_v31  ;;  %v3247_v52 = vpop.f32.mrb[207].mxu0 }
 0x4e5   :  { %v4281_v18 = vpack.c.bf16 %v3246_v47, %v3243_v33 }
 0x4e7   :  { %8089 = vmatmul.mubr.msk.bf16.gmra.mrb[124].mxu1 %vm3428_vm1, %v4281_v18 }
 0x4e8   :  { %v3250_v10 = vpop.f32.mrb[208].mxu0 }
 0x4e9   :  { %v3251_v0 = vadd.f32 %v3250_v10, %v10256_v12  ;;  %v3252_v20 = vpop.f32.mrb[209].mxu0 }
 0x4ea   :  { %v3253_v38 = vpop.f32.mrb[210].mxu0 }
 0x4eb   :  { %v3254_v5 = vadd.f32 %v3253_v38, %v10258_v55  ;;  %v3255_v46 = vpop.f32.mrb[211].mxu0 }
 0x4ed   :  { %v4282_v28 = vpack.c.bf16 %v3254_v5, %v3251_v0 }
 0x4ef   :  { %8092 = vmatprep.mubr.msk.bf16.mxu1 %vm3428_vm1, %v4282_v28 }
 0x4f0   :  { %v3258_v54 = vpop.f32.mrb[212].mxu0 }
 0x4f1   :  { %v3259_v9 = vadd.f32 %v3258_v54, %v10261_v23  ;;  %v3260_v22 = vpop.f32.mrb[213].mxu0 }
 0x4f2   :  { %v3261_v31 = vpop.f32.mrb[214].mxu0 }
 0x4f3   :  { %v3262_v6 = vadd.f32 %v3261_v31, %v10263_v4  ;;  %v3263_v26 = vpop.f32.mrb[215].mxu0 }
 0x4f5   :  { %v4283_v14 = vpack.c.bf16 %v3262_v6, %v3259_v9 }
 0x4f7   :  { %8093 = vmatmul.mubr.msk.bf16.gmra.mrb[128].mxu1 %vm3428_vm1, %v4283_v14 }
 0x4f8   :  { %v3266_v12 = vpop.f32.mrb[216].mxu0 }
 0x4f9   :  { %v3267_v50 = vadd.f32 %v3266_v12, %v10266_v37  ;;  %v3268_v30 = vpop.f32.mrb[217].mxu0 }
 0x4fa   :  { %v3269_v55 = vpop.f32.mrb[218].mxu0 }
 0x4fb   :  { %v3270_v25 = vadd.f32 %v3269_v55, %v10268_v40  ;;  %v3271_v8 = vpop.f32.mrb[219].mxu0 }
 0x4fd   :  { %v4284_v15 = vpack.c.bf16 %v3270_v25, %v3267_v50 }
 0x4ff   :  { %8096 = vmatprep.mubr.msk.bf16.mxu1 %vm3428_vm1, %v4284_v15 }
 0x500   :  { %v3274_v23 = vpop.f32.mrb[220].mxu0 }
 0x501   :  { %v3275_v53 = vadd.f32 %v3274_v23, %v10271_v49  ;;  %v3276_v63 = vpop.f32.mrb[221].mxu0 }
 0x502   :  { %v3277_v4 = vpop.f32.mrb[222].mxu0 }
 0x503   :  { %v3278_v39 = vadd.f32 %v3277_v4, %v10273_v2  ;;  %v3279_v33 = vpop.f32.mrb[223].mxu0 }
 0x505   :  { %v4285_v13 = vpack.c.bf16 %v3278_v39, %v3275_v53 }
 0x507   :  { %8097 = vmatmul.mubr.msk.bf16.gmra.mrb[132].mxu1 %vm3428_vm1, %v4285_v13 }
 0x508   :  { %v3282_v37 = vpop.f32.mrb[224].mxu0 }
 0x509   :  { %v3283_v57 = vadd.f32 %v3282_v37, %v10276_v48  ;;  %v3284_v47 = vpop.f32.mrb[225].mxu0  ;;  %v4613_v48 = vsel %vm3453_vm0, %v10397_v19, 0 }
 0x50a   :  { %v3285_v40 = vpop.f32.mrb[226].mxu0 }
 0x50b   :  { %v3286_v52 = vadd.f32 %v3285_v40, %v10278_v21  ;;  %v3287_v18 = vpop.f32.mrb[227].mxu0 }
 0x50d   :  { %v4428_v10 = vpack.c.bf16 %v3286_v52, %v3283_v57 }
 0x50f   :  { %8102 = vmatprep.mubr.msk.bf16.mxu1 %vm3428_vm1, %v4428_v10 }
 0x510   :  { %v3290_v49 = vpop.f32.mrb[228].mxu0 }
 0x511   :  { %v3291_v0 = vadd.f32 %v3290_v49, %v10281_v1  ;;  %v3292_v20 = vpop.f32.mrb[229].mxu0 }
 0x512   :  { %v3293_v2 = vpop.f32.mrb[230].mxu0 }
 0x513   :  { %v3294_v38 = vadd.f32 %v3293_v2, %v10283_v36  ;;  %v3295_v5 = vpop.f32.mrb[231].mxu0  ;;  %v10808_v2 = vld [vmem:[#allocation25_spill] sm:$0xff] }
 0x515   :  { %v4429_v46 = vpack.c.bf16 %v3294_v38, %v3291_v0 }
 0x517   :  { %8103 = vmatmul.mubr.msk.bf16.vlgmr.msra.gmra.mrb[120].mxu1 %vm3428_vm1, %v4429_v46 }
 0x518   :  { %v3298_v28 = vpop.f32.mrb[232].mxu0  ;;  %8119 = vmatpush3.bf16.msra.mxu1 %v4613_v48  ;;  %v10809_v48 = vld [vmem:[#allocation26_spill] sm:$0xff] }
 0x519   :  { %v3299_v21 = vadd.f32 %v3298_v28, %v10286_v44  ;;  %v3300_v54 = vpop.f32.mrb[233].mxu0 }
 0x51a   :  { %v3301_v9 = vpop.f32.mrb[234].mxu0  ;;  %v10810_v54 = vld [vmem:[#allocation27_spill] sm:$0xff] }
 0x51b   :  { %v3302_v22 = vadd.f32 %v3301_v9, %v10288_v59  ;;  %v3303_v1 = vpop.f32.mrb[235].mxu0 }
 0x51d   :  { %v4430_v31 = vpack.c.bf16 %v3302_v22, %v3299_v21 }
 0x51f   :  { %8106 = vmatprep.mubr.msk.bf16.mxu1 %vm3428_vm1, %v4430_v31 }
 0x520   :  { %v3306_v36 = vpop.f32.mrb[236].mxu0 }
 0x521   :  { %v3307_v6 = vadd.f32 %v3306_v36, %v10298_v58  ;;  %v3308_v26 = vpop.f32.mrb[237].mxu0 }
 0x522   :  { %v3309_v14 = vpop.f32.mrb[238].mxu0 }
 0x523   :  { %v3310_v19 = vadd.f32 %v3309_v14, %v10302_v51  ;;  %v3311_v12 = vpop.f32.mrb[239].mxu0 }
 0x525   :  { %v4431_v50 = vpack.c.bf16 %v3310_v19, %v3307_v6 }
 0x527   :  { %8107 = vmatmul.mubr.msk.bf16.gmra.mrb[124].mxu1 %vm3428_vm1, %v4431_v50  ;;  %v10811_v50 = vld [vmem:[#allocation28_spill] sm:$0xff] }
 0x528   :  { %v3314_v44 = vpop.f32.mrb[240].mxu0 }
 0x529   :  { %v3315_v30 = vadd.f32 %v3314_v44, %v10305_v32  ;;  %v3316_v55 = vpop.f32.mrb[241].mxu0 }
 0x52a   :  { %v3317_v59 = vpop.f32.mrb[242].mxu0 }
 0x52b   :  { %v3318_v25 = vadd.f32 %v3317_v59, %v10307_v24  ;;  %v3319_v8 = vpop.f32.mrb[243].mxu0  ;;  %v10812_v59 = vld [vmem:[#allocation29_spill] sm:$0xff] }
 0x52d   :  { %v4432_v15 = vpack.c.bf16 %v3318_v25, %v3315_v30 }
 0x52f   :  { %8110 = vmatprep.mubr.msk.bf16.mxu1 %vm3428_vm1, %v4432_v15 }
 0x530   :  { %v3322_v58 = vpop.f32.mrb[244].mxu0 }
 0x531   :  { %v3323_v23 = vadd.f32 %v3322_v58, %v10310_v56  ;;  %v3324_v53 = vpop.f32.mrb[245].mxu0 }
 0x532   :  { %v3325_v51 = vpop.f32.mrb[246].mxu0 }
 0x533   :  { %v3326_v63 = vadd.f32 %v3325_v51, %v10312_v7  ;;  %v3327_v4 = vpop.f32.mrb[247].mxu0 }
 0x535   :  { %v4433_v39 = vpack.c.bf16 %v3326_v63, %v3323_v23 }
 0x537   :  { %8111 = vmatmul.mubr.msk.bf16.gmra.mrb[128].mxu1 %vm3428_vm1, %v4433_v39 }
 0x538   :  { %v3330_v32 = vpop.f32.mrb[248].mxu0 }
 0x539   :  { %v3331_v33 = vadd.f32 %v3330_v32, %v10315_v62  ;;  %v3332_v13 = vpop.f32.mrb[249].mxu0 }
 0x53a   :  { %v3333_v24 = vpop.f32.mrb[250].mxu0 }
 0x53b   :  { %v3334_v37 = vadd.f32 %v3333_v24, %v10317_v34  ;;  %v3335_v57 = vpop.f32.mrb[251].mxu0 }
 0x53d   :  { %v4434_v47 = vpack.c.bf16 %v3334_v37, %v3331_v33 }
 0x53f   :  { %8114 = vmatprep.mubr.msk.bf16.mxu1 %vm3428_vm1, %v4434_v47 }
 0x540   :  { %v3338_v56 = vpop.f32.mrb[252].mxu0 }
 0x541   :  { %v3339_v40 = vadd.f32 %v3338_v56, %v10320_v45  ;;  %v3340_v52 = vpop.f32.mrb[253].mxu0 }
 0x542   :  { %v3341_v7 = vpop.f32.mrb[254].mxu0 }
 0x543   :  { %v3342_v18 = vadd.f32 %v3341_v7, %v10322_v3  ;;  %v3343_v10 = vpop.f32.mrb[255].mxu0 }
 0x545   :  { %v4435_v49 = vpack.c.bf16 %v3342_v18, %v3339_v40 }
 0x547   :  { %8115 = vmatmul.mubr.msk.bf16.gmra.mrb[132].mxu1 %vm3428_vm1, %v4435_v49 }
 0x548   :  { %v3346_v62 = vpop.f32.mrb[0].mxu0 }
 0x549   :  { %v3347_v0 = vadd.f32 %v3346_v62, %v10325_v60  ;;  %v3348_v20 = vpop.f32.mrb[1].mxu0 }
 0x54a   :  { %v3349_v34 = vpop.f32.mrb[2].mxu0 }
 0x54b   :  { %v3350_v38 = vadd.f32 %v3349_v34, %v10808_v2  ;;  %v3351_v5 = vpop.f32.mrb[3].mxu0 }
 0x54d   :  { %v4578_v46 = vpack.c.bf16 %v3350_v38, %v3347_v0  ;;  %v7653_v0 = vld [vmem:[#allocation4] ss:$0 sm:$0xff] }
 0x54f   :  { %8120 = vmatprep.mubr.msk.bf16.mxu1 %vm3428_vm1, %v4578_v46 }
 0x550   :  { %v3354_v45 = vpop.f32.mrb[4].mxu0 }
 0x551   :  { %v3355_v28 = vadd.f32 %v3354_v45, %v10809_v48  ;;  %v3356_v21 = vpop.f32.mrb[5].mxu0 }
 0x552   :  { %v3357_v3 = vpop.f32.mrb[6].mxu0 }
 0x553   :  { %v3358_v9 = vadd.f32 %v3357_v3, %v10810_v54  ;;  %v3359_v22 = vpop.f32.mrb[7].mxu0 }
 0x555   :  { %v4579_v1 = vpack.c.bf16 %v3358_v9, %v3355_v28 }
 0x557   :  { %8121 = vmatmul.mubr.msk.bf16.vlgmr.msra.gmra.mrb[120].mxu1 %vm3428_vm1, %v4579_v1 }
 0x558   :  { %v3362_v60 = vpop.f32.mrb[8].mxu0 }
 0x559   :  { %v3363_v31 = vadd.f32 %v3362_v60, %v10335_v27  ;;  %v3364_v36 = vpop.f32.mrb[9].mxu0 }
 0x55a   :  { %v3365_v6 = vpop.f32.mrb[10].mxu0 }
 0x55b   :  { %v3366_v26 = vadd.f32 %v3365_v6, %v10337_v41  ;;  %v3367_v14 = vpop.f32.mrb[11].mxu0 }
 0x55d   :  { %v4580_v19 = vpack.c.bf16 %v3366_v26, %v3363_v31 }
 0x55f   :  { %8124 = vmatprep.mubr.msk.bf16.mxu1 %vm3428_vm1, %v4580_v19 }
 0x560   :  { %v3370_v12 = vpop.f32.mrb[12].mxu0 }
 0x561   :  { %v3371_v44 = vadd.f32 %v3370_v12, %v10811_v50  ;;  %v3372_v30 = vpop.f32.mrb[13].mxu0 }
 0x562   :  { %v3373_v55 = vpop.f32.mrb[14].mxu0 }
 0x563   :  { %v3374_v25 = vadd.f32 %v3373_v55, %v10812_v59  ;;  %v3375_v8 = vpop.f32.mrb[15].mxu0 }
 0x565   :  { %v4581_v15 = vpack.c.bf16 %v3374_v25, %v3371_v44 }
 0x567   :  { %8125 = vmatmul.mubr.msk.bf16.gmra.mrb[124].mxu1 %vm3428_vm1, %v4581_v15 }
 0x568   :  { %v3378_v27 = vpop.f32.mrb[16].mxu0 }
 0x569   :  { %v3379_v58 = vadd.f32 %v3378_v27, %v10355_v61  ;;  %v3380_v23 = vpop.f32.mrb[17].mxu0 }
 0x56a   :  { %v3381_v41 = vpop.f32.mrb[18].mxu0 }
 0x56b   :  { %v3382_v53 = vadd.f32 %v3381_v41, %v10359_v42  ;;  %v3383_v51 = vpop.f32.mrb[19].mxu0 }
 0x56d   :  { %v4582_v63 = vpack.c.bf16 %v3382_v53, %v3379_v58 }
 0x56f   :  { %8128 = vmatprep.mubr.msk.bf16.mxu1 %vm3428_vm1, %v4582_v63 }
 0x570   :  { %v3386_v4 = vpop.f32.mrb[20].mxu0 }
 0x571   :  { %v3387_v39 = vadd.f32 %v3386_v4, %v10362_v11  ;;  %v3388_v32 = vpop.f32.mrb[21].mxu0 }
 0x572   :  { %v3389_v33 = vpop.f32.mrb[22].mxu0 }
 0x573   :  { %v3390_v13 = vadd.f32 %v3389_v33, %v10366_v43  ;;  %v3391_v24 = vpop.f32.mrb[23].mxu0 }
 0x575   :  { %v4583_v37 = vpack.c.bf16 %v3390_v13, %v3387_v39 }
 0x577   :  { %8129 = vmatmul.mubr.msk.bf16.gmra.mrb[128].mxu1 %vm3428_vm1, %v4583_v37 }
 0x578   :  { %v3394_v61 = vpop.f32.mrb[24].mxu0 }
 0x579   :  { %v3395_v57 = vadd.f32 %v3394_v61, %v10369_v16  ;;  %v3396_v47 = vpop.f32.mrb[25].mxu0  ;;  %v9347_v16 = vld [vmem:[#allocation6] sm:$0xff]  }
 0x57a   :  { %v3397_v42 = vpop.f32.mrb[26].mxu0 }
 0x57b   :  { %v3398_v56 = vadd.f32 %v3397_v42, %v10373_v17  ;;  %v3399_v40 = vpop.f32.mrb[27].mxu0 }
 0x57d   :  { %v4584_v52 = vpack.c.bf16 %v3398_v56, %v3395_v57 }
 0x57f   :  { %8132 = vmatprep.mubr.msk.bf16.mxu1 %vm3428_vm1, %v4584_v52 }
 0x580   :  { %v3402_v11 = vpop.f32.mrb[28].mxu0 }
 0x581   :  { %v3403_v7 = vadd.f32 %v3402_v11, %v10376_v35  ;;  %v3404_v18 = vpop.f32.mrb[29].mxu0 }
 0x582   :  { %v3405_v43 = vpop.f32.mrb[30].mxu0  ;;  %v9348_v18 = vld [vmem:[#allocation6 + $0x8] sm:$0xff]  }
 0x583   :  { %v3406_v10 = vadd.f32 %v3405_v43, %v10380_v29  ;;  %v3407_v49 = vpop.f32.mrb[31].mxu0  ;;  %v9349_v43 = vld [vmem:[#allocation6 + $0x10] sm:$0xff]  }
 0x584   :  { %v9350_v49 = vld [vmem:[#allocation6 + $0x18] sm:$0xff]  }
 0x585   :  { %v4585_v62 = vpack.c.bf16 %v3406_v10, %v3403_v7  ;;  %v7672_v7 = vld [vmem:[%s10770_s6 + $0x4] sm:$0xf] }
 0x586   :  { %v5110_v10 = vsel %vm3453_vm0, %v7672_v7, 0 }
 0x587   :  { %8133 = vmatmul.mubr.msk.bf16.gmra.mrb[132].mxu1 %vm3428_vm1, %v4585_v62  ;;  %v9351_v62 = vld [vmem:[#allocation6 + $0x20] sm:$0xff]  }
 0x588   :  { %8152 = vmatprep.mubr.bf16.mxu1 %v9347_v16  ;;  %v9352_v16 = vld [vmem:[#allocation6 + $0x28] sm:$0xff]  }
 0x62a   :  { %v8122_v20 = vpop.f32.mrb[120].mxu1 }
 0x62b   :  { %v4737_v17 = vadd.f32 %v8122_v20, %v7653_v0  ;;  %v4649_v34 = vpop.f32.mrb[121].mxu1  ;;  %v9354_v20 = vld [vmem:[#allocation6 + $0x38] sm:$0xff]  }
 0x62c   :  { %v4735_v2 = vadd.f32 %v7653_v0, %v4649_v34  ;;  %v8123_v38 = vpop.f32.mrb[122].mxu1  ;;  %v9356_v34 = vld [vmem:[#allocation6 + $0x48] sm:$0xff]  }
 0x62d   :  { %v4738_v5 = vadd.f32 %v8123_v38, %v7653_v0  ;;  %v4652_v46 = vpop.f32.mrb[123].mxu1  ;;  %v4753_v35 = vmax.f32 %v4737_v17, 0.0  ;;  %v9355_v17 = vld [vmem:[#allocation6 + $0x40] sm:$0xff]   ;;  %v9358_v38 = vld [vmem:[#allocation6 + $0x58] sm:$0xff]  }
 0x62e   :  { %v4736_v45 = vadd.f32 %v7653_v0, %v4652_v46  ;;  %v4751_v28 = vmax.f32 %v4735_v2, 0.0  ;;  %v9357_v2 = vld [vmem:[#allocation6 + $0x50] sm:$0xff]   ;;  %v9360_v46 = vld [vmem:[#allocation6 + $0x68] sm:$0xff]  }
 0x62f   :  { %v4754_v48 = vmax.f32 %v4738_v5, 0.0  ;;  %v9359_v5 = vld [vmem:[#allocation6 + $0x60] sm:$0xff]  }
 0x630   :  { %v4752_v21 = vmax.f32 %v4736_v45, 0.0  ;;  %v9361_v45 = vld [vmem:[#allocation6 + $0x70] sm:$0xff]  }
 0x631   :  { %v4768_v29 = vpack.c.bf16 %v4754_v48, %v4753_v35  ;;  %v9362_v35 = vld [vmem:[#allocation6 + $0x78] sm:$0xff]   ;;  %v9363_v48 = vld [vmem:[#allocation6 + $0x80] sm:$0xff]  }
 0x632   :  { %v4767_v3 = vpack.c.bf16 %v4752_v21, %v4751_v28  ;;  %v9364_v28 = vld [vmem:[#allocation6 + $0x88] sm:$0xff]   ;;  %v5098_v21 = vld [vmem:[%s10770_s6] sm:$0xf] }
 0x634   :  { %8136 = vmatprep.subr.bf16.mxu1 %v4767_v3 }
 0x635   :  { %8137 = vmatpush3.bf16.msra.mxu1 %v4767_v3 }
 0x636   :  { %8138 = vmatprep.subr.bf16.mxu1 %v4768_v29 }
 0x639   :  { %8139 = vmatpush3.bf16.msra.mxu1 %v4768_v29 }
 0x63a   :  { %v8126_v54 = vpop.f32.mrb[124].mxu1 }
 0x63b   :  { %v4741_v9 = vadd.f32 %v8126_v54, %v7653_v0  ;;  %v4665_v22 = vpop.f32.mrb[125].mxu1 }
 0x63c   :  { %v4739_v1 = vadd.f32 %v7653_v0, %v4665_v22  ;;  %v8127_v60 = vpop.f32.mrb[126].mxu1 }
 0x63d   :  { %v4742_v31 = vadd.f32 %v8127_v60, %v7653_v0  ;;  %v4668_v36 = vpop.f32.mrb[127].mxu1  ;;  %v4757_v26 = vmax.f32 %v4741_v9, 0.0 }
 0x63e   :  { %v4740_v6 = vadd.f32 %v7653_v0, %v4668_v36  ;;  %v4755_v19 = vmax.f32 %v4739_v1, 0.0 }
 0x63f   :  { %v4758_v14 = vmax.f32 %v4742_v31, 0.0 }
 0x640   :  { %v4756_v12 = vmax.f32 %v4740_v6, 0.0 }
 0x641   :  { %v4770_v50 = vpack.c.bf16 %v4758_v14, %v4757_v26 }
 0x642   :  { %v4769_v44 = vpack.c.bf16 %v4756_v12, %v4755_v19  ;;  %v5168_v19 = vsel %vm3453_vm0, %v5098_v21, 0  ;;  %v7677_v12 = vld [vmem:[%s10770_s6 + $0x8] sm:$0xf] }
 0x644   :  { %8140 = vmatprep.subr.bf16.mxu1 %v4769_v44 }
 0x645   :  { %8141 = vmatpush3.bf16.msra.mxu1 %v4769_v44 }
 0x646   :  { %8142 = vmatprep.subr.bf16.mxu1 %v4770_v50 }
 0x649   :  { %8143 = vmatpush3.bf16.msra.mxu1 %v4770_v50 }
 0x64a   :  { %v8130_v30 = vpop.f32.mrb[128].mxu1 }
 0x64b   :  { %v4745_v55 = vadd.f32 %v8130_v30, %v7653_v0  ;;  %v4681_v59 = vpop.f32.mrb[129].mxu1 }
 0x64c   :  { %v4743_v25 = vadd.f32 %v7653_v0, %v4681_v59  ;;  %v8131_v8 = vpop.f32.mrb[130].mxu1 }
 0x64d   :  { %v4746_v15 = vadd.f32 %v8131_v8, %v7653_v0  ;;  %v4684_v27 = vpop.f32.mrb[131].mxu1  ;;  %v4761_v23 = vmax.f32 %v4745_v55, 0.0 }
 0x64e   :  { %v4744_v58 = vadd.f32 %v7653_v0, %v4684_v27  ;;  %v4759_v53 = vmax.f32 %v4743_v25, 0.0 }
 0x64f   :  { %v4762_v41 = vmax.f32 %v4746_v15, 0.0  ;;  %v5230_v15 = vsel %vm3453_vm0, %v7677_v12, 0 }
 0x650   :  { %v4760_v51 = vmax.f32 %v4744_v58, 0.0 }
 0x651   :  { %v4772_v63 = vpack.c.bf16 %v4762_v41, %v4761_v23  ;;  %v7680_v23 = vld [vmem:[%s10770_s6 + $0xc] sm:$0xf] }
 0x652   :  { %v4771_v4 = vpack.c.bf16 %v4760_v51, %v4759_v53 }
 0x654   :  { %8144 = vmatprep.subr.bf16.mxu1 %v4771_v4 }
 0x655   :  { %8145 = vmatpush3.bf16.msra.mxu1 %v4771_v4 }
 0x656   :  { %8146 = vmatprep.subr.bf16.mxu1 %v4772_v63 }
 0x659   :  { %8147 = vmatpush3.bf16.msra.mxu1 %v4772_v63 }
 0x65a   :  { %v8134_v39 = vpop.f32.mrb[132].mxu1 }
 0x65b   :  { %v4749_v32 = vadd.f32 %v8134_v39, %v7653_v0  ;;  %v4697_v33 = vpop.f32.mrb[133].mxu1 }
 0x65c   :  { %v4747_v13 = vadd.f32 %v7653_v0, %v4697_v33  ;;  %v8135_v24 = vpop.f32.mrb[134].mxu1 }
 0x65d   :  { %v4750_v37 = vadd.f32 %v8135_v24, %v7653_v0  ;;  %v4700_v61 = vpop.f32.mrb[135].mxu1  ;;  %v4765_v47 = vmax.f32 %v4749_v32, 0.0  ;;  %v5296_v24 = vsel %vm3453_vm0, %v7680_v23, 0 }
 0x65e   :  { %v4748_v57 = vadd.f32 %v7653_v0, %v4700_v61  ;;  %v4763_v56 = vmax.f32 %v4747_v13, 0.0  ;;  %v9353_v0 = vld [vmem:[#allocation6 + $0x30] sm:$0xff]  }
 0x65f   :  { %v4766_v42 = vmax.f32 %v4750_v37, 0.0  ;;  %v7683_v37 = vld [vmem:[%s10770_s6 + $0x10] sm:$0xf] }
 0x660   :  { %v4764_v40 = vmax.f32 %v4748_v57, 0.0 }
 0x661   :  { %v4774_v52 = vpack.c.bf16 %v4766_v42, %v4765_v47 }
 0x662   :  { %v4773_v11 = vpack.c.bf16 %v4764_v40, %v4763_v56 }
 0x664   :  { %8148 = vmatprep.subr.bf16.mxu1 %v4773_v11 }
 0x665   :  { %8149 = vmatpush3.bf16.msra.mxu1 %v4773_v11  ;;  %v5362_v11 = vsel %vm3453_vm0, %v7683_v37, 0 }
 0x666   :  { %8150 = vmatprep.subr.bf16.mxu1 %v4774_v52 }
 0x669   :  { %8151 = vmatpush3.bf16.msra.mxu1 %v4774_v52 }
 0x66a   :  { %8853 = vmatprep.subr.msk.bf16.mxu1 %vm3453_vm0, %v7672_v7 }
 0x66c   :  { %8153 = vmatmul.mubr.bf16.vlgmr.msra.gmra.mrb[136].mxu1 %v9348_v18  ;;  %v7686_v18 = vld [vmem:[%s10770_s6 + $0x14] sm:$0xf] }
 0x66d   :  { %8156 = vmatprep.mubr.bf16.mxu1 %v9349_v43  ;;  %8189 = vmatpush3.bf16.msra.mxu1 %v5110_v10 }
 0x66e   :  { %8854 = vmatprep.subr.msk.bf16.mxu1 %vm3453_vm0, %v5098_v21 }
 0x674   :  { %8157 = vmatmul.mubr.bf16.gmra.mrb[140].mxu1 %v9350_v49 }
 0x675   :  { %8160 = vmatprep.mubr.bf16.mxu1 %v9351_v62 }
 0x67c   :  { %8161 = vmatmul.mubr.bf16.gmra.mrb[144].mxu1 %v9352_v16 }
 0x67d   :  { %8164 = vmatprep.mubr.bf16.mxu1 %v9353_v0 }
 0x684   :  { %8165 = vmatmul.mubr.bf16.gmra.mrb[148].mxu1 %v9354_v20 }
 0x685   :  { %8168 = vmatprep.mubr.bf16.mxu1 %v9355_v17 }
 0x68c   :  { %8169 = vmatmul.mubr.bf16.gmra.mrb[152].mxu1 %v9356_v34 }
 0x68d   :  { %8172 = vmatprep.mubr.bf16.mxu1 %v9357_v2 }
 0x694   :  { %8173 = vmatmul.mubr.bf16.gmra.mrb[156].mxu1 %v9358_v38  ;;  %v5428_v38 = vsel %vm3453_vm0, %v7686_v18, 0 }
 0x695   :  { %8176 = vmatprep.mubr.bf16.mxu1 %v9359_v5  ;;  %v7689_v5 = vld [vmem:[%s10770_s6 + $0x18] sm:$0xf] }
 0x69c   :  { %8177 = vmatmul.mubr.bf16.gmra.mrb[160].mxu1 %v9360_v46 }
 0x69d   :  { %8180 = vmatprep.mubr.bf16.mxu1 %v9361_v45 }
 0x6a4   :  { %8181 = vmatmul.mubr.bf16.gmra.mrb[164].mxu1 %v9362_v35 }
 0x6a5   :  { %8184 = vmatprep.mubr.bf16.mxu1 %v9363_v48 }
 0x6ac   :  { %8185 = vmatmul.mubr.bf16.gmra.mrb[168].mxu1 %v9364_v28 }
 0x73f   :  { %v8154_v29 = vpop.f32.mrb[136].mxu1 }
 0x740   :  { %v4953_v3 = vpop.f32.mrb[137].mxu1 }
 0x741   :  { %v8155_v54 = vpop.f32.mrb[138].mxu1 }
 0x742   :  { %v5097_v9 = vpack.c.bf16 %v8155_v54, %v8154_v29  ;;  %v4956_v22 = vpop.f32.mrb[139].mxu1  ;;  %v5494_v29 = vsel %vm3453_vm0, %v7689_v5, 0 }
 0x743   :  { %v5096_v1 = vpack.c.bf16 %v4956_v22, %v4953_v3  ;;  %v7692_v3 = vld [vmem:[%s10770_s6 + $0x1c] sm:$0xf] }
 0x744   :  { %v5560_v54 = vsel %vm3453_vm0, %v7692_v3, 0 }
 0x747   :  { %v8158_v60 = vpop.f32.mrb[140].mxu1 }
 0x748   :  { %v4969_v31 = vpop.f32.mrb[141].mxu1 }
 0x749   :  { %v8159_v36 = vpop.f32.mrb[142].mxu1 }
 0x74a   :  { %v5100_v6 = vpack.c.bf16 %v8159_v36, %v8158_v60  ;;  %v4972_v26 = vpop.f32.mrb[143].mxu1  ;;  %v7698_v60 = vld [vmem:[#allocation7] ss:$0 sm:$0xff] }
 0x74b   :  { %v5099_v14 = vpack.c.bf16 %v4972_v26, %v4969_v31 }
 0x74d   :  { %8190 = vmatprep.mubr.msk.bf16.mxu1 %vm3428_vm1, %v5099_v14 }
 0x74e   :  { %8191 = vmatmul.mubr.msk.bf16.vlgmr.msra.gmra.mrb[172].mxu1 %vm3428_vm1, %v5100_v6 }
 0x74f   :  { %8196 = vmatprep.mubr.msk.bf16.mxu1 %vm3428_vm1, %v5096_v1  ;;  %8195 = vmatpush3.bf16.msra.mxu1 %v5168_v19  ;;  %v8162_v50 = vpop.f32.mrb[144].mxu1  ;;  %v9653_v1 = vmov 0.0  }
 0x750   :  { %v4985_v44 = vpop.f32.mrb[145].mxu1  ;;  %8855 = vmatprep.subr.msk.bf16.mxu1 %vm3453_vm0, %v7677_v12 }
 0x751   :  { %v8163_v30 = vpop.f32.mrb[146].mxu1 }
 0x752   :  { %v5220_v55 = vpack.c.bf16 %v8163_v30, %v8162_v50  ;;  %v4988_v59 = vpop.f32.mrb[147].mxu1 }
 0x753   :  { %v5219_v25 = vpack.c.bf16 %v4988_v59, %v4985_v44 }
 0x757   :  { %v8166_v8 = vpop.f32.mrb[148].mxu1 }
 0x758   :  { %v5001_v27 = vpop.f32.mrb[149].mxu1 }
 0x759   :  { %v8167_v58 = vpop.f32.mrb[150].mxu1 }
 0x75a   :  { %8197 = vmatmul.mubr.msk.bf16.vlgmr.msra.gmra.mrb[172].mxu1 %vm3428_vm1, %v5097_v9  ;;  %v5286_v41 = vpack.c.bf16 %v8167_v58, %v8166_v8  ;;  %v5004_v53 = vpop.f32.mrb[151].mxu1  ;;  %v7695_v9 = vld [vmem:[%s10770_s6 + $0x20] sm:$0xf] }
 0x75b   :  { %8201 = vmatpush3.bf16.msra.mxu1 %v5230_v15  ;;  %8202 = vmatprep.mubr.msk.bf16.mxu1 %vm3428_vm1, %v5219_v25  ;;  %v5285_v51 = vpack.c.bf16 %v5004_v53, %v5001_v27  ;;  %v5626_v22 = vsel %vm3453_vm0, %v7695_v9, 0  ;;  %v7709_v15 = vld [vmem:[%s10773_s9 + $0x4] sm:$0xf]  ;;  %v9368_v53 = vld [vmem:[%s10772_s8 + $0x18] sm:$0xff]  }
 0x75c   :  { %8856 = vmatprep.subr.msk.bf16.mxu1 %vm3453_vm0, %v7680_v23  ;;  %v9365_v27 = vld [vmem:[%s10772_s8] sm:$0xff]   ;;  %v5827_v58 = vsel %vm3453_vm0, %v7709_v15, 0  ;;  %v9366_v23 = vld [vmem:[%s10772_s8 + $0x8] sm:$0xff]  }
 0x75f   :  { %v8170_v63 = vpop.f32.mrb[152].mxu1 }
 0x760   :  { %v5017_v4 = vpop.f32.mrb[153].mxu1 }
 0x761   :  { %v8171_v39 = vpop.f32.mrb[154].mxu1 }
 0x762   :  { %v5352_v32 = vpack.c.bf16 %v8171_v39, %v8170_v63  ;;  %v5020_v33 = vpop.f32.mrb[155].mxu1 }
 0x763   :  { %v5351_v13 = vpack.c.bf16 %v5020_v33, %v5017_v4  ;;  %v5819_v4 = vld [vmem:[%s10773_s9] sm:$0xf] }
 0x766   :  { %8203 = vmatmul.mubr.msk.bf16.vlgmr.msra.gmra.mrb[172].mxu1 %vm3428_vm1, %v5220_v55 }
 0x767   :  { %8207 = vmatpush3.bf16.msra.mxu1 %v5296_v24  ;;  %8208 = vmatprep.mubr.msk.bf16.mxu1 %vm3428_vm1, %v5285_v51  ;;  %v8174_v61 = vpop.f32.mrb[156].mxu1  ;;  %v9369_v51 = vld [vmem:[%s10772_s8 + $0x20] ss:$0 sps:$4 sm:$0xff]   ;;  %v5873_v24 = vsel %vm3453_vm0, %v5819_v4, 0 }
 0x768   :  { %8857 = vmatprep.subr.msk.bf16.mxu1 %vm3453_vm0, %v7683_v37  ;;  %v5033_v57 = vpop.f32.mrb[157].mxu1 }
 0x769   :  { %v8175_v47 = vpop.f32.mrb[158].mxu1 }
 0x76a   :  { %v5418_v42 = vpack.c.bf16 %v8175_v47, %v8174_v61  ;;  %v5036_v56 = vpop.f32.mrb[159].mxu1  ;;  %v7712_v61 = vld [vmem:[%s10773_s9 + $0x8] sm:$0xf] }
 0x76b   :  { %v5417_v40 = vpack.c.bf16 %v5036_v56, %v5033_v57 }
 0x76f   :  { %v8178_v52 = vpop.f32.mrb[160].mxu1 }
 0x770   :  { %v5049_v7 = vpop.f32.mrb[161].mxu1 }
 0x771   :  { %v8179_v43 = vpop.f32.mrb[162].mxu1 }
 0x772   :  { %8209 = vmatmul.mubr.msk.bf16.vlgmr.msra.gmra.mrb[172].mxu1 %vm3428_vm1, %v5286_v41  ;;  %v5484_v10 = vpack.c.bf16 %v8179_v43, %v8178_v52  ;;  %v5052_v49 = vpop.f32.mrb[163].mxu1  ;;  %v9367_v41 = vld [vmem:[%s10772_s8 + $0x10] sm:$0xff]   ;;  %v7714_v52 = vld [vmem:[%s10773_s9 + $0xc] sm:$0xf] }
 0x773   :  { %8213 = vmatpush3.bf16.msra.mxu1 %v5362_v11  ;;  %8214 = vmatprep.mubr.msk.bf16.mxu1 %vm3428_vm1, %v5351_v13  ;;  %v5483_v62 = vpack.c.bf16 %v5052_v49, %v5049_v7 }
 0x774   :  { %8858 = vmatprep.subr.msk.bf16.mxu1 %vm3453_vm0, %v7686_v18 }
 0x777   :  { %v8182_v16 = vpop.f32.mrb[164].mxu1 }
 0x778   :  { %v5065_v0 = vpop.f32.mrb[165].mxu1 }
 0x779   :  { %v8183_v20 = vpop.f32.mrb[166].mxu1 }
 0x77a   :  { %v5550_v17 = vpack.c.bf16 %v8183_v20, %v8182_v16  ;;  %v5068_v34 = vpop.f32.mrb[167].mxu1 }
 0x77b   :  { %v5549_v2 = vpack.c.bf16 %v5068_v34, %v5065_v0 }
 0x77e   :  { %8215 = vmatmul.mubr.msk.bf16.vlgmr.msra.gmra.mrb[172].mxu1 %vm3428_vm1, %v5352_v32 }
 0x77f   :  { %8219 = vmatpush3.bf16.msra.mxu1 %v5428_v38  ;;  %8220 = vmatprep.mubr.msk.bf16.mxu1 %vm3428_vm1, %v5417_v40  ;;  %v8186_v46 = vpop.f32.mrb[168].mxu1  ;;  %v5922_v40 = vsel %vm3453_vm0, %v7712_v61, 0  ;;  %v7718_v38 = vld [vmem:[%s10773_s9 + $0x14] sm:$0xf] }
 0x780   :  { %8859 = vmatprep.subr.msk.bf16.mxu1 %vm3453_vm0, %v7689_v5  ;;  %v5081_v45 = vpop.f32.mrb[169].mxu1 }
 0x781   :  { %v8187_v35 = vpop.f32.mrb[170].mxu1 }
 0x782   :  { %v5616_v48 = vpack.c.bf16 %v8187_v35, %v8186_v46  ;;  %v5084_v28 = vpop.f32.mrb[171].mxu1 }
 0x783   :  { %v5615_v21 = vpack.c.bf16 %v5084_v28, %v5081_v45 }
 0x78a   :  { %8221 = vmatmul.mubr.msk.bf16.vlgmr.msra.gmra.mrb[172].mxu1 %vm3428_vm1, %v5418_v42 }
 0x78b   :  { %8225 = vmatpush3.bf16.msra.mxu1 %v5494_v29  ;;  %8226 = vmatprep.mubr.msk.bf16.mxu1 %vm3428_vm1, %v5483_v62  ;;  %v7716_v62 = vld [vmem:[%s10773_s9 + $0x10] sm:$0xf] }
 0x78c   :  { %8860 = vmatprep.subr.msk.bf16.mxu1 %vm3453_vm0, %v7692_v3  ;;  %v6022_v34 = vsel %vm3453_vm0, %v7716_v62, 0 }
 0x796   :  { %8227 = vmatmul.mubr.msk.bf16.vlgmr.msra.gmra.mrb[172].mxu1 %vm3428_vm1, %v5484_v10  ;;  %v5972_v10 = vsel %vm3453_vm0, %v7714_v52, 0 }
 0x797   :  { %8231 = vmatpush3.bf16.msra.mxu1 %v5560_v54  ;;  %8232 = vmatprep.mubr.msk.bf16.mxu1 %vm3428_vm1, %v5549_v2  ;;  %v7722_v54 = vld [vmem:[%s10773_s9 + $0x1c] sm:$0xf] }
 0x798   :  { %8861 = vmatprep.subr.msk.bf16.mxu1 %vm3453_vm0, %v7695_v9 }
 0x7a2   :  { %8233 = vmatmul.mubr.msk.bf16.vlgmr.msra.gmra.mrb[172].mxu1 %vm3428_vm1, %v5550_v17 }
 0x7a3   :  { %8237 = vmatpush3.bf16.msra.mxu1 %v5626_v22  ;;  %8238 = vmatprep.mubr.msk.bf16.mxu1 %vm3428_vm1, %v5615_v21  ;;  %v7720_v21 = vld [vmem:[%s10773_s9 + $0x18] sm:$0xf]  ;;  %v6172_v22 = vsel %vm3453_vm0, %v7722_v54, 0 }
 0x7a4   :  { %8242 = vmatprep.subr.bf16.mxu1 %v9653_v1  ;;  %v6122_v3 = vsel %vm3453_vm0, %v7720_v21, 0 }
 0x7ae   :  { %8239 = vmatmul.mubr.msk.bf16.vlgmr.msra.gmra.mrb[172].mxu1 %vm3428_vm1, %v5616_v48  ;;  %v6072_v48 = vsel %vm3453_vm0, %v7718_v38, 0 }
 0x7af   :  { %8246 = vmatprep.mubr.msk.bf16.mxu1 %vm9654_vm2, %v9653_v1 }
 0x881   :  { %v8240_v31 = vpop.f32.mrb[172].mxu1 }
 0x882   :  { %v5690_v36 = vadd.f32 %v8240_v31, %v7698_v60  ;;  %v5662_v6 = vpop.f32.mrb[173].mxu1 }
 0x883   :  { %v5688_v26 = vadd.f32 %v7698_v60, %v5662_v6  ;;  %v8241_v14 = vpop.f32.mrb[174].mxu1 }
 0x884   :  { %v5691_v19 = vadd.f32 %v8241_v14, %v7698_v60  ;;  %v5665_v12 = vpop.f32.mrb[175].mxu1  ;;  %v5694_v44 = vmax.f32 %v5690_v36, 0.0 }
 0x885   :  { %v5689_v50 = vadd.f32 %v7698_v60, %v5665_v12  ;;  %v5692_v55 = vmax.f32 %v5688_v26, 0.0  ;;  %v7724_v60 = vld [vmem:[%s10773_s9 + $0x20] sm:$0xf]  ;;  %s10813_s9 = sld [smem:[#allocation31_spill]] }
 0x886   :  { %v5695_v30 = vmax.f32 %v5691_v19, 0.0  ;;  %v6222_v36 = vsel %vm3453_vm0, %v7724_v60, 0 }
 0x887   :  { %v5693_v59 = vmax.f32 %v5689_v50, 0.0 }
 0x888   :  { %v5697_v25 = vpack.c.bf16 %v5695_v30, %v5694_v44 }
 0x889   :  { %v5696_v8 = vpack.c.bf16 %v5693_v59, %v5692_v55 }
 0x88b   :  { %8243 = vmatpush3.bf16.msra.mxu1 %v5696_v8 }
 0x88c   :  { %8244 = vmatprep.subr.bf16.mxu1 %v9653_v1 }
 0x88f   :  { %8245 = vmatpush3.bf16.msra.mxu1 %v5697_v25 }
 0x890   :  { %8266 = vmatprep.subr.bf16.mxu1 %v9653_v1 }
 0x892   :  { %8247 = vmatmul.mubr.msk.bf16.vlgmr.msra.gmra.mrb[176].mxu1 %vm5730_vm3, %v9365_v27 }
 0x893   :  { %8250 = vmatprep.mubr.msk.bf16.mxu1 %vm9654_vm2, %v9653_v1  ;;  %8267 = vmatpush3.bf16.msra.mxu1 %v5827_v58 }
 0x894   :  { %8272 = vmatprep.subr.bf16.mxu1 %v9653_v1 }
 0x89a   :  { %8251 = vmatmul.mubr.msk.bf16.gmra.mrb[180].mxu1 %vm5730_vm3, %v9366_v23 }
 0x89b   :  { %8254 = vmatprep.mubr.msk.bf16.mxu1 %vm9654_vm2, %v9653_v1 }
 0x8a2   :  { %8255 = vmatmul.mubr.msk.bf16.gmra.mrb[184].mxu1 %vm5730_vm3, %v9367_v41 }
 0x8a3   :  { %8258 = vmatprep.mubr.msk.bf16.mxu1 %vm9654_vm2, %v9653_v1 }
 0x8aa   :  { %8259 = vmatmul.mubr.msk.bf16.gmra.mrb[188].mxu1 %vm5730_vm3, %v9368_v53 }
 0x8ab   :  { %8262 = vmatprep.mubr.msk.bf16.mxu1 %vm9654_vm2, %v9653_v1 }
 0x8b2   :  { %8263 = vmatmul.mubr.msk.bf16.gmra.mrb[192].mxu1 %vm5730_vm3, %v9369_v51 }
 0x8b3   :  { %8268 = vmatprep.mubr.msk.bf16.mxu1 %vm9654_vm2, %v9653_v1 }
 0x965   :  { %v5780_v63 = vpop.f32.mrb[176].mxu1 }
 0x966   :  { %v8248_v39 = vpop.f32.mrb[177].mxu1  ;;  %v5818_v42 = vpack.c.bf16 %v5780_v63, %v5780_v63 }
 0x967   :  { %v5783_v32 = vpop.f32.mrb[178].mxu1 }
 0x968   :  { %v5820_v33 = vpack.c.bf16 %v5783_v32, %v5783_v32  ;;  %v8249_v13 = vpop.f32.mrb[179].mxu1 }
 0x96a   :  { %8269 = vmatmul.mubr.msk.bf16.vlgmr.msra.gmra.mrb[196].mxu1 %vm3428_vm1, %v5820_v33 }
 0x96b   :  { %8273 = vmatpush3.bf16.msra.mxu1 %v5873_v24  ;;  %8274 = vmatprep.mubr.msk.bf16.mxu1 %vm9654_vm2, %v9653_v1 }
 0x96c   :  { %8278 = vmatprep.subr.bf16.mxu1 %v9653_v1 }
 0x96d   :  { %v5788_v37 = vpop.f32.mrb[180].mxu1 }
 0x96e   :  { %v8252_v57 = vpop.f32.mrb[181].mxu1  ;;  %v5915_v7 = vpack.c.bf16 %v5788_v37, %v5788_v37 }
 0x96f   :  { %v5791_v47 = vpop.f32.mrb[182].mxu1 }
 0x970   :  { %v8253_v56 = vpop.f32.mrb[183].mxu1  ;;  %v5965_v17 = vpack.c.bf16 %v5791_v47, %v5791_v47 }
 0x972   :  { %8275 = vmatmul.mubr.msk.bf16.vlgmr.msra.gmra.mrb[200].mxu1 %vm3428_vm1, %v5818_v42 }
 0x973   :  { %8279 = vmatpush3.bf16.msra.mxu1 %v5922_v40  ;;  %8280 = vmatprep.mubr.msk.bf16.mxu1 %vm9654_vm2, %v9653_v1 }
 0x974   :  { %8284 = vmatprep.subr.bf16.mxu1 %v9653_v1 }
 0x975   :  { %v5796_v11 = vpop.f32.mrb[184].mxu1 }
 0x976   :  { %v8256_v18 = vpop.f32.mrb[185].mxu1  ;;  %v6015_v46 = vpack.c.bf16 %v5796_v11, %v5796_v11 }
 0x977   :  { %v5799_v43 = vpop.f32.mrb[186].mxu1 }
 0x978   :  { %v8257_v49 = vpop.f32.mrb[187].mxu1  ;;  %v6065_v29 = vpack.c.bf16 %v5799_v43, %v5799_v43 }
 0x97a   :  { %8281 = vmatmul.mubr.msk.bf16.vlgmr.msra.gmra.mrb[204].mxu1 %vm3428_vm1, %v5915_v7 }
 0x97b   :  { %8285 = vmatpush3.bf16.msra.mxu1 %v5972_v10  ;;  %8286 = vmatprep.mubr.msk.bf16.mxu1 %vm9654_vm2, %v9653_v1 }
 0x97c   :  { %8290 = vmatprep.subr.bf16.mxu1 %v9653_v1 }
 0x97d   :  { %v5804_v16 = vpop.f32.mrb[188].mxu1 }
 0x97e   :  { %v8260_v0 = vpop.f32.mrb[189].mxu1  ;;  %v6115_v9 = vpack.c.bf16 %v5804_v16, %v5804_v16  ;;  %v7726_v16 = vld [vmem:[#allocation9] ss:$0 sm:$0xff] }
 0x97f   :  { %v5807_v20 = vpop.f32.mrb[190].mxu1 }
 0x980   :  { %v8261_v2 = vpop.f32.mrb[191].mxu1  ;;  %v6165_v31 = vpack.c.bf16 %v5807_v20, %v5807_v20 }
 0x982   :  { %8287 = vmatmul.mubr.msk.bf16.vlgmr.msra.gmra.mrb[208].mxu1 %vm3428_vm1, %v5965_v17 }
 0x983   :  { %8291 = vmatpush3.bf16.msra.mxu1 %v6022_v34  ;;  %8292 = vmatprep.mubr.msk.bf16.mxu1 %vm9654_vm2, %v9653_v1 }
 0x984   :  { %8296 = vmatprep.subr.bf16.mxu1 %v9653_v1 }
 0x985   :  { %v5812_v5 = vpop.f32.mrb[192].mxu1 }
 0x986   :  { %v8264_v45 = vpop.f32.mrb[193].mxu1  ;;  %v6215_v6 = vpack.c.bf16 %v5812_v5, %v5812_v5 }
 0x987   :  { %v5815_v35 = vpop.f32.mrb[194].mxu1  ;;  %v6275_v45 = vld [vmem:[#allocation10] sm:$0x1] }
 0x988   :  { %v8265_v28 = vpop.f32.mrb[195].mxu1  ;;  %v6325_v35 = vld [vmem:[#allocation10 + $0x1] sm:$0x1] }
 0x98a   :  { %8293 = vmatmul.mubr.msk.bf16.vlgmr.msra.gmra.mrb[212].mxu1 %vm3428_vm1, %v6015_v46 }
 0x98b   :  { %8297 = vmatpush3.bf16.msra.mxu1 %v6072_v48  ;;  %8298 = vmatprep.mubr.msk.bf16.mxu1 %vm9654_vm2, %v9653_v1  ;;  %v6371_v48 = vld [vmem:[#allocation12 + $0x4] sm:$0xf] }
 0x98c   :  { %8302 = vmatprep.subr.bf16.mxu1 %v9653_v1  ;;  %v6376_v28 = vsel %vm3453_vm0, %v6371_v48, 0 }
 0x992   :  { %8299 = vmatmul.mubr.msk.bf16.vlgmr.msra.gmra.mrb[216].mxu1 %vm3428_vm1, %v6065_v29 }
 0x993   :  { %8303 = vmatpush3.bf16.msra.mxu1 %v6122_v3  ;;  %8304 = vmatprep.mubr.msk.bf16.mxu1 %vm9654_vm2, %v9653_v1 }
 0x994   :  { %8308 = vmatprep.subr.bf16.mxu1 %v9653_v1 }
 0x99a   :  { %8305 = vmatmul.mubr.msk.bf16.vlgmr.msra.gmra.mrb[220].mxu1 %vm3428_vm1, %v6115_v9  ;;  %v6323_v9 = vld [vmem:[#allocation12] sm:$0xf] }
 0x99b   :  { %8309 = vmatpush3.bf16.msra.mxu1 %v6172_v22  ;;  %8310 = vmatprep.mubr.msk.bf16.mxu1 %vm9654_vm2, %v9653_v1 }
 0x99c   :  { %8314 = vmatprep.subr.bf16.mxu1 %v9653_v1 }
 0x9a2   :  { %8311 = vmatmul.mubr.msk.bf16.vlgmr.msra.gmra.mrb[224].mxu1 %vm3428_vm1, %v6165_v31 }
 0x9a3   :  { %8315 = vmatpush3.bf16.msra.mxu1 %v6222_v36  ;;  %8316 = vmatprep.mubr.msk.bf16.mxu1 %vm9654_vm2, %v9653_v1  ;;  %v6422_v36 = vsel %vm3453_vm0, %v6323_v9, 0  ;;  %v7753_v9 = vld [vmem:[%s10783_s19 + $0x8] sm:$0xff] }
 0x9a4   :  { %8320 = vmatprep.subr.bf16.mxu1 %v9653_v1 }
 0x9aa   :  { %8317 = vmatmul.mubr.msk.bf16.vlgmr.msra.gmra.mrb[228].mxu1 %vm3428_vm1, %v6215_v6 }
 0x9ab   :  { %8322 = vmatprep.mubr.msk.bf16.mxu1 %vm9654_vm2, %v9653_v1 }
 0xa3d   :  { %v5863_v26 = vpop.f32.mrb[196].mxu1 }
 0xa3e   :  { %v8270_v14 = vpop.f32.mrb[197].mxu1 }
 0xa3f   :  { %v5866_v19 = vpop.f32.mrb[198].mxu1 }
 0xa40   :  { %v8271_v12 = vpop.f32.mrb[199].mxu1  ;;  %v6465_v19 = vld [vmem:[#allocation10 + $0x2] sm:$0x1] }
 0xa41   :  { %v6511_v12 = vld [vmem:[#allocation12 + $0x8] sm:$0xf] }
 0xa45   :  { %v5909_v50 = vpop.f32.mrb[200].mxu1 }
 0xa46   :  { %v5910_v44 = vadd.f32 %v5909_v50, %v5863_v26  ;;  %v8276_v30 = vpop.f32.mrb[201].mxu1  ;;  %v6516_v50 = vsel %vm3453_vm0, %v6511_v12, 0  ;;  %v9376_v12 = vld [vmem:[%s10781_s17 + $0x20] sm:$0xff]  }
 0xa47   :  { %v5912_v55 = vpop.f32.mrb[202].mxu1 }
 0xa48   :  { %v8277_v59 = vpop.f32.mrb[203].mxu1 }
 0xa4d   :  { %v5958_v25 = vpop.f32.mrb[204].mxu1 }
 0xa4e   :  { %v5964_v8 = vadd.f32 %v5958_v25, %v5910_v44  ;;  %v8282_v15 = vpop.f32.mrb[205].mxu1 }
 0xa4f   :  { %v5961_v27 = vpop.f32.mrb[206].mxu1 }
 0xa50   :  { %v8283_v58 = vpop.f32.mrb[207].mxu1 }
 0xa55   :  { %v6008_v23 = vpop.f32.mrb[208].mxu1 }
 0xa56   :  { %v6014_v41 = vadd.f32 %v6008_v23, %v5964_v8  ;;  %v8288_v53 = vpop.f32.mrb[209].mxu1 }
 0xa57   :  { %v6011_v51 = vpop.f32.mrb[210].mxu1 }
 0xa58   :  { %v8289_v63 = vpop.f32.mrb[211].mxu1 }
 0xa5d   :  { %v6058_v4 = vpop.f32.mrb[212].mxu1 }
 0xa5e   :  { %v6064_v39 = vadd.f32 %v6058_v4, %v6014_v41  ;;  %v8294_v32 = vpop.f32.mrb[213].mxu1  ;;  %v6560_v4 = vld [vmem:[#allocation10 + $0x3] sm:$0x1] }
 0xa5f   :  { %v6061_v33 = vpop.f32.mrb[214].mxu1 }
 0xa60   :  { %v8295_v13 = vpop.f32.mrb[215].mxu1 }
 0xa65   :  { %v6108_v24 = vpop.f32.mrb[216].mxu1 }
 0xa66   :  { %v6114_v37 = vadd.f32 %v6108_v24, %v6064_v39  ;;  %v8300_v61 = vpop.f32.mrb[217].mxu1  ;;  %v6606_v39 = vld [vmem:[#allocation12 + $0xc] sm:$0xf] }
 0xa67   :  { %v6111_v57 = vpop.f32.mrb[218].mxu1  ;;  %v6611_v32 = vsel %vm3453_vm0, %v6606_v39, 0 }
 0xa68   :  { %v8301_v47 = vpop.f32.mrb[219].mxu1 }
 0xa6d   :  { %v6158_v42 = vpop.f32.mrb[220].mxu1 }
 0xa6e   :  { %v6164_v56 = vadd.f32 %v6158_v42, %v6114_v37  ;;  %v8306_v40 = vpop.f32.mrb[221].mxu1 }
 0xa6f   :  { %v6161_v52 = vpop.f32.mrb[222].mxu1 }
 0xa70   :  { %v8307_v11 = vpop.f32.mrb[223].mxu1  ;;  %v9370_v52 = vld [vmem:[#allocation15] sm:$0xff]  }
 0xa71   :  { %v9371_v11 = vld [vmem:[#allocation15 + $0x8] sm:$0xff]  }
 0xa75   :  { %v6208_v7 = vpop.f32.mrb[224].mxu1 }
 0xa76   :  { %v6214_v18 = vadd.f32 %v6208_v7, %v6164_v56  ;;  %v8312_v43 = vpop.f32.mrb[225].mxu1 }
 0xa77   :  { %v6211_v10 = vpop.f32.mrb[226].mxu1 }
 0xa78   :  { %v8313_v49 = vpop.f32.mrb[227].mxu1 }
 0xa7d   :  { %v6258_v62 = vpop.f32.mrb[228].mxu1 }
 0xa7e   :  { %v6264_v0 = vadd.f32 %v6258_v62, %v6214_v18  ;;  %v8318_v20 = vpop.f32.mrb[229].mxu1  ;;  %v7735_v18 = vld [vmem:[#allocation13] ss:$0 sm:$0xff] }
 0xa7f   :  { %v6261_v17 = vpop.f32.mrb[230].mxu1 }
 0xa80   :  { %v6272_v34 = vadd.f32 %v7726_v16, %v6264_v0  ;;  %v8319_v2 = vpop.f32.mrb[231].mxu1  ;;  %v7736_v17 = vld [vmem:[#allocation16] ss:$0 sm:$0xff] }
 0xa82   :  { %v6273_v38 = vmax.f32 %v6272_v34, 0.0 }
 0xa84   :  { %v6274_v5 = vpack.c.bf16 %v6273_v38, %v6273_v38 }
 0xa86   :  { %v6280_v46 = vsel %vm3453_vm0, %v6274_v5, 0 }
 0xa87   :  { %8321 = vmatpush3.bf16.msra.mxu1 %v6280_v46 }
 0xa88   :  { %8326 = vmatprep.subr.bf16.mxu1 %v9653_v1 }
 0xa8a   :  { %8323 = vmatmul.mubr.msk.bf16.vlgmr.msra.gmra.mrb[232].mxu1 %vm3428_vm1, %v6275_v45 }
 0xa8b   :  { %8327 = vmatpush3.bf16.msra.mxu1 %v6280_v46  ;;  %8328 = vmatprep.mubr.msk.bf16.mxu1 %vm9654_vm2, %v9653_v1 }
 0xa8c   :  { %8332 = vmatprep.subr.bf16.mxu1 %v9653_v1 }
 0xa92   :  { %8329 = vmatmul.mubr.msk.bf16.vlgmr.msra.gmra.mrb[236].mxu1 %vm3428_vm1, %v6325_v35 }
 0xa93   :  { %8334 = vmatprep.mubr.msk.bf16.mxu1 %vm9654_vm2, %v9653_v1  ;;  %8333 = vmatpush3.bf16.msra.mxu1 %v6376_v28  ;;  %v6732_v28 = vld [vmem:[%s10780_s16] sm:$0xf] }
 0xa94   :  { %8338 = vmatprep.subr.bf16.mxu1 %v9653_v1 }
 0xb5d   :  { %v6316_v21 = vpop.f32.mrb[232].mxu1 }
 0xb5e   :  { %v8324_v29 = vpop.f32.mrb[233].mxu1  ;;  %v6322_v14 = vpack.c.bf16 %v6316_v21, %v6316_v21  ;;  %v9372_v21 = vld [vmem:[%s10781_s17] sm:$0xff]  }
 0xb5f   :  { %v6319_v3 = vpop.f32.mrb[234].mxu1  ;;  %v9373_v29 = vld [vmem:[%s10781_s17 + $0x8] sm:$0xff]  }
 0xb60   :  { %v8325_v54 = vpop.f32.mrb[235].mxu1  ;;  %v6848_v3 = vld [vmem:[%s10783_s19] sm:$0xff] }
 0xb61   :  { %v7762_v54 = vld [vmem:[%s10783_s19 + $0x10] sm:$0xff]  ;;  %6851 = vperm.xlu0 %8881, %v6848_v3  }
 0xb62   :  { %6998 = vperm.xlu1 %8882, %v7762_v54  }
 0xb65   :  { %v6363_v22 = vpop.f32.mrb[236].mxu1  ;;  %6924 = vperm.xlu0 %8881, %v7753_v9  }
 0xb66   :  { %v6369_v60 = vpack.c.bf16 %v6363_v22, %v6363_v22  ;;  %v8330_v31 = vpop.f32.mrb[237].mxu1  ;;  %v7771_v22 = vld [vmem:[%s10783_s19 + $0x18] sm:$0xff] }
 0xb67   :  { %v6366_v6 = vpop.f32.mrb[238].mxu1  ;;  %7072 = vperm.xlu1 %8882, %v7771_v22   ;;  %v9374_v31 = vld [vmem:[%s10781_s17 + $0x10] sm:$0xff]  }
 0xb68   :  { %v8331_v26 = vpop.f32.mrb[239].mxu1  ;;  %8335 = vmatmul.mubr.msk.bf16.vlgmr.msra.gmra.mrb[240].mxu1 %vm3428_vm1, %v6369_v60 }
 0xb69   :  { %8339 = vmatpush3.bf16.msra.mxu1 %v6422_v36  ;;  %8340 = vmatprep.mubr.msk.bf16.mxu1 %vm9654_vm2, %v9653_v1 }
 0xb6a   :  { %8344 = vmatprep.subr.bf16.mxu1 %v9653_v1 }
 0xb70   :  { %8341 = vmatmul.mubr.msk.bf16.vlgmr.msra.gmra.mrb[244].mxu1 %vm3428_vm1, %v6322_v14 }
 0xb71   :  { %8345 = vmatpush3.bf16.msra.mxu1 %v6280_v46  ;;  %8346 = vmatprep.mubr.msk.bf16.mxu1 %vm9654_vm2, %v9653_v1 }
 0xb72   :  { %8350 = vmatprep.subr.bf16.mxu1 %v9653_v1 }
 0xb78   :  { %8347 = vmatmul.mubr.msk.bf16.vlgmr.msra.gmra.mrb[248].mxu1 %vm3428_vm1, %v6465_v19  ;;  %v9375_v19 = vld [vmem:[%s10781_s17 + $0x18] sm:$0xff]  }
 0xb79   :  { %8352 = vmatprep.mubr.msk.bf16.mxu1 %vm9654_vm2, %v9653_v1  ;;  %8351 = vmatpush3.bf16.msra.mxu1 %v6516_v50  ;;  %v9377_v50 = vld [vmem:[%s10781_s17 + $0x28] sm:$0xff]  }
 0xb7a   :  { %8356 = vmatprep.subr.bf16.mxu1 %v9653_v1 }
 0xc3b   :  { %v6412_v44 = vpop.f32.mrb[240].mxu1 }
 0xc3c   :  { %v8336_v30 = vpop.f32.mrb[241].mxu1 }
 0xc3d   :  { %v6415_v55 = vpop.f32.mrb[242].mxu1  ;;  %v9379_v30 = vld [vmem:[%s10781_s17 + $0x38] sm:$0xff]  }
 0xc3e   :  { %v8337_v59 = vpop.f32.mrb[243].mxu1  ;;  %v7080_v55 = vld [vmem:[%s10813_s9] sm:$0xf] }
 0xc43   :  { %v6458_v25 = vpop.f32.mrb[244].mxu1 }
 0xc44   :  { %v6459_v8 = vadd.f32 %v6458_v25, %v6412_v44  ;;  %v8342_v15 = vpop.f32.mrb[245].mxu1  ;;  %v9378_v44 = vld [vmem:[%s10781_s17 + $0x30] sm:$0xff]  }
 0xc45   :  { %v6461_v27 = vpop.f32.mrb[246].mxu1 }
 0xc46   :  { %v8343_v58 = vpop.f32.mrb[247].mxu1  ;;  %v7741_v27 = vld [vmem:[#allocation18] ss:$0 sm:$0xff] }
 0xc47   :  { %v6852_v58 = vpop.permute.xlu0 %6851 }
 0xc4b   :  { %v6503_v23 = vpop.f32.mrb[248].mxu1 }
 0xc4c   :  { %v6509_v41 = vpack.c.bf16 %v6503_v23, %v6503_v23  ;;  %v8348_v53 = vpop.f32.mrb[249].mxu1  ;;  %v7749_v23 = vld [vmem:[#allocation18 + $0x1] ss:$0 sm:$0xff] }
 0xc4d   :  { %v6506_v51 = vpop.f32.mrb[250].mxu1 }
 0xc4e   :  { %v8349_v63 = vpop.f32.mrb[251].mxu1  ;;  %8353 = vmatmul.mubr.msk.bf16.vlgmr.msra.gmra.mrb[252].mxu1 %vm3428_vm1, %v6509_v41  ;;  %v6925_v51 = vpop.permute.xlu0 %6924 }
 0xc4f   :  { %8357 = vmatpush3.bf16.msra.mxu1 %v6280_v46  ;;  %8358 = vmatprep.mubr.msk.bf16.mxu1 %vm9654_vm2, %v9653_v1 }
 0xc50   :  { %8362 = vmatprep.subr.bf16.mxu1 %v9653_v1 }
 0xc56   :  { %8359 = vmatmul.mubr.msk.bf16.vlgmr.msra.gmra.mrb[0].mxu1 %vm3428_vm1, %v6560_v4 }
 0xc57   :  { %8364 = vmatprep.mubr.msk.bf16.mxu1 %vm9654_vm2, %v9653_v1  ;;  %8363 = vmatpush3.bf16.msra.mxu1 %v6611_v32 }
 0xc58   :  { %8368 = vmatprep.subr.bf16.mxu1 %v9653_v1 }
 0xd21   :  { %v6552_v33 = vpop.f32.mrb[252].mxu1 }
 0xd22   :  { %v6558_v13 = vadd.f32 %v6552_v33, %v6459_v8  ;;  %v8354_v24 = vpop.f32.mrb[253].mxu1 }
 0xd23   :  { %v6555_v37 = vpop.f32.mrb[254].mxu1 }
 0xd24   :  { %v8355_v61 = vpop.f32.mrb[255].mxu1  ;;  %v7758_v37 = vld [vmem:[#allocation18 + $0x2] ss:$0 sm:$0xff] }
 0xd29   :  { %v6598_v57 = vpop.f32.mrb[0].mxu1 }
 0xd2a   :  { %v6604_v47 = vpack.c.bf16 %v6598_v57, %v6598_v57  ;;  %v8360_v42 = vpop.f32.mrb[1].mxu1  ;;  %v6999_v57 = vpop.permute.xlu1 %6998 }
 0xd2b   :  { %v6601_v56 = vpop.f32.mrb[2].mxu1 }
 0xd2c   :  { %v8361_v40 = vpop.f32.mrb[3].mxu1  ;;  %8365 = vmatmul.mubr.msk.bf16.vlgmr.msra.gmra.mrb[4].mxu1 %vm3428_vm1, %v6604_v47 }
 0xd2d   :  { %8372 = vmatprep.mubr.msk.bf16.mxu1 %vm9654_vm2, %v9653_v1  ;;  %8369 = vmatpush3.bf16.msra.mxu1 %v9370_v52 }
 0xd2e   :  { %8370 = vmatprep.subr.bf16.mxu1 %v9653_v1 }
 0xd31   :  { %8371 = vmatpush3.bf16.msra.mxu1 %v9371_v11 }
 0xd32   :  { %8376 = vmatprep.subr.bf16.mxu1 %v9653_v1 }
 0xdff   :  { %v6647_v7 = vpop.f32.mrb[4].mxu1 }
 0xe00   :  { %v6653_v43 = vadd.f32 %v6647_v7, %v6558_v13  ;;  %v8366_v10 = vpop.f32.mrb[5].mxu1  ;;  %v7767_v7 = vld [vmem:[#allocation18 + $0x3] ss:$0 sm:$0xff] }
 0xe01   :  { %v6650_v49 = vpop.f32.mrb[6].mxu1 }
 0xe02   :  { %v6661_v62 = vadd.f32 %v7735_v18, %v6653_v43  ;;  %v8367_v16 = vpop.f32.mrb[7].mxu1  ;;  %v7073_v49 = vpop.permute.xlu1 %7072 }
 0xe04   :  { %v6662_v0 = vmax.f32 %v6661_v62, 0.0 }
 0xe06   :  { %v6663_v20 = vpack.c.bf16 %v6662_v0, %v6662_v0 }
 0xe08   :  { %8373 = vmatmul.mubr.msk.bf16.vlgmr.msra.gmra.mrb[8].mxu1 %vm5730_vm3, %v6663_v20 }
 0xe09   :  { %8378 = vmatprep.mubr.msk.bf16.mxu1 %vm9654_vm2, %v9653_v1 }
 0xedb   :  { %v6724_v34 = vpop.f32.mrb[8].mxu1 }
 0xedc   :  { %v6725_v2 = vadd.f32 %v7736_v17, %v6724_v34  ;;  %v8374_v38 = vpop.f32.mrb[9].mxu1  ;;  %v7774_v17 = vld [vmem:[%s10813_s9 + $0x4] sm:$0xf] }
 0xedd   :  { %v6727_v5 = vpop.f32.mrb[10].mxu1 }
 0xede   :  { %v6730_v46 = vmax.f32 %v6725_v2, 0.0  ;;  %v8375_v45 = vpop.f32.mrb[11].mxu1 }
 0xee0   :  { %v6731_v35 = vpack.c.bf16 %v6730_v46, %v6730_v46 }
 0xee2   :  { %v6739_v48 = vsel %vm6737_vm4, %v6731_v35, 0 }
 0xee3   :  { %8377 = vmatpush3.bf16.msra.mxu1 %v6739_v48 }
 0xee4   :  { %8382 = vmatprep.subr.bf16.mxu1 %v9653_v1 }
 0xee6   :  { %8379 = vmatmul.mubr.msk.bf16.vlgmr.msra.gmra.mrb[12].mxu1 %vm6733_vm5, %v6732_v28 }
 0xee7   :  { %8383 = vmatpush3.bf16.msra.mxu1 %v9372_v21  ;;  %8386 = vmatprep.mubr.msk.bf16.mxu1 %vm9654_vm2, %v9653_v1 }
 0xee8   :  { %8384 = vmatprep.subr.bf16.mxu1 %v9653_v1 }
 0xeeb   :  { %8385 = vmatpush3.bf16.msra.mxu1 %v9373_v29 }
 0xeec   :  { %8390 = vmatprep.subr.bf16.mxu1 %v9653_v1 }
 0xfb9   :  { %v6775_v60 = vpop.f32.mrb[12].mxu1 }
 0xfba   :  { %v6781_v36 = vpack.c.bf16 %v6775_v60, %v6775_v60  ;;  %v8380_v6 = vpop.f32.mrb[13].mxu1 }
 0xfbb   :  { %v6778_v26 = vpop.f32.mrb[14].mxu1 }
 0xfbc   :  { %8387 = vmatmul.mubr.msk.bf16.vlgmr.msra.gmra.mrb[16].mxu1 %vm5730_vm3, %v6781_v36  ;;  %v8381_v14 = vpop.f32.mrb[15].mxu1 }
 0xfbd   :  { %8391 = vmatpush3.bf16.msra.mxu1 %v9374_v31  ;;  %8394 = vmatprep.mubr.msk.bf16.mxu1 %vm9654_vm2, %v9653_v1 }
 0xfbe   :  { %8392 = vmatprep.subr.bf16.mxu1 %v9653_v1 }
 0xfc1   :  { %8393 = vmatpush3.bf16.msra.mxu1 %v9375_v19 }
 0xfc2   :  { %8398 = vmatprep.subr.bf16.mxu1 %v9653_v1 }
 0xfc4   :  { %8395 = vmatmul.mubr.msk.bf16.vlgmr.msra.gmra.mrb[20].mxu1 %vm5730_vm3, %v6781_v36 }
 0xfc5   :  { %8399 = vmatpush3.bf16.msra.mxu1 %v9376_v12  ;;  %8402 = vmatprep.mubr.msk.bf16.mxu1 %vm9654_vm2, %v9653_v1 }
 0xfc6   :  { %8400 = vmatprep.subr.bf16.mxu1 %v9653_v1 }
 0xfc9   :  { %8401 = vmatpush3.bf16.msra.mxu1 %v9377_v50 }
 0xfca   :  { %8406 = vmatprep.subr.bf16.mxu1 %v9653_v1 }
 0xfcc   :  { %8403 = vmatmul.mubr.msk.bf16.vlgmr.msra.gmra.mrb[24].mxu1 %vm5730_vm3, %v6781_v36 }
 0xfcd   :  { %8407 = vmatpush3.bf16.msra.mxu1 %v9378_v44  ;;  %8410 = vmatprep.mubr.msk.bf16.mxu1 %vm9654_vm2, %v9653_v1 }
 0xfce   :  { %8408 = vmatprep.subr.bf16.mxu1 %v9653_v1 }
 0xfd1   :  { %8409 = vmatpush3.bf16.msra.mxu1 %v9379_v30 }
 0xfd2   :  { %8414 = vmatprep.subr.mxu1 %v9653_v1 }
 0xfd4   :  { %8411 = vmatmul.mubr.msk.bf16.vlgmr.msra.gmra.mrb[28].mxu1 %vm5730_vm3, %v6781_v36 }
 0xfd5   :  { %8416 = vmatprep.mubr.msk.f32.mxu1 %vm9654_vm2, %v9653_v1  ;;  %8415 = vmatpush3.msk.msra.mxu1 %vm3453_vm0, %v7080_v55 }
 0xfd6   :  { %8419 = vmatprep.subr.mxu1 %v9653_v1 }
0x108f   :  { %v6842_v59 = vpop.f32.mrb[16].mxu1 }
0x1090   :  { %v8388_v25 = vpop.f32.mrb[17].mxu1  ;;  %v6843_v41 = vadd.f32 %v7741_v27, %v6842_v59 }
0x1091   :  { %v6845_v8 = vpop.f32.mrb[18].mxu1 }
0x1092   :  { %v8389_v15 = vpop.f32.mrb[19].mxu1  ;;  %v6854_v32 = vmul.f32 %v6852_v58, %v6843_v41 }
0x1097   :  { %v6914_v53 = vpop.f32.mrb[20].mxu1 }
0x1098   :  { %v6915_v63 = vadd.f32 %v7749_v23, %v6914_v53  ;;  %v8396_v4 = vpop.f32.mrb[21].mxu1 }
0x1099   :  { %v6917_v39 = vpop.f32.mrb[22].mxu1 }
0x109a   :  { %v6927_v33 = vmul.f32 %v6925_v51, %v6915_v63  ;;  %v8397_v13 = vpop.f32.mrb[23].mxu1 }
0x109c   :  { %v6928_v24 = vadd.f32 %v6927_v33, %v6854_v32 }
0x109f   :  { %v6988_v61 = vpop.f32.mrb[24].mxu1 }
0x10a0   :  { %v6989_v47 = vadd.f32 %v7758_v37, %v6988_v61  ;;  %v8404_v42 = vpop.f32.mrb[25].mxu1 }
0x10a1   :  { %v6991_v56 = vpop.f32.mrb[26].mxu1 }
0x10a2   :  { %v7001_v40 = vmul.f32 %v6999_v57, %v6989_v47  ;;  %v8405_v52 = vpop.f32.mrb[27].mxu1 }
0x10a4   :  { %v7002_v11 = vadd.f32 %v7001_v40, %v6928_v24 }
0x10a7   :  { %v7062_v18 = vpop.f32.mrb[28].mxu1 }
0x10a8   :  { %v7063_v43 = vadd.f32 %v7767_v7, %v7062_v18  ;;  %v8412_v10 = vpop.f32.mrb[29].mxu1 }
0x10a9   :  { %v7065_v62 = vpop.f32.mrb[30].mxu1 }
0x10aa   :  { %v7075_v16 = vmul.f32 %v7073_v49, %v7063_v43  ;;  %v8413_v0 = vpop.f32.mrb[31].mxu1 }
0x10ac   :  { %v7076_v20 = vadd.f32 %v7075_v16, %v7002_v11 }
0x10ae   :  { %9380 = vtanh.f32 %v7076_v20 }
0x10b8   :  { %v9381_v34 = vpop.eup %9380 }
0x10b9   :  { %7079 = vst.msk [vmem:[%s10784_s20] sm:$0xff] %vm7078_vm6, %v9381_v34  ;;  %8417 = vmatmul.mubr.msk.f32.vlgmr.msra.gmra.mrb[32].mxu1 %vm7078_vm6, %v9381_v34  ;;  %v7161_v2 = vrot.slane %v9381_v34, 4 }
0x10ba   :  { %8420 = vmatpush3.msk.msra.mxu1 %vm3453_vm0, %v7774_v17  ;;  %8421 = vmatprep.mubr.msk.f32.mxu1 %vm9654_vm2, %v9653_v1 }
0x10bd   :  { %8422 = vmatmul.mubr.msk.f32.vlgmr.msra.gmra.mrb[34].mxu1 %vm7078_vm6, %v7161_v2 }
0x118c   :  { %v7153_v38 = vpop.f32.mrb[32].mxu1 }
0x118d   :  { %7158 = vst.msk [vmem:[%s10785_s21] sm:$0xf] %vm7157_vm7, %v7153_v38  ;;  %v8418_v5 = vpop.f32.mrb[33].mxu1 }
0x1190   :  { %v7233_v46 = vpop.f32.mrb[34].mxu1 }
0x1191   :  { %7777 = vst.msk [vmem:[%s10785_s21 + $0x4] sm:$0xf] %vm7157_vm7, %v7233_v46  ;;  %v8423_v45 = vpop.f32.mrb[35].mxu1 }
0x1192   :  { %7247 = vsyncpa [#allocation3], 1 }
0x1193   :  { %7248 = vsyncpa [#allocation5], 1 }
0x1194   :  { %7249 = vsyncpa [#allocation8], 1 }
0x1195   :  { %7250 = vsyncpa [#allocation11], 1 }
0x1196   :  { %7251 = vsyncpa [#allocation14], 1 }
0x1197   :  { %7252 = vsyncpa [#allocation17], 1 }

</bundles_post_ra>
